<compile_context>
chip_gen: v6e
topology: v6e:2x2x1
jax: 0.10.0
libtpu: 0.0.40
codegen_flags: <defaults>
</compile_context>

<pallas_src>
import jax
import jax.numpy as jnp
from jax.experimental import pallas as pl
from jax.experimental.pallas import tpu as pltpu


def bottleneck_kernel(x_ref, w1_ref, b1_ref, w2_ref, b2_ref, w3_ref, b3_ref,
                      o_ref, pad_ref):
    B, Hp2, W, planes = pad_ref.shape
    H = Hp2 - 2
    cin = x_ref.shape[-1]
    cout = w3_ref.shape[-1]
    M = B * H * W

    # ---- conv1 (1x1, BN1 folded) + bias + ReLU ------------------------------
    x2d = x_ref[...].reshape(M, cin)                        # f32, free reshape
    h1 = jnp.dot(x2d.astype(jnp.bfloat16), w1_ref[...],
                 preferred_element_type=jnp.float32)
    h1 = jnp.maximum(h1 + b1_ref[...], 0.0)                 # (M, planes) f32

    # Stage the conv2 input in a bf16 scratch padded along H only.  All stores
    # are full-width, sublane-aligned row slabs (no 1-column halo writes, no
    # sublane-offset interior write).  Halo rows are re-zeroed every step so
    # correctness holds for any megacore split of the parallel batch axis.
    zero_row = jnp.zeros((B, 1, W, planes), jnp.bfloat16)
    pad_ref[:, 0:1, :, :] = zero_row
    pad_ref[:, H + 1:H + 2, :, :] = zero_row
    pad_ref[:, 1:H + 1, :, :] = h1.astype(jnp.bfloat16).reshape(B, H, W, planes)

    # ---- conv2 (3x3, stride 1, pad 1, BN2 folded) + bias + ReLU --------------
    # For each horizontal tap kx, sum the 3 vertical taps (aligned outer-dim
    # slices of the padded scratch) with accumulating MXU matmuls; then apply
    # the +/-1 column shift to the f32 partial with pltpu.roll (XLU) plus an
    # edge mask instead of a misaligned slice / im2col patch.
    def tap_sum(kx):
        s = None
        for ky in range(3):                                  # w2_ref is (ky,kx,ci,co)
            rows = pad_ref[:, ky:ky + H, :, :].reshape(M, planes)   # bf16
            d = jnp.dot(rows, w2_ref[ky, kx],
                        preferred_element_type=jnp.float32)
            s = d if s is None else s + d
        return s                                             # (M, planes) f32

    # Column index of every row of the fused (M, planes) layout.
    x_pos = jax.lax.broadcasted_iota(jnp.int32, (M, 1), 0) % W

    h2 = tap_sum(1) + b2_ref[...]                            # center tap (kx=1)
    # kx = 0 tap: out[., x] += P0[., x-1]  -> roll forward by 1 row, kill x == 0.
    p_left = pltpu.roll(tap_sum(0), 1, axis=0)
    h2 = h2 + jnp.where(x_pos > 0, p_left, 0.0)
    # kx = 2 tap: out[., x] += P2[., x+1]  -> roll backward by 1 row, kill x == W-1.
    p_right = pltpu.roll(tap_sum(2), M - 1, axis=0)
    h2 = h2 + jnp.where(x_pos < W - 1, p_right, 0.0)
    h2 = jnp.maximum(h2, 0.0)                                # (M, planes) f32

    # ---- conv3 (1x1, BN3 folded) + bias --------------------------------------
    h3 = jnp.dot(h2.astype(jnp.bfloat16), w3_ref[...],
                 preferred_element_type=jnp.float32) + b3_ref[...]

    # ---- identity residual (Cin == Cout) + ReLU -------------------------------
    out = jnp.maximum(h3 + x_ref[...].reshape(M, cout), 0.0)
    o_ref[...] = out.reshape(B, H, W, cout)


def _pick_block_n(n, max_b=8):
    """Largest divisor of n <= max_b, preferring >= 2 grid blocks so the
    'parallel' batch axis can be split across TensorCores (v7x megacore)."""
    divisors = [b for b in range(1, min(n, max_b) + 1) if n % b == 0]
    multi = [b for b in divisors if n // b >= 2]
    return max(multi) if multi else max(divisors)


def bottleneck_pallas(x, w1, b1, w2, b2, w3, b3, *, max_images_per_block=8):
    """Fused bottleneck forward.

    x:  (N, H, W, Cin) f32.
    w1: (Cin, planes)      bf16, BN1 folded.       b1: (1, planes) f32.
    w2: (3, 3, planes, planes) bf16 (HWIO), BN2 folded.  b2: (1, planes) f32.
    w3: (planes, Cout)     bf16, BN3 folded.       b3: (1, Cout) f32.
    Requires stride 1 and Cin == Cout (identity shortcut).
    """
    N, H, W, cin = x.shape
    planes = w1.shape[1]
    cout = w3.shape[1]
    assert cin == cout, "identity shortcut requires inplanes == 4*planes"
    assert w2.shape == (3, 3, planes, planes)
    assert W % 8 == 0, "W must be a multiple of 8 (sublane-aligned reshapes)"

    block_n = _pick_block_n(N, max_images_per_block)
    grid = (N // block_n,)

    def full_spec(shape):
        zeros = (0,) * len(shape)
        return pl.BlockSpec(shape, lambda n, _z=zeros: _z)

    flops = 2 * N * H * W * (cin * planes + 9 * planes * planes + planes * cout)
    bytes_accessed = (sum(int(a.size) * a.dtype.itemsize
                          for a in (x, w1, b1, w2, b2, w3, b3))
                      + N * H * W * cout * 4)

    # Explicit VMEM budget with headroom (double-buffered I/O blocks + weights
    # + bf16 scratch), capped below v7x's 64 MiB physical VMEM.
    w_bytes = sum(int(a.size) * a.dtype.itemsize
                  for a in (w1, b1, w2, b2, w3, b3))
    x_blk = block_n * H * W * cin * 4
    o_blk = block_n * H * W * cout * 4
    scratch_bytes = block_n * (H + 2) * W * max(planes, 128) * 2
    vmem_limit = int(min(max(2 * (x_blk + o_blk) + 2 * w_bytes + scratch_bytes
                             + (4 << 20), 16 << 20), 64 << 20))

    return pl.pallas_call(
        bottleneck_kernel,
        out_shape=jax.ShapeDtypeStruct((N, H, W, cout), jnp.float32),
        grid=grid,
        in_specs=[
            pl.BlockSpec((block_n, H, W, cin), lambda n: (n, 0, 0, 0)),
            full_spec(w1.shape), full_spec(b1.shape),
            full_spec(w2.shape), full_spec(b2.shape),
            full_spec(w3.shape), full_spec(b3.shape),
        ],
        out_specs=pl.BlockSpec((block_n, H, W, cout), lambda n: (n, 0, 0, 0)),
        scratch_shapes=[pltpu.VMEM((block_n, H + 2, W, planes), jnp.bfloat16)],
        compiler_params=pltpu.CompilerParams(
            dimension_semantics=("parallel",),
            vmem_limit_bytes=vmem_limit),
        cost_estimate=pl.CostEstimate(
            flops=flops, transcendentals=0, bytes_accessed=bytes_accessed),
    )(x, w1, b1, w2, b2, w3, b3)


def fold_bn(gamma, beta, mean, var, eps=1e-5):
    scale = gamma / jnp.sqrt(var + eps)
    bias = beta - mean * scale
    return scale, bias


def reference_nhwc(x, w1_bf16, b1, w2_hwio_bf16, b2, w3_bf16, b3):
    # Mirrors the kernel numerics: bf16 conv operands, f32 accumulation,
    # f32 bias / ReLU / residual.
    dn = ('NHWC', 'HWIO', 'NHWC')
    h = jax.lax.conv_general_dilated(
        x.astype(jnp.bfloat16), w1_bf16[None, None], (1, 1), 'VALID',
        dimension_numbers=dn, preferred_element_type=jnp.float32)
    h = jnp.maximum(h + b1, 0.0)
    h = jax.lax.conv_general_dilated(
        h.astype(jnp.bfloat16), w2_hwio_bf16, (1, 1), ((1, 1), (1, 1)),
        dimension_numbers=dn, preferred_element_type=jnp.float32)
    h = jnp.maximum(h + b2, 0.0)
    h = jax.lax.conv_general_dilated(
        h.astype(jnp.bfloat16), w3_bf16[None, None], (1, 1), 'VALID',
        dimension_numbers=dn, preferred_element_type=jnp.float32)
    h = h + b3
    return jnp.maximum(h + x, 0.0)


if __name__ == "__main__":
    # Bottleneck(inplanes=256, planes=64), stride=1, no downsample, no CBAM,
    # BatchNorm in eval mode -> identity residual, BN folded into conv weights.
    N, H, W = 2, 16, 16
    planes = 64
    inplanes = planes * 4     # 256
    cout = planes * 4         # 256

    key = jax.random.PRNGKey(0)
    ks = jax.random.split(key, 8)

    x = jax.random.normal(ks[0], (N, H, W, inplanes), dtype=jnp.float32)

    # conv weights (channels-last: (Cin, Cout) for 1x1, HWIO for 3x3)
    w1 = jax.random.normal(ks[1], (inplanes, planes), jnp.float32) * 0.05
    w2 = jax.random.normal(ks[2], (3, 3, planes, planes), jnp.float32) * 0.05
    w3 = jax.random.normal(ks[3], (planes, cout), jnp.float32) * 0.05

    # BatchNorm params (inference / running-stats form)
    def bn_params(k, c):
        k1, k2, k3, k4 = jax.random.split(k, 4)
        gamma = 1.0 + 0.1 * jax.random.normal(k1, (c,), jnp.float32)
        beta = 0.1 * jax.random.normal(k2, (c,), jnp.float32)
        mean = 0.1 * jax.random.normal(k3, (c,), jnp.float32)
        var = 0.5 + jnp.abs(jax.random.normal(k4, (c,), jnp.float32))
        return gamma, beta, mean, var

    s1, b1 = fold_bn(*bn_params(ks[4], planes))
    s2, b2 = fold_bn(*bn_params(ks[5], planes))
    s3, b3 = fold_bn(*bn_params(ks[6], cout))

    # Fold BN scales into the conv weights; cast weights to bf16 for the MXU.
    w1f = (w1 * s1[None, :]).astype(jnp.bfloat16)
    w2f = (w2 * s2[None, None, None, :]).astype(jnp.bfloat16)   # (3,3,P,P) HWIO
    w3f = (w3 * s3[None, :]).astype(jnp.bfloat16)
    b1k, b2k, b3k = b1[None, :], b2[None, :], b3[None, :]

    out = bottleneck_pallas(x, w1f, b1k, w2f, b2k, w3f, b3k)
    out = jax.block_until_ready(out)

    ref = reference_nhwc(x, w1f, b1k, w2f, b2k, w3f, b3k)
    assert out.shape == (N, H, W, cout)
    max_err = jnp.max(jnp.abs(out - ref))
    assert jnp.allclose(out, ref, rtol=1e-2, atol=1e-2), f"max abs err {max_err}"

    print("KERNEL_OK")
</pallas_src>

<mosaic_0001>
module attributes {stable_mosaic.version = 11 : i64} {
  func.func @bottleneck_kernel(%arg0: i32, %arg1: memref<1x16x16x256xf32, #tpu.memory_space<vmem>>, %arg2: memref<256x64xbf16, #tpu.memory_space<vmem>>, %arg3: memref<1x64xf32, #tpu.memory_space<vmem>>, %arg4: memref<3x3x64x64xbf16, #tpu.memory_space<vmem>>, %arg5: memref<1x64xf32, #tpu.memory_space<vmem>>, %arg6: memref<64x256xbf16, #tpu.memory_space<vmem>>, %arg7: memref<1x256xf32, #tpu.memory_space<vmem>>, %arg8: memref<1x16x16x256xf32, #tpu.memory_space<vmem>>, %arg9: memref<1x18x16x64xbf16, #tpu.memory_space<vmem>>) attributes {dimension_semantics = [#tpu.dimension_semantics<parallel>], iteration_bounds = array<i64: 2>, scalar_prefetch = 0 : i64, scratch_operands = 1 : i64, tpu.core_type = #tpu.core_type<tc>, window_params = [{transform_indices = @transform_0, window_bounds = array<i64: 1, 16, 16, 256>}, {pipeline_mode = #tpu.pipeline_mode<synchronous>, transform_indices = @transform_1, window_bounds = array<i64: 256, 64>}, {pipeline_mode = #tpu.pipeline_mode<synchronous>, transform_indices = @transform_2, window_bounds = array<i64: 1, 64>}, {pipeline_mode = #tpu.pipeline_mode<synchronous>, transform_indices = @transform_3, window_bounds = array<i64: 3, 3, 64, 64>}, {pipeline_mode = #tpu.pipeline_mode<synchronous>, transform_indices = @transform_4, window_bounds = array<i64: 1, 64>}, {pipeline_mode = #tpu.pipeline_mode<synchronous>, transform_indices = @transform_5, window_bounds = array<i64: 64, 256>}, {pipeline_mode = #tpu.pipeline_mode<synchronous>, transform_indices = @transform_6, window_bounds = array<i64: 1, 256>}, {transform_indices = @transform_7, window_bounds = array<i64: 1, 16, 16, 256>}]} {
    %c0 = arith.constant 0 : index
    %c0_0 = arith.constant 0 : index
    %c0_1 = arith.constant 0 : index
    %c0_2 = arith.constant 0 : index
    %0 = vector.load %arg1[%c0, %c0_0, %c0_1, %c0_2] : memref<1x16x16x256xf32, #tpu.memory_space<vmem>>, vector<1x16x16x256xf32>
    %1 = vector.shape_cast %0 : vector<1x16x16x256xf32> to vector<256x256xf32>
    %2 = arith.truncf %1 : vector<256x256xf32> to vector<256x256xbf16>
    %c0_3 = arith.constant 0 : index
    %c0_4 = arith.constant 0 : index
    %3 = vector.load %arg2[%c0_3, %c0_4] : memref<256x64xbf16, #tpu.memory_space<vmem>>, vector<256x64xbf16>
    %cst = arith.constant dense<0.000000e+00> : vector<256x64xf32>
    %4 = tpu.matmul %2, %3, %cst {dimension_numbers = #tpu.dot_dimension_numbers<[1], [0], [0], [1], [0, 0, 1, 1], [], []>} : vector<256x256xbf16>, vector<256x64xbf16>, vector<256x64xf32> -> vector<256x64xf32>
    %c0_5 = arith.constant 0 : index
    %c0_6 = arith.constant 0 : index
    %5 = vector.load %arg3[%c0_5, %c0_6] : memref<1x64xf32, #tpu.memory_space<vmem>>, vector<1x64xf32>
    %6 = vector.broadcast %5 : vector<1x64xf32> to vector<256x64xf32>
    %7 = arith.addf %4, %6 : vector<256x64xf32>
    %cst_7 = arith.constant 0.000000e+00 : f32
    %8 = vector.broadcast %cst_7 : f32 to vector<256x64xf32>
    %9 = arith.maximumf %7, %8 : vector<256x64xf32>
    %cst_8 = arith.constant 0.000000e+00 : bf16
    %10 = vector.broadcast %cst_8 : bf16 to vector<1x1x16x64xbf16>
    %c0_9 = arith.constant 0 : index
    %c0_10 = arith.constant 0 : index
    %c0_11 = arith.constant 0 : index
    %c0_12 = arith.constant 0 : index
    %11 = vector.load %arg9[%c0_9, %c0_10, %c0_11, %c0_12] : memref<1x18x16x64xbf16, #tpu.memory_space<vmem>>, vector<1x1x16x64xbf16>
    tpu.vector_store %arg9[%c0_9, %c0_10, %c0_11, %c0_12], %10 {strides = array<i32>} : memref<1x18x16x64xbf16, #tpu.memory_space<vmem>>, vector<1x1x16x64xbf16>,
    %c0_13 = arith.constant 0 : index
    %c17 = arith.constant 17 : index
    %c0_14 = arith.constant 0 : index
    %c0_15 = arith.constant 0 : index
    %12 = vector.load %arg9[%c0_13, %c17, %c0_14, %c0_15] : memref<1x18x16x64xbf16, #tpu.memory_space<vmem>>, vector<1x1x16x64xbf16>
    tpu.vector_store %arg9[%c0_13, %c17, %c0_14, %c0_15], %10 {strides = array<i32>} : memref<1x18x16x64xbf16, #tpu.memory_space<vmem>>, vector<1x1x16x64xbf16>,
    %13 = arith.truncf %9 : vector<256x64xf32> to vector<256x64xbf16>
    %14 = vector.shape_cast %13 : vector<256x64xbf16> to vector<1x16x16x64xbf16>
    %c0_16 = arith.constant 0 : index
    %c1 = arith.constant 1 : index
    %c0_17 = arith.constant 0 : index
    %c0_18 = arith.constant 0 : index
    %15 = vector.load %arg9[%c0_16, %c1, %c0_17, %c0_18] : memref<1x18x16x64xbf16, #tpu.memory_space<vmem>>, vector<1x16x16x64xbf16>
    tpu.vector_store %arg9[%c0_16, %c1, %c0_17, %c0_18], %14 {strides = array<i32>} : memref<1x18x16x64xbf16, #tpu.memory_space<vmem>>, vector<1x16x16x64xbf16>,
    %16 = tpu.iota {dimensions = array<i32: 0>} : vector<256x1xi32>
    %c16_i32 = arith.constant 16 : i32
    %c0_i32 = arith.constant 0 : i32
    %17 = arith.cmpi eq, %c16_i32, %c0_i32 : i32
    %c1_i32 = arith.constant 1 : i32
    %18 = arith.select %17, %c1_i32, %c16_i32 : i32
    %19 = vector.broadcast %18 : i32 to vector<256x1xi32>
    %20 = arith.remsi %16, %19 : vector<256x1xi32>
    %c0_i32_19 = arith.constant 0 : i32
    %21 = vector.broadcast %c0_i32_19 : i32 to vector<256x1xi32>
    %22 = arith.cmpi ne, %20, %21 : vector<256x1xi32>
    %c0_i32_20 = arith.constant 0 : i32
    %23 = vector.broadcast %c0_i32_20 : i32 to vector<256x1xi32>
    %24 = arith.cmpi slt, %20, %23 : vector<256x1xi32>
    %c0_i32_21 = arith.constant 0 : i32
    %25 = arith.cmpi slt, %18, %c0_i32_21 : i32
    %26 = vector.broadcast %25 : i1 to vector<256x1xi1>
    %27 = vector.broadcast %26 : vector<256x1xi1> to vector<256x1xi1>
    %28 = arith.xori %24, %27 : vector<256x1xi1>
    %29 = arith.andi %28, %22 : vector<256x1xi1>
    %30 = vector.broadcast %18 : i32 to vector<256x1xi32>
    %31 = arith.addi %20, %30 : vector<256x1xi32>
    %32 = arith.select %29, %31, %20 : vector<256x1xi1>, vector<256x1xi32>
    %c0_22 = arith.constant 0 : index
    %c0_23 = arith.constant 0 : index
    %c0_24 = arith.constant 0 : index
    %c0_25 = arith.constant 0 : index
    %33 = vector.load %arg9[%c0_22, %c0_23, %c0_24, %c0_25] : memref<1x18x16x64xbf16, #tpu.memory_space<vmem>>, vector<1x16x16x64xbf16>
    %34 = vector.shape_cast %33 : vector<1x16x16x64xbf16> to vector<256x64xbf16>
    %c0_26 = arith.constant 0 : index
    %c1_27 = arith.constant 1 : index
    %c0_28 = arith.constant 0 : index
    %c0_29 = arith.constant 0 : index
    %35 = vector.load %arg4[%c0_26, %c1_27, %c0_28, %c0_29] : memref<3x3x64x64xbf16, #tpu.memory_space<vmem>>, vector<1x1x64x64xbf16>
    %36 = vector.shape_cast %35 : vector<1x1x64x64xbf16> to vector<64x64xbf16>
    %cst_30 = arith.constant dense<0.000000e+00> : vector<256x64xf32>
    %37 = tpu.matmul %34, %36, %cst_30 {dimension_numbers = #tpu.dot_dimension_numbers<[1], [0], [0], [1], [0, 0, 1, 1], [], []>} : vector<256x64xbf16>, vector<64x64xbf16>, vector<256x64xf32> -> vector<256x64xf32>
    %c0_31 = arith.constant 0 : index
    %c1_32 = arith.constant 1 : index
    %c0_33 = arith.constant 0 : index
    %c0_34 = arith.constant 0 : index
    %38 = vector.load %arg9[%c0_31, %c1_32, %c0_33, %c0_34] : memref<1x18x16x64xbf16, #tpu.memory_space<vmem>>, vector<1x16x16x64xbf16>
    %39 = vector.shape_cast %38 : vector<1x16x16x64xbf16> to vector<256x64xbf16>
    %c1_35 = arith.constant 1 : index
    %c1_36 = arith.constant 1 : index
    %c0_37 = arith.constant 0 : index
    %c0_38 = arith.constant 0 : index
    %40 = vector.load %arg4[%c1_35, %c1_36, %c0_37, %c0_38] : memref<3x3x64x64xbf16, #tpu.memory_space<vmem>>, vector<1x1x64x64xbf16>
    %41 = vector.shape_cast %40 : vector<1x1x64x64xbf16> to vector<64x64xbf16>
    %cst_39 = arith.constant dense<0.000000e+00> : vector<256x64xf32>
    %42 = tpu.matmul %39, %41, %cst_39 {dimension_numbers = #tpu.dot_dimension_numbers<[1], [0], [0], [1], [0, 0, 1, 1], [], []>} : vector<256x64xbf16>, vector<64x64xbf16>, vector<256x64xf32> -> vector<256x64xf32>
    %43 = arith.addf %37, %42 : vector<256x64xf32>
    %c0_40 = arith.constant 0 : index
    %c2 = arith.constant 2 : index
    %c0_41 = arith.constant 0 : index
    %c0_42 = arith.constant 0 : index
    %44 = vector.load %arg9[%c0_40, %c2, %c0_41, %c0_42] : memref<1x18x16x64xbf16, #tpu.memory_space<vmem>>, vector<1x16x16x64xbf16>
    %45 = vector.shape_cast %44 : vector<1x16x16x64xbf16> to vector<256x64xbf16>
    %c2_43 = arith.constant 2 : index
    %c1_44 = arith.constant 1 : index
    %c0_45 = arith.constant 0 : index
    %c0_46 = arith.constant 0 : index
    %46 = vector.load %arg4[%c2_43, %c1_44, %c0_45, %c0_46] : memref<3x3x64x64xbf16, #tpu.memory_space<vmem>>, vector<1x1x64x64xbf16>
    %47 = vector.shape_cast %46 : vector<1x1x64x64xbf16> to vector<64x64xbf16>
    %cst_47 = arith.constant dense<0.000000e+00> : vector<256x64xf32>
    %48 = tpu.matmul %45, %47, %cst_47 {dimension_numbers = #tpu.dot_dimension_numbers<[1], [0], [0], [1], [0, 0, 1, 1], [], []>} : vector<256x64xbf16>, vector<64x64xbf16>, vector<256x64xf32> -> vector<256x64xf32>
    %49 = arith.addf %43, %48 : vector<256x64xf32>
    %c0_48 = arith.constant 0 : index
    %c0_49 = arith.constant 0 : index
    %50 = vector.load %arg5[%c0_48, %c0_49] : memref<1x64xf32, #tpu.memory_space<vmem>>, vector<1x64xf32>
    %51 = vector.broadcast %50 : vector<1x64xf32> to vector<256x64xf32>
    %52 = arith.addf %49, %51 : vector<256x64xf32>
    %c0_50 = arith.constant 0 : index
    %c0_51 = arith.constant 0 : index
    %c0_52 = arith.constant 0 : index
    %c0_53 = arith.constant 0 : index
    %53 = vector.load %arg9[%c0_50, %c0_51, %c0_52, %c0_53] : memref<1x18x16x64xbf16, #tpu.memory_space<vmem>>, vector<1x16x16x64xbf16>
    %54 = vector.shape_cast %53 : vector<1x16x16x64xbf16> to vector<256x64xbf16>
    %c0_54 = arith.constant 0 : index
    %c0_55 = arith.constant 0 : index
    %c0_56 = arith.constant 0 : index
    %c0_57 = arith.constant 0 : index
    %55 = vector.load %arg4[%c0_54, %c0_55, %c0_56, %c0_57] : memref<3x3x64x64xbf16, #tpu.memory_space<vmem>>, vector<1x1x64x64xbf16>
    %56 = vector.shape_cast %55 : vector<1x1x64x64xbf16> to vector<64x64xbf16>
    %cst_58 = arith.constant dense<0.000000e+00> : vector<256x64xf32>
    %57 = tpu.matmul %54, %56, %cst_58 {dimension_numbers = #tpu.dot_dimension_numbers<[1], [0], [0], [1], [0, 0, 1, 1], [], []>} : vector<256x64xbf16>, vector<64x64xbf16>, vector<256x64xf32> -> vector<256x64xf32>
    %c0_59 = arith.constant 0 : index
    %c1_60 = arith.constant 1 : index
    %c0_61 = arith.constant 0 : index
    %c0_62 = arith.constant 0 : index
    %58 = vector.load %arg9[%c0_59, %c1_60, %c0_61, %c0_62] : memref<1x18x16x64xbf16, #tpu.memory_space<vmem>>, vector<1x16x16x64xbf16>
    %59 = vector.shape_cast %58 : vector<1x16x16x64xbf16> to vector<256x64xbf16>
    %c1_63 = arith.constant 1 : index
    %c0_64 = arith.constant 0 : index
    %c0_65 = arith.constant 0 : index
    %c0_66 = arith.constant 0 : index
    %60 = vector.load %arg4[%c1_63, %c0_64, %c0_65, %c0_66] : memref<3x3x64x64xbf16, #tpu.memory_space<vmem>>, vector<1x1x64x64xbf16>
    %61 = vector.shape_cast %60 : vector<1x1x64x64xbf16> to vector<64x64xbf16>
    %cst_67 = arith.constant dense<0.000000e+00> : vector<256x64xf32>
    %62 = tpu.matmul %59, %61, %cst_67 {dimension_numbers = #tpu.dot_dimension_numbers<[1], [0], [0], [1], [0, 0, 1, 1], [], []>} : vector<256x64xbf16>, vector<64x64xbf16>, vector<256x64xf32> -> vector<256x64xf32>
    %63 = arith.addf %57, %62 : vector<256x64xf32>
    %c0_68 = arith.constant 0 : index
    %c2_69 = arith.constant 2 : index
    %c0_70 = arith.constant 0 : index
    %c0_71 = arith.constant 0 : index
    %64 = vector.load %arg9[%c0_68, %c2_69, %c0_70, %c0_71] : memref<1x18x16x64xbf16, #tpu.memory_space<vmem>>, vector<1x16x16x64xbf16>
    %65 = vector.shape_cast %64 : vector<1x16x16x64xbf16> to vector<256x64xbf16>
    %c2_72 = arith.constant 2 : index
    %c0_73 = arith.constant 0 : index
    %c0_74 = arith.constant 0 : index
    %c0_75 = arith.constant 0 : index
    %66 = vector.load %arg4[%c2_72, %c0_73, %c0_74, %c0_75] : memref<3x3x64x64xbf16, #tpu.memory_space<vmem>>, vector<1x1x64x64xbf16>
    %67 = vector.shape_cast %66 : vector<1x1x64x64xbf16> to vector<64x64xbf16>
    %cst_76 = arith.constant dense<0.000000e+00> : vector<256x64xf32>
    %68 = tpu.matmul %65, %67, %cst_76 {dimension_numbers = #tpu.dot_dimension_numbers<[1], [0], [0], [1], [0, 0, 1, 1], [], []>} : vector<256x64xbf16>, vector<64x64xbf16>, vector<256x64xf32> -> vector<256x64xf32>
    %69 = arith.addf %63, %68 : vector<256x64xf32>
    %c1_i32_77 = arith.constant 1 : i32
    %70 = tpu.dynamic_rotate %69 by %c1_i32_77 dim 0 : vector<256x64xf32>, i32 -> vector<256x64xf32>
    %c0_i32_78 = arith.constant 0 : i32
    %71 = vector.broadcast %c0_i32_78 : i32 to vector<256x1xi32>
    %72 = arith.cmpi sgt, %32, %71 : vector<256x1xi32>
    %cst_79 = arith.constant 0.000000e+00 : f32
    %73 = vector.shape_cast %72 : vector<256x1xi1> to vector<256x1xi1>
    %74 = vector.broadcast %73 : vector<256x1xi1> to vector<256x64xi1>
    %75 = vector.broadcast %cst_79 : f32 to vector<256x64xf32>
    %76 = arith.select %74, %70, %75 : vector<256x64xi1>, vector<256x64xf32>
    %77 = arith.addf %52, %76 : vector<256x64xf32>
    %c0_80 = arith.constant 0 : index
    %c0_81 = arith.constant 0 : index
    %c0_82 = arith.constant 0 : index
    %c0_83 = arith.constant 0 : index
    %78 = vector.load %arg9[%c0_80, %c0_81, %c0_82, %c0_83] : memref<1x18x16x64xbf16, #tpu.memory_space<vmem>>, vector<1x16x16x64xbf16>
    %79 = vector.shape_cast %78 : vector<1x16x16x64xbf16> to vector<256x64xbf16>
    %c0_84 = arith.constant 0 : index
    %c2_85 = arith.constant 2 : index
    %c0_86 = arith.constant 0 : index
    %c0_87 = arith.constant 0 : index
    %80 = vector.load %arg4[%c0_84, %c2_85, %c0_86, %c0_87] : memref<3x3x64x64xbf16, #tpu.memory_space<vmem>>, vector<1x1x64x64xbf16>
    %81 = vector.shape_cast %80 : vector<1x1x64x64xbf16> to vector<64x64xbf16>
    %cst_88 = arith.constant dense<0.000000e+00> : vector<256x64xf32>
    %82 = tpu.matmul %79, %81, %cst_88 {dimension_numbers = #tpu.dot_dimension_numbers<[1], [0], [0], [1], [0, 0, 1, 1], [], []>} : vector<256x64xbf16>, vector<64x64xbf16>, vector<256x64xf32> -> vector<256x64xf32>
    %c0_89 = arith.constant 0 : index
    %c1_90 = arith.constant 1 : index
    %c0_91 = arith.constant 0 : index
    %c0_92 = arith.constant 0 : index
    %83 = vector.load %arg9[%c0_89, %c1_90, %c0_91, %c0_92] : memref<1x18x16x64xbf16, #tpu.memory_space<vmem>>, vector<1x16x16x64xbf16>
    %84 = vector.shape_cast %83 : vector<1x16x16x64xbf16> to vector<256x64xbf16>
    %c1_93 = arith.constant 1 : index
    %c2_94 = arith.constant 2 : index
    %c0_95 = arith.constant 0 : index
    %c0_96 = arith.constant 0 : index
    %85 = vector.load %arg4[%c1_93, %c2_94, %c0_95, %c0_96] : memref<3x3x64x64xbf16, #tpu.memory_space<vmem>>, vector<1x1x64x64xbf16>
    %86 = vector.shape_cast %85 : vector<1x1x64x64xbf16> to vector<64x64xbf16>
    %cst_97 = arith.constant dense<0.000000e+00> : vector<256x64xf32>
    %87 = tpu.matmul %84, %86, %cst_97 {dimension_numbers = #tpu.dot_dimension_numbers<[1], [0], [0], [1], [0, 0, 1, 1], [], []>} : vector<256x64xbf16>, vector<64x64xbf16>, vector<256x64xf32> -> vector<256x64xf32>
    %88 = arith.addf %82, %87 : vector<256x64xf32>
    %c0_98 = arith.constant 0 : index
    %c2_99 = arith.constant 2 : index
    %c0_100 = arith.constant 0 : index
    %c0_101 = arith.constant 0 : index
    %89 = vector.load %arg9[%c0_98, %c2_99, %c0_100, %c0_101] : memref<1x18x16x64xbf16, #tpu.memory_space<vmem>>, vector<1x16x16x64xbf16>
    %90 = vector.shape_cast %89 : vector<1x16x16x64xbf16> to vector<256x64xbf16>
    %c2_102 = arith.constant 2 : index
    %c2_103 = arith.constant 2 : index
    %c0_104 = arith.constant 0 : index
    %c0_105 = arith.constant 0 : index
    %91 = vector.load %arg4[%c2_102, %c2_103, %c0_104, %c0_105] : memref<3x3x64x64xbf16, #tpu.memory_space<vmem>>, vector<1x1x64x64xbf16>
    %92 = vector.shape_cast %91 : vector<1x1x64x64xbf16> to vector<64x64xbf16>
    %cst_106 = arith.constant dense<0.000000e+00> : vector<256x64xf32>
    %93 = tpu.matmul %90, %92, %cst_106 {dimension_numbers = #tpu.dot_dimension_numbers<[1], [0], [0], [1], [0, 0, 1, 1], [], []>} : vector<256x64xbf16>, vector<64x64xbf16>, vector<256x64xf32> -> vector<256x64xf32>
    %94 = arith.addf %88, %93 : vector<256x64xf32>
    %c255_i32 = arith.constant 255 : i32
    %95 = tpu.dynamic_rotate %94 by %c255_i32 dim 0 : vector<256x64xf32>, i32 -> vector<256x64xf32>
    %c15_i32 = arith.constant 15 : i32
    %96 = vector.broadcast %c15_i32 : i32 to vector<256x1xi32>
    %97 = arith.cmpi slt, %32, %96 : vector<256x1xi32>
    %cst_107 = arith.constant 0.000000e+00 : f32
    %98 = vector.shape_cast %97 : vector<256x1xi1> to vector<256x1xi1>
    %99 = vector.broadcast %98 : vector<256x1xi1> to vector<256x64xi1>
    %100 = vector.broadcast %cst_107 : f32 to vector<256x64xf32>
    %101 = arith.select %99, %95, %100 : vector<256x64xi1>, vector<256x64xf32>
    %102 = arith.addf %77, %101 : vector<256x64xf32>
    %cst_108 = arith.constant 0.000000e+00 : f32
    %103 = vector.broadcast %cst_108 : f32 to vector<256x64xf32>
    %104 = arith.maximumf %102, %103 : vector<256x64xf32>
    %105 = arith.truncf %104 : vector<256x64xf32> to vector<256x64xbf16>
    %c0_109 = arith.constant 0 : index
    %c0_110 = arith.constant 0 : index
    %106 = vector.load %arg6[%c0_109, %c0_110] : memref<64x256xbf16, #tpu.memory_space<vmem>>, vector<64x256xbf16>
    %cst_111 = arith.constant dense<0.000000e+00> : vector<256x256xf32>
    %107 = tpu.matmul %105, %106, %cst_111 {dimension_numbers = #tpu.dot_dimension_numbers<[1], [0], [0], [1], [0, 0, 1, 1], [], []>} : vector<256x64xbf16>, vector<64x256xbf16>, vector<256x256xf32> -> vector<256x256xf32>
    %c0_112 = arith.constant 0 : index
    %c0_113 = arith.constant 0 : index
    %108 = vector.load %arg7[%c0_112, %c0_113] : memref<1x256xf32, #tpu.memory_space<vmem>>, vector<1x256xf32>
    %109 = vector.broadcast %108 : vector<1x256xf32> to vector<256x256xf32>
    %110 = arith.addf %107, %109 : vector<256x256xf32>
    %c0_114 = arith.constant 0 : index
    %c0_115 = arith.constant 0 : index
    %c0_116 = arith.constant 0 : index
    %c0_117 = arith.constant 0 : index
    %111 = vector.load %arg1[%c0_114, %c0_115, %c0_116, %c0_117] : memref<1x16x16x256xf32, #tpu.memory_space<vmem>>, vector<1x16x16x256xf32>
    %112 = vector.shape_cast %111 : vector<1x16x16x256xf32> to vector<256x256xf32>
    %113 = arith.addf %110, %112 : vector<256x256xf32>
    %cst_118 = arith.constant 0.000000e+00 : f32
    %114 = vector.broadcast %cst_118 : f32 to vector<256x256xf32>
    %115 = arith.maximumf %113, %114 : vector<256x256xf32>
    %116 = vector.shape_cast %115 : vector<256x256xf32> to vector<1x16x16x256xf32>
    %c0_119 = arith.constant 0 : index
    %c0_120 = arith.constant 0 : index
    %c0_121 = arith.constant 0 : index
    %c0_122 = arith.constant 0 : index
    %117 = vector.load %arg8[%c0_119, %c0_120, %c0_121, %c0_122] : memref<1x16x16x256xf32, #tpu.memory_space<vmem>>, vector<1x16x16x256xf32>
    tpu.vector_store %arg8[%c0_119, %c0_120, %c0_121, %c0_122], %116 {strides = array<i32>} : memref<1x16x16x256xf32, #tpu.memory_space<vmem>>, vector<1x16x16x256xf32>,
    return
  }
  func.func @transform_0(%arg0: i32) -> (i32, i32, i32, i32) {
    %c0_i32 = arith.constant 0 : i32
    %c0_i32_0 = arith.constant 0 : i32
    %c0_i32_1 = arith.constant 0 : i32
    %c0_i32_2 = arith.constant 0 : i32
    return %arg0, %c0_i32, %c0_i32_0, %c0_i32_1 : i32, i32, i32, i32
  }
  func.func @transform_1(%arg0: i32) -> (i32, i32) {
    %c0_i32 = arith.constant 0 : i32
    %c0_i32_0 = arith.constant 0 : i32
    %c0_i32_1 = arith.constant 0 : i32
    return %c0_i32, %c0_i32_0 : i32, i32
  }
  func.func @transform_2(%arg0: i32) -> (i32, i32) {
    %c0_i32 = arith.constant 0 : i32
    %c0_i32_0 = arith.constant 0 : i32
    %c0_i32_1 = arith.constant 0 : i32
    return %c0_i32, %c0_i32_0 : i32, i32
  }
  func.func @transform_3(%arg0: i32) -> (i32, i32, i32, i32) {
    %c0_i32 = arith.constant 0 : i32
    %c0_i32_0 = arith.constant 0 : i32
    %c0_i32_1 = arith.constant 0 : i32
    %c0_i32_2 = arith.constant 0 : i32
    %c0_i32_3 = arith.constant 0 : i32
    return %c0_i32, %c0_i32_0, %c0_i32_1, %c0_i32_2 : i32, i32, i32, i32
  }
  func.func @transform_4(%arg0: i32) -> (i32, i32) {
    %c0_i32 = arith.constant 0 : i32
    %c0_i32_0 = arith.constant 0 : i32
    %c0_i32_1 = arith.constant 0 : i32
    return %c0_i32, %c0_i32_0 : i32, i32
  }
  func.func @transform_5(%arg0: i32) -> (i32, i32) {
    %c0_i32 = arith.constant 0 : i32
    %c0_i32_0 = arith.constant 0 : i32
    %c0_i32_1 = arith.constant 0 : i32
    return %c0_i32, %c0_i32_0 : i32, i32
  }
  func.func @transform_6(%arg0: i32) -> (i32, i32) {
    %c0_i32 = arith.constant 0 : i32
    %c0_i32_0 = arith.constant 0 : i32
    %c0_i32_1 = arith.constant 0 : i32
    return %c0_i32, %c0_i32_0 : i32, i32
  }
  func.func @transform_7(%arg0: i32) -> (i32, i32, i32, i32) {
    %c0_i32 = arith.constant 0 : i32
    %c0_i32_0 = arith.constant 0 : i32
    %c0_i32_1 = arith.constant 0 : i32
    %c0_i32_2 = arith.constant 0 : i32
    return %arg0, %c0_i32, %c0_i32_0, %c0_i32_1 : i32, i32, i32, i32
  }
}

</mosaic_0001>

<bundles_post_ra>
// kernel: tpu_custom_call.1
= control target key start
LH: loop header
LB: loop body
LE: loop exit
PB: predicated region body
PF: predicated region fallthrough
CT: control target
= control target key end

     0   :  { %s8384_s0 = inlined_call_operand.hbm [shape: f32[2,16,16,256], index: 0, kind: input, shape index: {}]   ;;  %s8385_s1 = inlined_call_operand.vmem [shape: bf16[256,64], index: 1, kind: input, shape index: {}]   ;;  %s8386_s2 = inlined_call_operand.vmem [shape: f32[1,64], index: 2, kind: input, shape index: {}]   ;;  %s8387_s3 = inlined_call_operand.hbm [shape: bf16[3,3,64,64], index: 3, kind: input, shape index: {}]   ;;  %s8388_s4 = inlined_call_operand.vmem [shape: f32[1,64], index: 4, kind: input, shape index: {}]   ;;  %s8389_s5 = inlined_call_operand.vmem [shape: bf16[64,256], index: 5, kind: input, shape index: {}]   ;;  %s8390_s6 = inlined_call_operand.vmem [shape: f32[1,256], index: 6, kind: input, shape index: {}]   ;;  %s8391_s7 = inlined_call_operand.hbm [shape: f32[2,16,16,256], index: 7, kind: output, shape index: {}]  }
   0x1   :  { %8409 = sst [smem:[#allocation48_spill]] %s8387_s3 }
   0x2   :  { %12 = vsyncpa [#allocation4], 0 }
   0x3   :  { %14 = vsyncpa [#allocation4 + $0x1], 0 }
   0x4   :  { %15 = vsyncpa [#allocation7], 0 }
   0x5   :  { %16 = vsyncpa [#allocation5], 0 }
   0x6   :  { %18 = vsyncpa [#allocation5 + $0x1], 0  ;;  %s6209_s24 = smov 0   ;;  %s6211_s25 = smov 0  }
   0x7   :  { %s6213_s26 = smov 0   ;;  %s6215_s27 = smov 0  }
   0x8 LB: > { %s6230_s28 = sadd.s32 4294967295, %s6157_s27   ;;  %s4835_s29 = sadd.s32 4294967294, %s6157_s27   ;;  %s6157_s27 = sphi %s6215_s27, %s8677_s27   ;;  %s6153_s26 = sphi %s6213_s26, %s8676_s26   ;;  %s6149_s25 = sphi %s6211_s25, %s8675_s25   ;;  %s6145_s24 = sphi %s6209_s24, %s8674_s24  }
   0x9   : > { %p44_p0 = scmp.ne.s32.totalorder %s6149_s25, %s6145_s24  ;;  %p8392_p1 = scmp.eq.s32.totalorder %s6230_s28, 0 }
   0xa   : > { %p200_p3 = scmp.eq.s32.totalorder %s4835_s29, 1  ;;  %p4836_p5 = scmp.ge.s32.totalorder %s6157_s27, 1 }
   0xb   : > { %p6239_p4 = por %p8392_p1, %p44_p0  ;;  %p207_p7 = scmp.lt.s32.totalorder %s6157_s27, 3 }
   0xc   : > { %p6244_p6 = por %p200_p3, %p44_p0  ;;  %s6159_s10 = smov [#allocation6]  }
   0xd   : > { %s8410_s30 = scalar_select %p6239_p4, 1, 0 }
   0xe   : > { %s8411_s8 = scalar_select %p6244_p6, 1, 0 }
   0xf   : > { %p6249_p8 = pnand %p4836_p5, %p207_p7  ;;  %s225_s11 = sshll.u32 %s6159_s10, 4  ;;  %s226_s11 = int_to_ptr.vmem [resolvable:$true] %s225_s11 }
  0x10   : > { %s6263_s13 = sadd.s32 1, %s6157_s27   ;;  %s31_s14 = sadd.s32 1, %s6153_s26 }
  0x11   : > { %s8412_s9 = scalar_select %p6249_p8, 1, 0 }
  0x12   : > { %p5855_p9 = pneg %p6249_p8  ;;  %s28_s15 = ssub.s32 %s6157_s27, %s6263_s13 }
  0x13   : > { %s6046_s16 = scalar_lea.vmem %s226_s11, 4608  ;;  %p6054_p5 = scmp.lt.s32.totalorder %s226_s11, %s226_s11 }
  0x14   : > { %p6258_p11 = pnand %p5855_p9, %p8392_p1  ;;  %p6047_p13 = scmp.ne.s32.totalorder %s226_s11, %s6046_s16 }
  0x15   : > { %p6055_p7 = scmp.lt.s32.totalorder %s6046_s16, %s6046_s16 }
  0x16   : > { %p6037_p12 = pneg %p6258_p11 }
  0x17   : > { %p6056_p10 = por %p6055_p7, %p6054_p5 }
  0x18   : > { %p6049_p0 = pnand %p6047_p13, %p6037_p12 }
  0x1a   : > { %p6050_p3 = pneg %p6049_p0 }
  0x1c   : > { %p6057_p2 = pnand %p6056_p10, %p6050_p3 }
  0x1e   : > { %6060 = shalt.err (!%p6057_p2)
}
  0x1f   : > { %s6160_s17 = smov 64   ;;  %s6161_s18 = smov 4  }
  0x20   : > { %s8414_s3 = sld [smem:[#allocation48_spill]]  ;;  %p29_p9 = scmp.eq.s32.totalorder %s28_s15, 0 }
  0x21   : > { %p38_p12 = scmp.ne.s32.totalorder %s6153_s26, %s6149_s25  ;;  %p39_p10 = scmp.eq.s32.totalorder %s6157_s27, 0 }
  0x22   : > { %p5868_p2 = scmp.lt.s32.totalorder %s6157_s27, 2  ;;  %p8415_p0 = scmp.eq.s32.totalorder %s6230_s28, 1 }
  0x23   : > { %s6280_s21 = scalar_select %p29_p9, %s6153_s26, %s31_s14  }
  0x24   : > { %p40_p13 = por %p39_p10, %p38_p12  ;;  %p6284_p3 = por %p8415_p0, %p38_p12 }
  0x25   : > { %s248_s23 = sand.u32 1, %s6153_s26   ;;  %s5153_s29 = sshll.u32 %s6157_s27, 13 }
  0x26   : > { %5858 = dma.hbm_to_vmem [thread:$0]  (!%p6258_p11), %s8414_s3, 4608, %s226_s11, [#allocation7], %s6160_s17, %s6160_s17, %s6161_s18  }
  0x27   : > { %s8416_s22 = scalar_select %p6284_p3, 1, 0 }
  0x28   : > { %s4839_s10 = sshll.u32 %s248_s23, 9  ;;  %s6293_s19 = scalar_lea.hbm %s8384_s0, %s5153_s29 }
  0x29   : > { %s252_s11 = scalar_lea.vmem [#allocation3], %s4839_s10  ;;  %p6295_p11 = pnand %p5868_p2, %p40_p13 }
  0x2a   : > { %s259_s14 = sshll.u32 %s252_s11, 4  ;;  %s6301_s17 = scalar_lea.sflag [#allocation4], %s248_s23  ;;  %s6299_s14 = int_to_ptr.vmem [resolvable:$true] %s259_s14 }
  0x2b   : > { %s6061_s18 = scalar_lea.hbm %s6293_s19, 8192  ;;  %p6063_p7 = pneg %p6295_p11 }
  0x2c   : > { %p6062_p5 = scmp.ne.s32.totalorder %s6293_s19, %s6061_s18  ;;  %s6066_s10 = scalar_lea.hbm %s8384_s0, 16384 }
  0x2d   : > { %p6067_p10 = scmp.lt.s32.totalorder %s6293_s19, %s8384_s0  ;;  %p6068_p2 = scmp.lt.s32.totalorder %s6066_s10, %s6061_s18 }
  0x2e   : > { %p6064_p9 = pnand %p6063_p7, %p6062_p5 }
  0x2f   : > { %p6069_p13 = por %p6068_p2, %p6067_p10 }
  0x30   : > { %p6065_p12 = pneg %p6064_p9 }
  0x32   : > { %p6070_p0 = pnand %p6069_p13, %p6065_p12 }
  0x34   : > { %6073 = shalt.err (!%p6070_p0)
}
  0x35   : > { %s6074_s23 = scalar_lea.vmem %s6299_s14, 8192  ;;  %s6162_s11 = smov [#allocation3]  }
  0x36   : > { %p6075_p1 = scmp.ne.s32.totalorder %s6299_s14, %s6074_s23  ;;  %s6079_s3 = sshll.u32 %s6162_s11, 4  ;;  %s6080_s3 = int_to_ptr.vmem [resolvable:$false] %s6079_s3 }
  0x37   : > { %s6081_s20 = scalar_lea.vmem %s6080_s3, 16384  ;;  %p6082_p9 = scmp.lt.s32.totalorder %s6299_s14, %s6080_s3 }
  0x38   : > { %p6077_p6 = pnand %p6075_p1, %p6063_p7  ;;  %p6083_p3 = scmp.lt.s32.totalorder %s6081_s20, %s6074_s23 }
  0x3a   : > { %p6078_p5 = pneg %p6077_p6  ;;  %p6084_p4 = por %p6083_p3, %p6082_p9 }
  0x3c   : > { %p6085_p8 = pnand %p6084_p4, %p6078_p5 }
  0x3e   : > { %6088 = shalt.err (!%p6085_p8)
}
  0x3f   : > { %s6163_s18 = smov 256   ;;  %s6164_s29 = smov 16  }
  0x40   : > { %5862 = dma.hbm_to_vmem [thread:$0]  (!%p6295_p11), %s6293_s19, 8192, %s6299_s14, %s6301_s17, %s6163_s18, %s6163_s18, %s6164_s29  }
  0x41   : > { %p8418_p1 = scmp.ne.s32.totalorder %s8412_s9, 0 }
  0x43   : > { %271 = sbr.rel (%p8418_p1) target bundleno = 1301 (0x515), region = 48 }
  0x48   : > { %s6325_s10 = sand.u32 1, %s6149_s25   ;;  %p8419_p4 = scmp.ne.s32.totalorder %s8410_s30, 0 }
  0x49   : > { %s4843_s3 = sshll.u32 %s6325_s10, 9  ;;  %s274_s12 = scalar_lea.sflag [#allocation4], %s6325_s10 }
  0x4a   : > { %s6331_s16 = scalar_lea.vmem [#allocation3], %s4843_s3 }
  0x4b   : > { %6132 = dma.done.wait (%p8419_p4), %s274_s12, 8192  }
  0x4c   : > { %6134 = vsyncadd (%p8419_p4), %s274_s12, 4294959104  ;;  %p8420_p6 = scmp.eq.s32.totalorder %s6230_s28, 0 }
  0x4e   : > { %6136 = dma.done.wait (%p8420_p6), [#allocation7], 4608   ;;  %p8421_p8 = pmov %p8420_p6 }
  0x4f   : > { %v5911_v0 = vld [vmem:[%s8385_s1 + $0x78] sm:$0xff]   ;;  %v5913_v2 = vld [vmem:[%s8385_s1 + $0x70] sm:$0xff]   ;;  %v5915_v4 = vld [vmem:[%s8385_s1 + $0x68] sm:$0xff]   ;;  %vm737_vm0 = vcmask 519168   ;;  %vm1507_vm1 = vcmask 523264   ;;  %s8147_s30 = scalar_lea.vmem [#allocation8], %s4843_s3 }
  0x50   : > { %6138 = vsyncadd (%p8421_p8), [#allocation7], 4294962688  ;;  %v5912_v1 = vld [vmem:[%s8385_s1 + $0x38] sm:$0xff]   ;;  %5187 = vmatprep.subr.bf16.mxu0 %v5911_v0  ;;  %v5914_v3 = vld [vmem:[%s8385_s1 + $0x30] sm:$0xff]   ;;  %s5186_s3 = sshll.u32 %s6230_s28, 13  ;;  %s4752_s11 = sshll.u32 %s8147_s30, 4  ;;  %s8339_s11 = int_to_ptr.vmem [resolvable:$true] %s4752_s11 }
  0x51   : > { %5188 = vmatpush3.bf16.msra.mxu0 %v5912_v1  ;;  %v5916_v5 = vld [vmem:[%s8385_s1 + $0x28] sm:$0xff]   ;;  %v5917_v6 = vld [vmem:[%s8385_s1 + $0x60] sm:$0xff]   ;;  %v5919_v8 = vld [vmem:[%s8385_s1 + $0x58] sm:$0xff]   ;;  %s8337_s29 = scalar_lea.hbm %s8391_s7, %s5186_s3  ;;  %s6089_s12 = scalar_lea.vmem %s8339_s11, 8192 }
  0x52   : > { %5189 = vmatprep.subr.bf16.mxu0 %v5913_v2  ;;  %v5918_v7 = vld [vmem:[%s8385_s1 + $0x20] sm:$0xff]   ;;  %v5920_v9 = vld [vmem:[%s8385_s1 + $0x18] sm:$0xff]   ;;  %v5921_v10 = vld [vmem:[%s8385_s1 + $0x50] sm:$0xff]   ;;  %p6090_p3 = scmp.ne.s32.totalorder %s8339_s11, %s6089_s12  ;;  %p8671_p11 = scmp.ne.s32.totalorder %s8416_s22, 0 }
  0x53   : > { %v314_v11 = vld [vmem:[%s6331_s16 + $0x8] sm:$0xff]  ;;  %v316_v12 = vld [vmem:[%s6331_s16 + $0x18] sm:$0xff]  ;;  %v5922_v14 = vld [vmem:[%s8385_s1 + $0x10] sm:$0xff]   ;;  %s6166_s28 = smov [#allocation8]  }
  0x54   : > { %v378_v13 = vpack.c.bf16 %v316_v12, %v314_v11  ;;  %v5923_v15 = vld [vmem:[%s8385_s1 + $0x48] sm:$0xff]   ;;  %v5925_v17 = vld [vmem:[%s8385_s1 + $0x40] sm:$0xff]   ;;  %v313_v19 = vld [vmem:[%s6331_s16] sm:$0xff]  ;;  %p6091_p7 = pnand %p6090_p3, %p8671_p11  ;;  %s6093_s9 = sshll.u32 %s6166_s28, 4  ;;  %s6094_s9 = int_to_ptr.vmem [resolvable:$false] %s6093_s9 }
  0x55   : > { %5190 = vmatpush3.bf16.msra.mxu0 %v5914_v3  ;;  %v5924_v16 = vld [vmem:[%s8385_s1 + $0x8] sm:$0xff]   ;;  %v5926_v18 = vld [vmem:[%s8385_s1] sm:$0xff]   ;;  %v318_v21 = vld [vmem:[%s6331_s16 + $0x28] sm:$0xff]  ;;  %s6095_s19 = scalar_lea.vmem %s6094_s9, 16384  ;;  %p6096_p10 = scmp.lt.s32.totalorder %s8339_s11, %s6094_s9 }
  0x56   : > { %5191 = vmatprep.subr.bf16.mxu0 %v5915_v4  ;;  %576 = vmatprep.mubr.bf16.mxu0 %v378_v13  ;;  %v315_v20 = vld [vmem:[%s6331_s16 + $0x10] sm:$0xff]  ;;  %v320_v22 = vld [vmem:[%s6331_s16 + $0x38] sm:$0xff]  ;;  %v317_v25 = vld [vmem:[%s6331_s16 + $0x20] sm:$0xff]  ;;  %p6092_p12 = pneg %p6091_p7  ;;  %p6097_p2 = scmp.lt.s32.totalorder %s6095_s19, %s6089_s12 }
  0x57   : > { %v377_v23 = vpack.c.bf16 %v315_v20, %v313_v19  ;;  %v380_v24 = vpack.c.bf16 %v320_v22, %v318_v21  ;;  %v319_v26 = vld [vmem:[%s6331_s16 + $0x30] sm:$0xff]  ;;  %v322_v27 = vld [vmem:[%s6331_s16 + $0x48] sm:$0xff]  ;;  %v324_v28 = vld [vmem:[%s6331_s16 + $0x58] sm:$0xff] }
  0x58   : > { %v379_v29 = vpack.c.bf16 %v319_v26, %v317_v25  ;;  %v382_v30 = vpack.c.bf16 %v324_v28, %v322_v27  ;;  %v321_v31 = vld [vmem:[%s6331_s16 + $0x40] sm:$0xff]  ;;  %v323_v32 = vld [vmem:[%s6331_s16 + $0x50] sm:$0xff]  ;;  %v326_v33 = vld [vmem:[%s6331_s16 + $0x68] sm:$0xff]  ;;  %p6098_p13 = por %p6097_p2, %p6096_p10 }
  0x59   : > { %5192 = vmatpush3.bf16.msra.mxu0 %v5916_v5  ;;  %v328_v34 = vld [vmem:[%s6331_s16 + $0x78] sm:$0xff]  ;;  %v381_v35 = vpack.c.bf16 %v323_v32, %v321_v31  ;;  %v325_v37 = vld [vmem:[%s6331_s16 + $0x60] sm:$0xff]  ;;  %v327_v38 = vld [vmem:[%s6331_s16 + $0x70] sm:$0xff] }
  0x5a   : > { %5193 = vmatprep.subr.bf16.mxu0 %v5917_v6  ;;  %v384_v36 = vpack.c.bf16 %v328_v34, %v326_v33  ;;  %v330_v39 = vld [vmem:[%s6331_s16 + $0x88] sm:$0xff]  ;;  %v332_v40 = vld [vmem:[%s6331_s16 + $0x98] sm:$0xff]  ;;  %v383_v41 = vpack.c.bf16 %v327_v38, %v325_v37  ;;  %v329_v43 = vld [vmem:[%s6331_s16 + $0x80] sm:$0xff]  ;;  %p6099_p0 = pnand %p6098_p13, %p6092_p12 }
  0x5b   : > { %v386_v42 = vpack.c.bf16 %v332_v40, %v330_v39  ;;  %v331_v44 = vld [vmem:[%s6331_s16 + $0x90] sm:$0xff]  ;;  %v334_v45 = vld [vmem:[%s6331_s16 + $0xa8] sm:$0xff]  ;;  %v336_v46 = vld [vmem:[%s6331_s16 + $0xb8] sm:$0xff] }
  0x5c   : > { %v385_v47 = vpack.c.bf16 %v331_v44, %v329_v43  ;;  %v388_v48 = vpack.c.bf16 %v336_v46, %v334_v45  ;;  %v333_v49 = vld [vmem:[%s6331_s16 + $0xa0] sm:$0xff]  ;;  %v335_v50 = vld [vmem:[%s6331_s16 + $0xb0] sm:$0xff]  ;;  %v338_v51 = vld [vmem:[%s6331_s16 + $0xc8] sm:$0xff] }
  0x5d   : > { %5194 = vmatpush3.bf16.msra.mxu0 %v5918_v7  ;;  %v340_v52 = vld [vmem:[%s6331_s16 + $0xd8] sm:$0xff]  ;;  %v387_v53 = vpack.c.bf16 %v335_v50, %v333_v49  ;;  %v337_v55 = vld [vmem:[%s6331_s16 + $0xc0] sm:$0xff]  ;;  %v339_v56 = vld [vmem:[%s6331_s16 + $0xd0] sm:$0xff] }
  0x5e   : > { %5195 = vmatprep.subr.bf16.mxu0 %v5919_v8  ;;  %v390_v54 = vpack.c.bf16 %v340_v52, %v338_v51  ;;  %v342_v57 = vld [vmem:[%s6331_s16 + $0xe8] sm:$0xff]  ;;  %v344_v58 = vld [vmem:[%s6331_s16 + $0xf8] sm:$0xff]  ;;  %v389_v59 = vpack.c.bf16 %v339_v56, %v337_v55  ;;  %v341_v61 = vld [vmem:[%s6331_s16 + $0xe0] sm:$0xff] }
  0x5f   : > { %v392_v60 = vpack.c.bf16 %v344_v58, %v342_v57  ;;  %v343_v62 = vld [vmem:[%s6331_s16 + $0xf0] sm:$0xff]  ;;  %v346_v63 = vld [vmem:[%s6331_s16 + $0x108] sm:$0xff]  ;;  %v348_v0 = vld [vmem:[%s6331_s16 + $0x118] sm:$0xff] }
  0x60   : > { %v391_v1 = vpack.c.bf16 %v343_v62, %v341_v61  ;;  %v394_v2 = vpack.c.bf16 %v348_v0, %v346_v63  ;;  %v345_v3 = vld [vmem:[%s6331_s16 + $0x100] sm:$0xff]  ;;  %v347_v4 = vld [vmem:[%s6331_s16 + $0x110] sm:$0xff]  ;;  %v350_v5 = vld [vmem:[%s6331_s16 + $0x128] sm:$0xff] }
  0x61   : > { %5196 = vmatpush3.bf16.msra.mxu0 %v5920_v9  ;;  %v352_v6 = vld [vmem:[%s6331_s16 + $0x138] sm:$0xff]  ;;  %v393_v7 = vpack.c.bf16 %v347_v4, %v345_v3  ;;  %v349_v9 = vld [vmem:[%s6331_s16 + $0x120] sm:$0xff]  ;;  %v354_v11 = vld [vmem:[%s6331_s16 + $0x148] sm:$0xff] }
  0x62   : > { %5197 = vmatprep.subr.bf16.mxu0 %v5921_v10  ;;  %v396_v8 = vpack.c.bf16 %v352_v6, %v350_v5  ;;  %v351_v10 = vld [vmem:[%s6331_s16 + $0x130] sm:$0xff]  ;;  %v356_v12 = vld [vmem:[%s6331_s16 + $0x158] sm:$0xff]  ;;  %v362_v25 = vld [vmem:[%s6331_s16 + $0x188] sm:$0xff]  ;;  %v8396_v6 = vmov 0  }
  0x63   : > { %v395_v13 = vpack.c.bf16 %v351_v10, %v349_v9  ;;  %v5927_v21 = vld [vmem:[#allocation6 + $0x98] sm:$0xff]   ;;  %v5929_v27 = vld [vmem:[#allocation6 + $0x90] sm:$0xff]   ;;  %v5931_v31 = vld [vmem:[#allocation6 + $0x88] sm:$0xff]   ;;  %741 = vst.msk [vmem:[#allocation2 + $0x88] sm:$0xf] %vm737_vm0, %v8396_v6 }
  0x64   : > { %v5928_v22 = vld [vmem:[#allocation6 + $0x78] sm:$0xff]   ;;  %5479 = vmatprep.subr.bf16.mxu1 %v5927_v21  ;;  %v5930_v28 = vld [vmem:[#allocation6 + $0x70] sm:$0xff]   ;;  %v5933_v32 = vld [vmem:[#allocation6 + $0x68] sm:$0xff]   ;;  %742 = vst.msk [vmem:[#allocation2 + $0x8c] sm:$0xf] %vm737_vm0, %v8396_v6 }
  0x65   : > { %5198 = vmatpush3.bf16.msra.mxu0 %v5922_v14  ;;  %v398_v14 = vpack.c.bf16 %v356_v12, %v354_v11  ;;  %v364_v26 = vld [vmem:[%s6331_s16 + $0x198] sm:$0xff]  ;;  %5480 = vmatpush3.bf16.msra.mxu1 %v5927_v21  ;;  %v361_v33 = vld [vmem:[%s6331_s16 + $0x180] sm:$0xff]  ;;  %v363_v34 = vld [vmem:[%s6331_s16 + $0x190] sm:$0xff]  ;;  %738 = vst.msk [vmem:[#allocation2] sm:$0xf] %vm737_vm0, %v8396_v6 }
  0x66   : > { %5199 = vmatprep.subr.bf16.mxu0 %v5923_v15  ;;  %v353_v15 = vld [vmem:[%s6331_s16 + $0x140] sm:$0xff]  ;;  %5481 = vmatprep.subr.bf16.mxu1 %v5929_v27  ;;  %v401_v39 = vpack.c.bf16 %v363_v34, %v361_v33  ;;  %v370_v43 = vld [vmem:[%s6331_s16 + $0x1c8] sm:$0xff]  ;;  %v372_v44 = vld [vmem:[%s6331_s16 + $0x1d8] sm:$0xff]  ;;  %739 = vst.msk [vmem:[#allocation2 + $0x4] sm:$0xf] %vm737_vm0, %v8396_v6 }
  0x67   : > { %v5934_v37 = vld [vmem:[#allocation6 + $0x80] sm:$0xff]   ;;  %v406_v46 = vpack.c.bf16 %v372_v44, %v370_v43  ;;  %v374_v49 = vld [vmem:[%s6331_s16 + $0x1e8] sm:$0xff]  ;;  %v376_v50 = vld [vmem:[%s6331_s16 + $0x1f8] sm:$0xff] }
  0x68   : > { %v5935_v38 = vld [vmem:[#allocation6 + $0x60] sm:$0xff]   ;;  %v408_v52 = vpack.c.bf16 %v376_v50, %v374_v49  ;;  %v6453_v56 = vld [vmem:[#allocation6 + $0xd8] sm:$0xff]  }
  0x69   : > { %5200 = vmatpush3.bf16.msra.mxu0 %v5924_v16  ;;  %v355_v16 = vld [vmem:[%s6331_s16 + $0x150] sm:$0xff]  ;;  %5482 = vmatpush3.bf16.msra.mxu1 %v5929_v27  ;;  %v6456_v57 = vld [vmem:[#allocation6 + $0x38] sm:$0xff]  }
  0x6a   : > { %5201 = vmatprep.subr.bf16.mxu0 %v5925_v17  ;;  %v358_v17 = vld [vmem:[%s6331_s16 + $0x168] sm:$0xff]  ;;  %v397_v19 = vpack.c.bf16 %v355_v16, %v353_v15  ;;  %5483 = vmatprep.subr.bf16.mxu1 %v5931_v31 }
  0x6d   : > { %5202 = vmatpush3.bf16.msra.mxu0 %v5926_v18  ;;  %v360_v18 = vld [vmem:[%s6331_s16 + $0x178] sm:$0xff]  ;;  %5484 = vmatpush3.bf16.msra.mxu1 %v5931_v31 }
  0x6e   : > { %v400_v20 = vpack.c.bf16 %v360_v18, %v358_v17  ;;  %5599 = vmatprep.subr.bf16.mxu0 %v5928_v22  ;;  %5485 = vmatprep.subr.bf16.mxu1 %v5934_v37 }
  0x70   : > { %577 = vmatmul.mubr.bf16.vlgmr.msra.gmra.mxu0 %v377_v23  ;;  %v357_v23 = vld [vmem:[%s6331_s16 + $0x160] sm:$0xff] }
  0x71   : > { %584 = vmatprep.mubr.bf16.mxu0 %v380_v24  ;;  %v359_v24 = vld [vmem:[%s6331_s16 + $0x170] sm:$0xff]  ;;  %5600 = vmatpush3.bf16.msra.mxu0 %v5928_v22 }
  0x72   : > { %5601 = vmatprep.subr.bf16.mxu0 %v5930_v28  ;;  %5486 = vmatpush3.bf16.msra.mxu1 %v5934_v37 }
  0x73   : > { %5519 = vmatprep.subr.bf16.mxu1 %v6456_v57 }
  0x75   : > { %5602 = vmatpush3.bf16.msra.mxu0 %v5930_v28 }
  0x76   : > { %5603 = vmatprep.subr.bf16.mxu0 %v5933_v32 }
  0x78   : > { %585 = vmatmul.mubr.bf16.gmra.mxu0 %v379_v29  ;;  %v399_v29 = vpack.c.bf16 %v359_v24, %v357_v23 }
  0x79   : > { %592 = vmatprep.mubr.bf16.mxu0 %v382_v30  ;;  %v402_v30 = vpack.c.bf16 %v364_v26, %v362_v25  ;;  %5604 = vmatpush3.bf16.msra.mxu0 %v5933_v32 }
  0x7a   : > { %5605 = vmatprep.subr.bf16.mxu0 %v5935_v38 }
  0x7d   : > { %5606 = vmatpush3.bf16.msra.mxu0 %v5935_v38  ;;  %v5941_v38 = vld [vmem:[#allocation6 + $0xd0] sm:$0xff]  }
  0x7e   : > { %5679 = vmatprep.subr.bf16.mxu0 %v6453_v56 }
  0x80   : > { %593 = vmatmul.mubr.bf16.gmra.mxu0 %v381_v35  ;;  %v366_v35 = vld [vmem:[%s6331_s16 + $0x1a8] sm:$0xff] }
  0x81   : > { %600 = vmatprep.mubr.bf16.mxu0 %v384_v36  ;;  %v368_v36 = vld [vmem:[%s6331_s16 + $0x1b8] sm:$0xff] }
  0x82   : > { %v404_v40 = vpack.c.bf16 %v368_v36, %v366_v35 }
  0x88   : > { %601 = vmatmul.mubr.bf16.gmra.mxu0 %v383_v41  ;;  %v365_v41 = vld [vmem:[%s6331_s16 + $0x1a0] sm:$0xff] }
  0x89   : > { %608 = vmatprep.mubr.bf16.mxu0 %v386_v42  ;;  %v367_v42 = vld [vmem:[%s6331_s16 + $0x1b0] sm:$0xff] }
  0x8a   : > { %v403_v45 = vpack.c.bf16 %v367_v42, %v365_v41 }
  0x90   : > { %609 = vmatmul.mubr.bf16.gmra.mxu0 %v385_v47  ;;  %v369_v47 = vld [vmem:[%s6331_s16 + $0x1c0] sm:$0xff] }
  0x91   : > { %616 = vmatprep.mubr.bf16.mxu0 %v388_v48  ;;  %v371_v48 = vld [vmem:[%s6331_s16 + $0x1d0] sm:$0xff] }
  0x92   : > { %v405_v51 = vpack.c.bf16 %v371_v48, %v369_v47  ;;  %v5943_v47 = vld [vmem:[#allocation6 + $0xc8] sm:$0xff]  }
  0x93   : > { %v5964_v48 = vld [vmem:[#allocation6 + $0x28] sm:$0xff]  }
  0x98   : > { %617 = vmatmul.mubr.bf16.gmra.mxu0 %v387_v53  ;;  %v373_v53 = vld [vmem:[%s6331_s16 + $0x1e0] sm:$0xff] }
  0x99   : > { %624 = vmatprep.mubr.bf16.mxu0 %v390_v54  ;;  %v375_v54 = vld [vmem:[%s6331_s16 + $0x1f0] sm:$0xff] }
  0x9a   : > { %v407_v55 = vpack.c.bf16 %v375_v54, %v373_v53 }
  0xa0   : > { %625 = vmatmul.mubr.bf16.gmra.mxu0 %v389_v59  ;;  %v6462_v59 = vld [vmem:[%s8386_s2] ss:$0 sm:$0xff] }
  0xa1   : > { %632 = vmatprep.mubr.bf16.mxu0 %v392_v60 }
  0xa8   : > { %633 = vmatmul.mubr.bf16.gmra.mxu0 %v391_v1 }
  0xa9   : > { %640 = vmatprep.mubr.bf16.mxu0 %v394_v2 }
  0xb0   : > { %641 = vmatmul.mubr.bf16.gmra.mxu0 %v393_v7 }
  0xb1   : > { %648 = vmatprep.mubr.bf16.mxu0 %v396_v8 }
  0xb8   : > { %649 = vmatmul.mubr.bf16.gmra.mxu0 %v395_v13 }
  0xb9   : > { %656 = vmatprep.mubr.bf16.mxu0 %v398_v14 }
  0xc0   : > { %657 = vmatmul.mubr.bf16.gmra.mxu0 %v397_v19 }
  0xc1   : > { %664 = vmatprep.mubr.bf16.mxu0 %v400_v20 }
  0xc8   : > { %665 = vmatmul.mubr.bf16.gmra.mxu0 %v399_v29 }
  0xc9   : > { %672 = vmatprep.mubr.bf16.mxu0 %v402_v30 }
  0xd0   : > { %673 = vmatmul.mubr.bf16.gmra.mxu0 %v401_v39  ;;  %v5959_v39 = vld [vmem:[#allocation6 + $0x30] sm:$0xff]  }
  0xd1   : > { %680 = vmatprep.mubr.bf16.mxu0 %v404_v40 }
  0xd8   : > { %681 = vmatmul.mubr.bf16.gmra.mxu0 %v403_v45 }
  0xd9   : > { %688 = vmatprep.mubr.bf16.mxu0 %v406_v46 }
  0xe0   : > { %689 = vmatmul.mubr.bf16.gmra.mxu0 %v405_v51 }
  0xe1   : > { %696 = vmatprep.mubr.bf16.mxu0 %v408_v52 }
  0xe8   : > { %697 = vmatmul.mubr.bf16.gmra.mxu0 %v407_v55  ;;  %v5945_v55 = vld [vmem:[#allocation6 + $0xc0] sm:$0xff]  }
 0x130   : > { %v5203_v58 = vpop.f32.mrf.mxu0 }
 0x132   : > { %v5204_v60 = vpop.f32.mrf.mxu0 }
 0x133   : > { %v5205_v61 = vadd.f32 %v5204_v60, %v5203_v58  ;;  %v5969_v58 = vld [vmem:[#allocation6 + $0x20] sm:$0xff]  }
 0x134   : > { %v5206_v62 = vpop.f32.mrf.mxu0 }
 0x135   : > { %v579_v63 = vadd.f32 %v5205_v61, %v6462_v59 }
 0x136   : > { %v5207_v0 = vpop.f32.mrf.mxu0 }
 0x137   : > { %v705_v1 = vmax.f32 %v579_v63, 0.0  ;;  %v5208_v2 = vadd.f32 %v5207_v0, %v5206_v62 }
 0x138   : > { %v5209_v3 = vpop.f32.mrf.mxu0 }
 0x139   : > { %v5154_v4 = vpack.c.bf16 %v705_v1, %v705_v1  ;;  %v582_v5 = vadd.f32 %v5208_v2, %v6462_v59  ;;  %v6498_v1 = vld [vmem:[#allocation6 + $0x58] sm:$0xff]  }
 0x13a   : > { %v5210_v7 = vpop.f32.mrf.mxu0  ;;  %v6500_v2 = vld [vmem:[#allocation6 + $0xf8] sm:$0xff]  }
 0x13b   : > { %872 = vst.msk [vmem:[#allocation2 + $0x8] sm:$0xf] %vm737_vm0, %v5154_v4  ;;  %v706_v8 = vmax.f32 %v582_v5, 0.0  ;;  %v5211_v9 = vadd.f32 %v5210_v7, %v5209_v3 }
 0x13c   : > { %v5212_v10 = vpop.f32.mrf.mxu0 }
 0x13d   : > { %v5155_v11 = vpack.c.bf16 %v706_v8, %v706_v8  ;;  %v587_v12 = vadd.f32 %v5211_v9, %v6462_v59 }
 0x13e   : > { %v5213_v13 = vpop.f32.mrf.mxu0 }
 0x13f   : > { %873 = vst.msk [vmem:[#allocation2 + $0xc] sm:$0xf] %vm737_vm0, %v5155_v11  ;;  %v707_v14 = vmax.f32 %v587_v12, 0.0  ;;  %v5214_v15 = vadd.f32 %v5213_v13, %v5212_v10 }
 0x140   : > { %v5215_v16 = vpop.f32.mrf.mxu0 }
 0x141   : > { %v5156_v17 = vpack.c.bf16 %v707_v14, %v707_v14  ;;  %v590_v18 = vadd.f32 %v5214_v15, %v6462_v59 }
 0x142   : > { %v5216_v19 = vpop.f32.mrf.mxu0 }
 0x143   : > { %874 = vst.msk [vmem:[#allocation2 + $0x10] sm:$0xf] %vm737_vm0, %v5156_v17  ;;  %v708_v20 = vmax.f32 %v590_v18, 0.0  ;;  %v5217_v21 = vadd.f32 %v5216_v19, %v5215_v16 }
 0x144   : > { %v5218_v22 = vpop.f32.mrf.mxu0 }
 0x145   : > { %v5157_v23 = vpack.c.bf16 %v708_v20, %v708_v20  ;;  %v595_v24 = vadd.f32 %v5217_v21, %v6462_v59 }
 0x146   : > { %v5219_v25 = vpop.f32.mrf.mxu0  ;;  %v5932_v26 = vld [vmem:[#allocation2 + $0x8] sm:$0xff]  }
 0x147   : > { %875 = vst.msk [vmem:[#allocation2 + $0x14] sm:$0xf] %vm737_vm0, %v5157_v23  ;;  %v709_v27 = vmax.f32 %v595_v24, 0.0  ;;  %v5220_v28 = vadd.f32 %v5219_v25, %v5218_v22  ;;  %5487 = vmatprep.mubr.msk.bf16.mxu1 %vm1507_vm1, %v5932_v26  ;;  %5607 = vmatprep.mubr.msk.bf16.mxu0 %vm1507_vm1, %v5932_v26 }
 0x148   : > { %v5221_v29 = vpop.f32.mrf.mxu0 }
 0x149   : > { %v5158_v30 = vpack.c.bf16 %v709_v27, %v709_v27  ;;  %v598_v31 = vadd.f32 %v5220_v28, %v6462_v59 }
 0x14a   : > { %v5222_v32 = vpop.f32.mrf.mxu0 }
 0x14b   : > { %876 = vst.msk [vmem:[#allocation2 + $0x18] sm:$0xf] %vm737_vm0, %v5158_v30  ;;  %v710_v33 = vmax.f32 %v598_v31, 0.0  ;;  %v5223_v34 = vadd.f32 %v5222_v32, %v5221_v29 }
 0x14c   : > { %v5224_v35 = vpop.f32.mrf.mxu0 }
 0x14d   : > { %v5159_v36 = vpack.c.bf16 %v710_v33, %v710_v33  ;;  %v603_v37 = vadd.f32 %v5223_v34, %v6462_v59 }
 0x14e   : > { %v5225_v40 = vpop.f32.mrf.mxu0  ;;  %v5936_v41 = vld [vmem:[#allocation2 + $0x10] sm:$0xff]  }
 0x14f   : > { %877 = vst.msk [vmem:[#allocation2 + $0x1c] sm:$0xf] %vm737_vm0, %v5159_v36  ;;  %v711_v42 = vmax.f32 %v603_v37, 0.0  ;;  %v5226_v43 = vadd.f32 %v5225_v40, %v5224_v35  ;;  %5488 = vmatmul.mubr.msk.bf16.vlgmr.msra.gmra.mxu1 %vm1507_vm1, %v5936_v41  ;;  %5608 = vmatmul.mubr.msk.bf16.vlgmr.msra.gmra.mxu0 %vm1507_vm1, %v5936_v41  ;;  %v6529_v40 = vld [vmem:[#allocation2 + $0x10] sm:$0xff]  }
 0x150   : > { %v5227_v44 = vpop.f32.mrf.mxu0  ;;  %5680 = vmatpush3.bf16.msra.mxu0 %v6453_v56  ;;  %5520 = vmatpush3.bf16.msra.mxu1 %v6456_v57 }
 0x151   : > { %v5160_v45 = vpack.c.bf16 %v711_v42, %v711_v42  ;;  %v606_v46 = vadd.f32 %v5226_v43, %v6462_v59  ;;  %5681 = vmatprep.subr.bf16.mxu0 %v5941_v38  ;;  %5521 = vmatprep.subr.bf16.mxu1 %v5959_v39 }
 0x152   : > { %v5228_v49 = vpop.f32.mrf.mxu0 }
 0x153   : > { %878 = vst.msk [vmem:[#allocation2 + $0x20] sm:$0xf] %vm737_vm0, %v5160_v45  ;;  %v712_v50 = vmax.f32 %v606_v46, 0.0  ;;  %v5229_v51 = vadd.f32 %v5228_v49, %v5227_v44 }
 0x154   : > { %v5230_v52 = vpop.f32.mrf.mxu0  ;;  %5682 = vmatpush3.bf16.msra.mxu0 %v5941_v38  ;;  %5522 = vmatpush3.bf16.msra.mxu1 %v5959_v39 }
 0x155   : > { %v5161_v53 = vpack.c.bf16 %v712_v50, %v712_v50  ;;  %v611_v54 = vadd.f32 %v5229_v51, %v6462_v59  ;;  %5683 = vmatprep.subr.bf16.mxu0 %v5943_v47  ;;  %5523 = vmatprep.subr.bf16.mxu1 %v5964_v48  ;;  %v5973_v51 = vld [vmem:[#allocation6 + $0x50] sm:$0xff]  }
 0x156   : > { %v5231_v56 = vpop.f32.mrf.mxu0  ;;  %v5937_v60 = vld [vmem:[#allocation2 + $0x18] sm:$0xff]  }
 0x157   : > { %879 = vst.msk [vmem:[#allocation2 + $0x24] sm:$0xf] %vm737_vm0, %v5161_v53  ;;  %v713_v57 = vmax.f32 %v611_v54, 0.0  ;;  %v5232_v61 = vadd.f32 %v5231_v56, %v5230_v52  ;;  %5491 = vmatprep.mubr.msk.bf16.mxu1 %vm1507_vm1, %v5937_v60  ;;  %5611 = vmatprep.mubr.msk.bf16.mxu0 %vm1507_vm1, %v5937_v60  ;;  %v6540_v50 = vld [vmem:[#allocation2 + $0x18] sm:$0xff]  }
 0x158   : > { %v5233_v62 = vpop.f32.mrf.mxu0  ;;  %5684 = vmatpush3.bf16.msra.mxu0 %v5943_v47  ;;  %5524 = vmatpush3.bf16.msra.mxu1 %v5964_v48 }
 0x159   : > { %v5162_v63 = vpack.c.bf16 %v713_v57, %v713_v57  ;;  %v614_v0 = vadd.f32 %v5232_v61, %v6462_v59  ;;  %5685 = vmatprep.subr.bf16.mxu0 %v5945_v55  ;;  %5525 = vmatprep.subr.bf16.mxu1 %v5969_v58  ;;  %v5977_v61 = vld [vmem:[#allocation6 + $0x48] sm:$0xff]  }
 0x15a   : > { %v5234_v3 = vpop.f32.mrf.mxu0 }
 0x15b   : > { %880 = vst.msk [vmem:[#allocation2 + $0x28] sm:$0xf] %vm737_vm0, %v5162_v63  ;;  %v714_v4 = vmax.f32 %v614_v0, 0.0  ;;  %v5235_v5 = vadd.f32 %v5234_v3, %v5233_v62 }
 0x15c   : > { %v5236_v7 = vpop.f32.mrf.mxu0  ;;  %5686 = vmatpush3.bf16.msra.mxu0 %v5945_v55  ;;  %5526 = vmatpush3.bf16.msra.mxu1 %v5969_v58 }
 0x15d   : > { %v5163_v8 = vpack.c.bf16 %v714_v4, %v714_v4  ;;  %v619_v9 = vadd.f32 %v5235_v5, %v6462_v59  ;;  %5759 = vmatprep.subr.bf16.mxu0 %v6498_v1  ;;  %5559 = vmatprep.subr.bf16.mxu1 %v6500_v2 }
 0x15e   : > { %v5237_v10 = vpop.f32.mrf.mxu0  ;;  %v6504_v11 = vld [vmem:[#allocation2 + $0x20] sm:$0xff]  }
 0x15f   : > { %881 = vst.msk [vmem:[#allocation2 + $0x2c] sm:$0xf] %vm737_vm0, %v5163_v8  ;;  %v715_v12 = vmax.f32 %v619_v9, 0.0  ;;  %v5238_v13 = vadd.f32 %v5237_v10, %v5236_v7  ;;  %5492 = vmatmul.mubr.msk.bf16.gmra.mxu1 %vm1507_vm1, %v6504_v11  ;;  %5612 = vmatmul.mubr.msk.bf16.gmra.mxu0 %vm1507_vm1, %v6504_v11  ;;  %v6545_v58 = vld [vmem:[#allocation2 + $0x20] sm:$0xff]   ;;  %v5978_v8 = vld [vmem:[#allocation6 + $0x40] sm:$0xff]  }
 0x160   : > { %v5239_v14 = vpop.f32.mrf.mxu0 }
 0x161   : > { %v5164_v15 = vpack.c.bf16 %v715_v12, %v715_v12  ;;  %v622_v16 = vadd.f32 %v5238_v13, %v6462_v59 }
 0x162   : > { %v5240_v17 = vpop.f32.mrf.mxu0 }
 0x163   : > { %882 = vst.msk [vmem:[#allocation2 + $0x30] sm:$0xf] %vm737_vm0, %v5164_v15  ;;  %v716_v18 = vmax.f32 %v622_v16, 0.0  ;;  %v5241_v19 = vadd.f32 %v5240_v17, %v5239_v14 }
 0x164   : > { %v5242_v20 = vpop.f32.mrf.mxu0 }
 0x165   : > { %v5165_v21 = vpack.c.bf16 %v716_v18, %v716_v18  ;;  %v627_v22 = vadd.f32 %v5241_v19, %v6462_v59 }
 0x166   : > { %v5243_v23 = vpop.f32.mrf.mxu0  ;;  %v6516_v24 = vld [vmem:[#allocation2 + $0x28] sm:$0xff]  }
 0x167   : > { %883 = vst.msk [vmem:[#allocation2 + $0x34] sm:$0xf] %vm737_vm0, %v5165_v21  ;;  %v717_v25 = vmax.f32 %v627_v22, 0.0  ;;  %v5244_v26 = vadd.f32 %v5243_v23, %v5242_v20  ;;  %5495 = vmatprep.mubr.msk.bf16.mxu1 %vm1507_vm1, %v6516_v24  ;;  %5615 = vmatprep.mubr.msk.bf16.mxu0 %vm1507_vm1, %v6516_v24  ;;  %v6557_v7 = vld [vmem:[#allocation2 + $0x28] sm:$0xff]  }
 0x168   : > { %v5245_v27 = vpop.f32.mrf.mxu0 }
 0x169   : > { %v5166_v28 = vpack.c.bf16 %v717_v25, %v717_v25  ;;  %v630_v29 = vadd.f32 %v5244_v26, %v6462_v59 }
 0x16a   : > { %v5246_v30 = vpop.f32.mrf.mxu0 }
 0x16b   : > { %884 = vst.msk [vmem:[#allocation2 + $0x38] sm:$0xf] %vm737_vm0, %v5166_v28  ;;  %v718_v31 = vmax.f32 %v630_v29, 0.0  ;;  %v5247_v32 = vadd.f32 %v5246_v30, %v5245_v27 }
 0x16c   : > { %v5248_v33 = vpop.f32.mrf.mxu0 }
 0x16d   : > { %v5167_v34 = vpack.c.bf16 %v718_v31, %v718_v31  ;;  %v635_v35 = vadd.f32 %v5247_v32, %v6462_v59 }
 0x16e   : > { %v5249_v36 = vpop.f32.mrf.mxu0  ;;  %v6526_v37 = vld [vmem:[#allocation2 + $0x30] sm:$0xff]  }
 0x16f   : > { %885 = vst.msk [vmem:[#allocation2 + $0x3c] sm:$0xf] %vm737_vm0, %v5167_v34  ;;  %v719_v38 = vmax.f32 %v635_v35, 0.0  ;;  %v5250_v39 = vadd.f32 %v5249_v36, %v5248_v33  ;;  %5496 = vmatmul.mubr.msk.bf16.gmra.mxu1 %vm1507_vm1, %v6526_v37  ;;  %5616 = vmatmul.mubr.msk.bf16.gmra.mxu0 %vm1507_vm1, %v6526_v37  ;;  %v6562_v13 = vld [vmem:[#allocation2 + $0x30] sm:$0xff]  }
 0x170   : > { %v5251_v41 = vpop.f32.mrf.mxu0  ;;  %5687 = vmatprep.mubr.msk.bf16.mxu0 %vm1507_vm1, %v6529_v40 }
 0x171   : > { %v5168_v42 = vpack.c.bf16 %v719_v38, %v719_v38  ;;  %v638_v43 = vadd.f32 %v5250_v39, %v6462_v59 }
 0x172   : > { %v5252_v44 = vpop.f32.mrf.mxu0 }
 0x173   : > { %886 = vst.msk [vmem:[#allocation2 + $0x40] sm:$0xf] %vm737_vm0, %v5168_v42  ;;  %v720_v45 = vmax.f32 %v638_v43, 0.0  ;;  %v5253_v46 = vadd.f32 %v5252_v44, %v5251_v41 }
 0x174   : > { %v5254_v47 = vpop.f32.mrf.mxu0 }
 0x175   : > { %v5169_v48 = vpack.c.bf16 %v720_v45, %v720_v45  ;;  %v643_v49 = vadd.f32 %v5253_v46, %v6462_v59 }
 0x176   : > { %v5255_v52 = vpop.f32.mrf.mxu0  ;;  %v6542_v53 = vld [vmem:[#allocation2 + $0x38] sm:$0xff]  }
 0x177   : > { %887 = vst.msk [vmem:[#allocation2 + $0x44] sm:$0xf] %vm737_vm0, %v5169_v48  ;;  %v721_v54 = vmax.f32 %v643_v49, 0.0  ;;  %v5256_v55 = vadd.f32 %v5255_v52, %v5254_v47  ;;  %5499 = vmatprep.mubr.msk.bf16.mxu1 %vm1507_vm1, %v6542_v53  ;;  %5688 = vmatmul.mubr.msk.bf16.vlgmr.msra.gmra.mxu0 %vm1507_vm1, %v6540_v50  ;;  %v6573_v23 = vld [vmem:[#allocation2 + $0x38] sm:$0xff]  }
 0x178   : > { %v5257_v56 = vpop.f32.mrf.mxu0  ;;  %5691 = vmatprep.mubr.msk.bf16.mxu0 %vm1507_vm1, %v6545_v58  ;;  %5760 = vmatpush3.bf16.msra.mxu0 %v6498_v1  ;;  %8422 = vst [vmem:[#allocation12_spill] sm:$0xff] %v6573_v23 }
 0x179   : > { %v5170_v60 = vpack.c.bf16 %v721_v54, %v721_v54  ;;  %v646_v57 = vadd.f32 %v5256_v55, %v6462_v59  ;;  %5761 = vmatprep.subr.bf16.mxu0 %v5973_v51 }
 0x17a   : > { %v5258_v62 = vpop.f32.mrf.mxu0 }
 0x17b   : > { %888 = vst.msk [vmem:[#allocation2 + $0x48] sm:$0xf] %vm737_vm0, %v5170_v60  ;;  %v722_v63 = vmax.f32 %v646_v57, 0.0  ;;  %v5259_v0 = vadd.f32 %v5258_v62, %v5257_v56 }
 0x17c   : > { %v5260_v3 = vpop.f32.mrf.mxu0  ;;  %5762 = vmatpush3.bf16.msra.mxu0 %v5973_v51 }
 0x17d   : > { %v5171_v4 = vpack.c.bf16 %v722_v63, %v722_v63  ;;  %v651_v5 = vadd.f32 %v5259_v0, %v6462_v59  ;;  %5763 = vmatprep.subr.bf16.mxu0 %v5977_v61 }
 0x17e   : > { %v5261_v9 = vpop.f32.mrf.mxu0  ;;  %v6559_v10 = vld [vmem:[#allocation2 + $0x40] sm:$0xff]  }
 0x17f   : > { %889 = vst.msk [vmem:[#allocation2 + $0x4c] sm:$0xf] %vm737_vm0, %v5171_v4  ;;  %v723_v1 = vmax.f32 %v651_v5, 0.0  ;;  %v5262_v12 = vadd.f32 %v5261_v9, %v5260_v3  ;;  %5500 = vmatmul.mubr.msk.bf16.gmra.mxu1 %vm1507_vm1, %v6559_v10  ;;  %5692 = vmatmul.mubr.msk.bf16.gmra.mxu0 %vm1507_vm1, %v6557_v7  ;;  %v6578_v29 = vld [vmem:[#allocation2 + $0x40] sm:$0xff]  }
 0x180   : > { %v5263_v14 = vpop.f32.mrf.mxu0  ;;  %5695 = vmatprep.mubr.msk.bf16.mxu0 %vm1507_vm1, %v6562_v13  ;;  %5764 = vmatpush3.bf16.msra.mxu0 %v5977_v61  ;;  %8423 = vst [vmem:[#allocation13_spill] sm:$0xff] %v6578_v29 }
 0x181   : > { %v5172_v15 = vpack.c.bf16 %v723_v1, %v723_v1  ;;  %v654_v16 = vadd.f32 %v5262_v12, %v6462_v59  ;;  %5765 = vmatprep.subr.bf16.mxu0 %v5978_v8 }
 0x182   : > { %v5264_v17 = vpop.f32.mrf.mxu0 }
 0x183   : > { %890 = vst.msk [vmem:[#allocation2 + $0x50] sm:$0xf] %vm737_vm0, %v5172_v15  ;;  %v724_v18 = vmax.f32 %v654_v16, 0.0  ;;  %v5265_v19 = vadd.f32 %v5264_v17, %v5263_v14 }
 0x184   : > { %v5266_v20 = vpop.f32.mrf.mxu0  ;;  %5766 = vmatpush3.bf16.msra.mxu0 %v5978_v8 }
 0x185   : > { %v5173_v21 = vpack.c.bf16 %v724_v18, %v724_v18  ;;  %v659_v22 = vadd.f32 %v5265_v19, %v6462_v59 }
 0x186   : > { %v5267_v25 = vpop.f32.mrf.mxu0  ;;  %v6575_v26 = vld [vmem:[#allocation2 + $0x48] sm:$0xff]  }
 0x187   : > { %891 = vst.msk [vmem:[#allocation2 + $0x54] sm:$0xf] %vm737_vm0, %v5173_v21  ;;  %v725_v27 = vmax.f32 %v659_v22, 0.0  ;;  %v5268_v28 = vadd.f32 %v5267_v25, %v5266_v20  ;;  %5503 = vmatprep.mubr.msk.bf16.mxu1 %vm1507_vm1, %v6575_v26  ;;  %5696 = vmatmul.mubr.msk.bf16.gmra.mxu0 %vm1507_vm1, %v6573_v23  ;;  %v6589_v41 = vld [vmem:[#allocation2 + $0x48] sm:$0xff]  }
 0x188   : > { %v5269_v30 = vpop.f32.mrf.mxu0  ;;  %5699 = vmatprep.mubr.msk.bf16.mxu0 %vm1507_vm1, %v6578_v29  ;;  %8424 = vst [vmem:[#allocation14_spill] sm:$0xff] %v6589_v41 }
 0x189   : > { %v5174_v31 = vpack.c.bf16 %v725_v27, %v725_v27  ;;  %v662_v32 = vadd.f32 %v5268_v28, %v6462_v59 }
 0x18a   : > { %v5270_v33 = vpop.f32.mrf.mxu0 }
 0x18b   : > { %892 = vst.msk [vmem:[#allocation2 + $0x58] sm:$0xf] %vm737_vm0, %v5174_v31  ;;  %v726_v34 = vmax.f32 %v662_v32, 0.0  ;;  %v5271_v35 = vadd.f32 %v5270_v33, %v5269_v30 }
 0x18c   : > { %v5272_v36 = vpop.f32.mrf.mxu0 }
 0x18d   : > { %v5175_v38 = vpack.c.bf16 %v726_v34, %v726_v34  ;;  %v667_v39 = vadd.f32 %v5271_v35, %v6462_v59 }
 0x18e   : > { %v5273_v42 = vpop.f32.mrf.mxu0  ;;  %v6591_v43 = vld [vmem:[#allocation2 + $0x50] sm:$0xff]  }
 0x18f   : > { %893 = vst.msk [vmem:[#allocation2 + $0x5c] sm:$0xf] %vm737_vm0, %v5175_v38  ;;  %v727_v44 = vmax.f32 %v667_v39, 0.0  ;;  %v5274_v45 = vadd.f32 %v5273_v42, %v5272_v36  ;;  %v6594_v46 = vld [vmem:[#allocation2 + $0x50] sm:$0xff]   ;;  %5504 = vmatmul.mubr.msk.bf16.gmra.mxu1 %vm1507_vm1, %v6591_v43  ;;  %5700 = vmatmul.mubr.msk.bf16.gmra.mxu0 %vm1507_vm1, %v6589_v41 }
 0x190   : > { %8425 = vst [vmem:[#allocation15_spill] sm:$0xff] %v6594_v46  ;;  %v5275_v47 = vpop.f32.mrf.mxu0  ;;  %5703 = vmatprep.mubr.msk.bf16.mxu0 %vm1507_vm1, %v6594_v46 }
 0x191   : > { %v5176_v48 = vpack.c.bf16 %v727_v44, %v727_v44  ;;  %v670_v49 = vadd.f32 %v5274_v45, %v6462_v59 }
 0x192   : > { %v5276_v51 = vpop.f32.mrf.mxu0 }
 0x193   : > { %894 = vst.msk [vmem:[#allocation2 + $0x60] sm:$0xf] %vm737_vm0, %v5176_v48  ;;  %v728_v52 = vmax.f32 %v670_v49, 0.0  ;;  %v5277_v54 = vadd.f32 %v5276_v51, %v5275_v47 }
 0x194   : > { %v5278_v55 = vpop.f32.mrf.mxu0 }
 0x195   : > { %v5177_v56 = vpack.c.bf16 %v728_v52, %v728_v52  ;;  %v675_v60 = vadd.f32 %v5277_v54, %v6462_v59 }
 0x196   : > { %v5279_v57 = vpop.f32.mrf.mxu0  ;;  %v6605_v61 = vld [vmem:[#allocation2 + $0x58] sm:$0xff]  }
 0x197   : > { %895 = vst.msk [vmem:[#allocation2 + $0x64] sm:$0xf] %vm737_vm0, %v5177_v56  ;;  %v729_v62 = vmax.f32 %v675_v60, 0.0  ;;  %v5280_v63 = vadd.f32 %v5279_v57, %v5278_v55  ;;  %v6608_v0 = vld [vmem:[#allocation2 + $0x58] sm:$0xff]   ;;  %5507 = vmatprep.mubr.msk.bf16.mxu1 %vm1507_vm1, %v6605_v61 }
 0x198   : > { %8426 = vst [vmem:[#allocation16_spill] sm:$0xff] %v6608_v0  ;;  %v5281_v3 = vpop.f32.mrf.mxu0  ;;  %5704 = vmatmul.mubr.msk.bf16.gmra.mxu0 %vm1507_vm1, %v6608_v0 }
 0x199   : > { %v5178_v4 = vpack.c.bf16 %v729_v62, %v729_v62  ;;  %v678_v5 = vadd.f32 %v5280_v63, %v6462_v59 }
 0x19a   : > { %v5282_v8 = vpop.f32.mrf.mxu0 }
 0x19b   : > { %896 = vst.msk [vmem:[#allocation2 + $0x68] sm:$0xf] %vm737_vm0, %v5178_v4  ;;  %v730_v9 = vmax.f32 %v678_v5, 0.0  ;;  %v5283_v1 = vadd.f32 %v5282_v8, %v5281_v3 }
 0x19c   : > { %v5284_v12 = vpop.f32.mrf.mxu0 }
 0x19d   : > { %v5179_v14 = vpack.c.bf16 %v730_v9, %v730_v9  ;;  %v683_v15 = vadd.f32 %v5283_v1, %v6462_v59  ;;  %v6663_v1 = vld [vmem:[#allocation2] sm:$0xff]  }
 0x19e   : > { %v5285_v16 = vpop.f32.mrf.mxu0  ;;  %v6617_v17 = vld [vmem:[#allocation2 + $0x60] sm:$0xff]  }
 0x19f   : > { %897 = vst.msk [vmem:[#allocation2 + $0x6c] sm:$0xf] %vm737_vm0, %v5179_v14  ;;  %v731_v18 = vmax.f32 %v683_v15, 0.0  ;;  %v5286_v19 = vadd.f32 %v5285_v16, %v5284_v12  ;;  %v6620_v20 = vld [vmem:[#allocation2 + $0x60] sm:$0xff]   ;;  %5508 = vmatmul.mubr.msk.bf16.gmra.mxu1 %vm1507_vm1, %v6617_v17  ;;  %v6679_v15 = vld [vmem:[#allocation2 + $0x8] sm:$0xff]  }
 0x1a0   : > { %8427 = vst [vmem:[#allocation17_spill] sm:$0xff] %v6620_v20  ;;  %v5287_v21 = vpop.f32.mrf.mxu0  ;;  %5707 = vmatprep.mubr.msk.bf16.mxu0 %vm1507_vm1, %v6620_v20  ;;  %v5985_v16 = vld [vmem:[#allocation6 + $0xf0] sm:$0xff]  }
 0x1a1   : > { %v5180_v22 = vpack.c.bf16 %v731_v18, %v731_v18  ;;  %v686_v25 = vadd.f32 %v5286_v19, %v6462_v59  ;;  %v6681_v18 = vld [vmem:[#allocation2 + $0x10] sm:$0xff]   ;;  %v5990_v19 = vld [vmem:[#allocation6 + $0xe8] sm:$0xff]  }
 0x1a2   : > { %v5288_v27 = vpop.f32.mrf.mxu0 }
 0x1a3   : > { %898 = vst.msk [vmem:[#allocation2 + $0x70] sm:$0xf] %vm737_vm0, %v5180_v22  ;;  %v732_v28 = vmax.f32 %v686_v25, 0.0  ;;  %v5289_v30 = vadd.f32 %v5288_v27, %v5287_v21  ;;  %v6692_v21 = vld [vmem:[#allocation2 + $0x18] sm:$0xff]   ;;  %v5995_v22 = vld [vmem:[#allocation6 + $0xe0] sm:$0xff]   ;;  %v6694_v25 = vld [vmem:[#allocation2 + $0x20] sm:$0xff]  }
 0x1a4   : > { %v5290_v31 = vpop.f32.mrf.mxu0  ;;  %v6023_v27 = vld [vmem:[#allocation6 + $0x78] sm:$0xff]  }
 0x1a5   : > { %v5181_v32 = vpack.c.bf16 %v732_v28, %v732_v28  ;;  %v691_v33 = vadd.f32 %v5289_v30, %v6462_v59  ;;  %v6706_v28 = vld [vmem:[#allocation2 + $0x30] sm:$0xff]   ;;  %v6716_v30 = vld [vmem:[#allocation2 + $0x38] sm:$0xff]  }
 0x1a6   : > { %v5291_v34 = vpop.f32.mrf.mxu0  ;;  %v6629_v35 = vld [vmem:[#allocation2 + $0x68] sm:$0xff]  }
 0x1a7   : > { %899 = vst.msk [vmem:[#allocation2 + $0x74] sm:$0xf] %vm737_vm0, %v5181_v32  ;;  %v733_v36 = vmax.f32 %v691_v33, 0.0  ;;  %v5292_v38 = vadd.f32 %v5291_v34, %v5290_v31  ;;  %v6632_v39 = vld [vmem:[#allocation2 + $0x68] sm:$0xff]   ;;  %5511 = vmatprep.mubr.msk.bf16.mxu1 %vm1507_vm1, %v6629_v35  ;;  %v6718_v31 = vld [vmem:[#allocation2 + $0x40] sm:$0xff]   ;;  %v6730_v33 = vld [vmem:[#allocation2 + $0x50] sm:$0xff]  }
 0x1a8   : > { %8428 = vst [vmem:[#allocation18_spill] sm:$0xff] %v6632_v39  ;;  %v5293_v42 = vpop.f32.mrf.mxu0  ;;  %5708 = vmatmul.mubr.msk.bf16.gmra.mxu0 %vm1507_vm1, %v6632_v39  ;;  %v6728_v32 = vld [vmem:[#allocation2 + $0x48] sm:$0xff]   ;;  %v6740_v34 = vld [vmem:[#allocation2 + $0x58] sm:$0xff]  }
 0x1a9   : > { %v5182_v44 = vpack.c.bf16 %v733_v36, %v733_v36  ;;  %v694_v45 = vadd.f32 %v5292_v38, %v6462_v59  ;;  %v6742_v36 = vld [vmem:[#allocation2 + $0x60] sm:$0xff]   ;;  %v6752_v38 = vld [vmem:[#allocation2 + $0x68] sm:$0xff]  }
 0x1aa   : > { %v5294_v47 = vpop.f32.mrf.mxu0 }
 0x1ab   : > { %900 = vst.msk [vmem:[#allocation2 + $0x78] sm:$0xf] %vm737_vm0, %v5182_v44  ;;  %v734_v48 = vmax.f32 %v694_v45, 0.0  ;;  %v5295_v49 = vadd.f32 %v5294_v47, %v5293_v42  ;;  %v6024_v45 = vld [vmem:[#allocation6 + $0x70] sm:$0xff]   ;;  %v6025_v47 = vld [vmem:[#allocation6 + $0x68] sm:$0xff]  }
 0x1ac   : > { %v5296_v51 = vpop.f32.mrf.mxu0 }
 0x1ad   : > { %v5183_v52 = vpack.c.bf16 %v734_v48, %v734_v48  ;;  %v699_v54 = vadd.f32 %v5295_v49, %v6462_v59  ;;  %v5999_v48 = vld [vmem:[#allocation6 + $0x18] sm:$0xff]  }
 0x1ae   : > { %v5297_v55 = vpop.f32.mrf.mxu0  ;;  %v6641_v56 = vld [vmem:[#allocation2 + $0x70] sm:$0xff]  }
 0x1af   : > { %901 = vst.msk [vmem:[#allocation2 + $0x7c] sm:$0xf] %vm737_vm0, %v5183_v52  ;;  %v735_v60 = vmax.f32 %v699_v54, 0.0  ;;  %v5298_v57 = vadd.f32 %v5297_v55, %v5296_v51  ;;  %v6644_v62 = vld [vmem:[#allocation2 + $0x70] sm:$0xff]   ;;  %5512 = vmatmul.mubr.msk.bf16.gmra.mxu1 %vm1507_vm1, %v6641_v56 }
 0x1b0   : > { %8429 = vst [vmem:[#allocation19_spill] sm:$0xff] %v6644_v62  ;;  %5711 = vmatprep.mubr.msk.bf16.mxu0 %vm1507_vm1, %v6644_v62  ;;  %v6754_v42 = vld [vmem:[#allocation2 + $0x70] sm:$0xff]  }
 0x1b1   : > { %v5184_v63 = vpack.c.bf16 %v735_v60, %v735_v60  ;;  %v702_v3 = vadd.f32 %v5298_v57, %v6462_v59  ;;  %v6661_v59 = vld [vmem:[#allocation2 + $0x88] sm:$0xff]  }
 0x1b2   : > { %8431 = vst [vmem:[#allocation21_spill] sm:$0xff] %v6661_v59 }
 0x1b3   : > { %902 = vst.msk [vmem:[#allocation2 + $0x80] sm:$0xf] %vm737_vm0, %v5184_v63  ;;  %v736_v4 = vmax.f32 %v702_v3, 0.0  ;;  %v6000_v3 = vld [vmem:[#allocation6 + $0x10] sm:$0xff]  }
 0x1b5   : > { %v5185_v5 = vpack.c.bf16 %v736_v4, %v736_v4 }
 0x1b6   : > { %v6652_v8 = vld [vmem:[#allocation2 + $0x78] sm:$0xff]  }
 0x1b7   : > { %903 = vst.msk [vmem:[#allocation2 + $0x84] sm:$0xf] %vm737_vm0, %v5185_v5  ;;  %v6655_v9 = vld [vmem:[#allocation2 + $0x78] sm:$0xff]   ;;  %5515 = vmatprep.mubr.msk.bf16.mxu1 %vm1507_vm1, %v6652_v8 }
 0x1b8   : > { %8430 = vst [vmem:[#allocation20_spill] sm:$0xff] %v6655_v9  ;;  %5712 = vmatmul.mubr.msk.bf16.gmra.mxu0 %vm1507_vm1, %v6655_v9  ;;  %v6764_v44 = vld [vmem:[#allocation2 + $0x78] sm:$0xff]  }
 0x1b9   : > { %v6001_v5 = vld [vmem:[#allocation6 + $0x8] sm:$0xff]  }
 0x1be   : > { %v6665_v12 = vld [vmem:[#allocation2 + $0x80] sm:$0xff]  }
 0x1bf   : > { %v6667_v14 = vld [vmem:[#allocation2 + $0x80] sm:$0xff]   ;;  %5516 = vmatmul.mubr.msk.bf16.gmra.mxu1 %vm1507_vm1, %v6665_v12 }
 0x1c0   : > { %8432 = vst [vmem:[#allocation22_spill] sm:$0xff] %v6667_v14  ;;  %5715 = vmatprep.mubr.msk.bf16.mxu0 %vm1507_vm1, %v6667_v14  ;;  %5527 = vmatprep.mubr.msk.bf16.mxu1 %vm1507_vm1, %v6663_v1 }
 0x1c1   : > { %5716 = vmatmul.mubr.msk.bf16.gmra.mxu0 %vm1507_vm1, %v6661_v59 }
 0x1c2   : > { %5767 = vmatprep.mubr.msk.bf16.mxu0 %vm1507_vm1, %v6663_v1 }
 0x1c7   : > { %5528 = vmatmul.mubr.msk.bf16.vlgmr.msra.gmra.mxu1 %vm1507_vm1, %v6679_v15 }
 0x1c8   : > { %5560 = vmatpush3.bf16.msra.mxu1 %v6500_v2  ;;  %5531 = vmatprep.mubr.msk.bf16.mxu1 %vm1507_vm1, %v6681_v18  ;;  %v6704_v2 = vld [vmem:[#allocation2 + $0x28] sm:$0xff]  }
 0x1c9   : > { %5768 = vmatmul.mubr.msk.bf16.vlgmr.msra.gmra.mxu0 %vm1507_vm1, %v6679_v15  ;;  %5561 = vmatprep.subr.bf16.mxu1 %v5985_v16 }
 0x1ca   : > { %5771 = vmatprep.mubr.msk.bf16.mxu0 %vm1507_vm1, %v6681_v18 }
 0x1cc   : > { %5562 = vmatpush3.bf16.msra.mxu1 %v5985_v16 }
 0x1cd   : > { %5563 = vmatprep.subr.bf16.mxu1 %v5990_v19 }
 0x1cf   : > { %5532 = vmatmul.mubr.msk.bf16.gmra.mxu1 %vm1507_vm1, %v6692_v21 }
 0x1d0   : > { %5535 = vmatprep.mubr.msk.bf16.mxu1 %vm1507_vm1, %v6694_v25  ;;  %5564 = vmatpush3.bf16.msra.mxu1 %v5990_v19  ;;  %v6002_v19 = vld [vmem:[#allocation6] sm:$0xff]  }
 0x1d1   : > { %5772 = vmatmul.mubr.msk.bf16.gmra.mxu0 %vm1507_vm1, %v6692_v21  ;;  %5565 = vmatprep.subr.bf16.mxu1 %v5995_v22 }
 0x1d2   : > { %5775 = vmatprep.mubr.msk.bf16.mxu0 %vm1507_vm1, %v6694_v25 }
 0x1d4   : > { %5566 = vmatpush3.bf16.msra.mxu1 %v5995_v22 }
 0x1d5   : > { %5839 = vmatprep.subr.bf16.mxu1 %v6023_v27 }
 0x1d7   : > { %5536 = vmatmul.mubr.msk.bf16.gmra.mxu1 %vm1507_vm1, %v6704_v2 }
 0x1d8   : > { %5539 = vmatprep.mubr.msk.bf16.mxu1 %vm1507_vm1, %v6706_v28 }
 0x1d9   : > { %5776 = vmatmul.mubr.msk.bf16.gmra.mxu0 %vm1507_vm1, %v6704_v2 }
 0x1da   : > { %5779 = vmatprep.mubr.msk.bf16.mxu0 %vm1507_vm1, %v6706_v28 }
 0x1df   : > { %5540 = vmatmul.mubr.msk.bf16.gmra.mxu1 %vm1507_vm1, %v6716_v30 }
 0x1e0   : > { %5543 = vmatprep.mubr.msk.bf16.mxu1 %vm1507_vm1, %v6718_v31 }
 0x1e1   : > { %5780 = vmatmul.mubr.msk.bf16.gmra.mxu0 %vm1507_vm1, %v6716_v30 }
 0x1e2   : > { %5783 = vmatprep.mubr.msk.bf16.mxu0 %vm1507_vm1, %v6718_v31 }
 0x1e7   : > { %5544 = vmatmul.mubr.msk.bf16.gmra.mxu1 %vm1507_vm1, %v6728_v32 }
 0x1e8   : > { %5547 = vmatprep.mubr.msk.bf16.mxu1 %vm1507_vm1, %v6730_v33 }
 0x1e9   : > { %5784 = vmatmul.mubr.msk.bf16.gmra.mxu0 %vm1507_vm1, %v6728_v32 }
 0x1ea   : > { %5787 = vmatprep.mubr.msk.bf16.mxu0 %vm1507_vm1, %v6730_v33 }
 0x1ef   : > { %5548 = vmatmul.mubr.msk.bf16.gmra.mxu1 %vm1507_vm1, %v6740_v34 }
 0x1f0   : > { %5551 = vmatprep.mubr.msk.bf16.mxu1 %vm1507_vm1, %v6742_v36 }
 0x1f1   : > { %5788 = vmatmul.mubr.msk.bf16.gmra.mxu0 %vm1507_vm1, %v6740_v34 }
 0x1f2   : > { %5791 = vmatprep.mubr.msk.bf16.mxu0 %vm1507_vm1, %v6742_v36 }
 0x1f7   : > { %5552 = vmatmul.mubr.msk.bf16.gmra.mxu1 %vm1507_vm1, %v6752_v38 }
 0x1f8   : > { %5555 = vmatprep.mubr.msk.bf16.mxu1 %vm1507_vm1, %v6754_v42 }
 0x1f9   : > { %5792 = vmatmul.mubr.msk.bf16.gmra.mxu0 %vm1507_vm1, %v6752_v38 }
 0x1fa   : > { %5795 = vmatprep.mubr.msk.bf16.mxu0 %vm1507_vm1, %v6754_v42 }
 0x1ff   : > { %5556 = vmatmul.mubr.msk.bf16.gmra.mxu1 %vm1507_vm1, %v6764_v44 }
 0x200   : > { %5567 = vmatprep.mubr.msk.bf16.mxu1 %vm1507_vm1, %v6529_v40  ;;  %v6026_v40 = vld [vmem:[#allocation6 + $0x60] sm:$0xff]  }
 0x201   : > { %5796 = vmatmul.mubr.msk.bf16.gmra.mxu0 %vm1507_vm1, %v6764_v44 }
 0x202   : > { %4321 = vmatprep.mubr.bf16.mxu0 %v8396_v6 }
 0x207   : > { %5568 = vmatmul.mubr.msk.bf16.vlgmr.msra.gmra.mxu1 %vm1507_vm1, %v6540_v50 }
 0x208   : > { %5843 = vmatpush3.bf16.msra.mxu1 %v6023_v27  ;;  %5571 = vmatprep.mubr.msk.bf16.mxu1 %vm1507_vm1, %v6545_v58  ;;  %v6003_v27 = vld [vmem:[#allocation6 + $0xb8] sm:$0xff]  }
 0x209   : > { %5840 = vmatprep.subr.bf16.mxu1 %v6024_v45 }
 0x20c   : > { %5844 = vmatpush3.bf16.msra.mxu1 %v6024_v45 }
 0x20d   : > { %5841 = vmatprep.subr.bf16.mxu1 %v6025_v47 }
 0x20f   : > { %5572 = vmatmul.mubr.msk.bf16.gmra.mxu1 %vm1507_vm1, %v6557_v7  ;;  %v6785_v50 = vpop.f32.mrf.mxu1 }
 0x210   : > { %5575 = vmatprep.mubr.msk.bf16.mxu1 %vm1507_vm1, %v6562_v13  ;;  %5845 = vmatpush3.bf16.msra.mxu1 %v6025_v47 }
 0x211   : > { %5842 = vmatprep.subr.bf16.mxu1 %v6026_v40  ;;  %v6791_v58 = vpop.f32.mrf.mxu1 }
 0x213   : > { %v6793_v7 = vpop.f32.mrf.mxu1 }
 0x214   : > { %5846 = vmatpush3.bf16.msra.mxu1 %v6026_v40 }
 0x215   : > { %5639 = vmatprep.subr.bf16.mxu1 %v5999_v48  ;;  %v6799_v13 = vpop.f32.mrf.mxu1 }
 0x217   : > { %5576 = vmatmul.mubr.msk.bf16.gmra.mxu1 %vm1507_vm1, %v6573_v23 }
 0x218   : > { %5579 = vmatprep.mubr.msk.bf16.mxu1 %vm1507_vm1, %v6578_v29 }
 0x21f   : > { %5580 = vmatmul.mubr.msk.bf16.gmra.mxu1 %vm1507_vm1, %v6589_v41  ;;  %v6801_v49 = vpop.f32.mrf.mxu1 }
 0x220   : > { %5583 = vmatprep.mubr.msk.bf16.mxu1 %vm1507_vm1, %v6594_v46 }
 0x221   : > { %v6803_v51 = vpop.f32.mrf.mxu1 }
 0x223   : > { %v6809_v52 = vpop.f32.mrf.mxu1 }
 0x225   : > { %v6811_v54 = vpop.f32.mrf.mxu1 }
 0x227   : > { %5584 = vmatmul.mubr.msk.bf16.gmra.mxu1 %vm1507_vm1, %v6608_v0 }
 0x228   : > { %5587 = vmatprep.mubr.msk.bf16.mxu1 %vm1507_vm1, %v6620_v20 }
 0x22f   : > { %5588 = vmatmul.mubr.msk.bf16.gmra.mxu1 %vm1507_vm1, %v6632_v39  ;;  %v6817_v55 = vpop.f32.mrf.mxu1 }
 0x230   : > { %5591 = vmatprep.mubr.msk.bf16.mxu1 %vm1507_vm1, %v6644_v62  ;;  %v6005_v62 = vld [vmem:[#allocation6 + $0xa8] sm:$0xff]  }
 0x231   : > { %v6819_v60 = vpop.f32.mrf.mxu1 }
 0x233   : > { %v6825_v57 = vpop.f32.mrf.mxu1 }
 0x235   : > { %v6827_v63 = vpop.f32.mrf.mxu1 }
 0x237   : > { %5592 = vmatmul.mubr.msk.bf16.gmra.mxu1 %vm1507_vm1, %v6655_v9 }
 0x238   : > { %5595 = vmatprep.mubr.msk.bf16.mxu1 %vm1507_vm1, %v6667_v14 }
 0x23f   : > { %5596 = vmatmul.mubr.msk.bf16.gmra.mxu1 %vm1507_vm1, %v6661_v59  ;;  %v6829_v4 = vpop.f32.mrf.mxu1  ;;  %v6004_v59 = vld [vmem:[#allocation6 + $0xb0] sm:$0xff]  }
 0x240   : > { %5619 = vmatprep.mubr.msk.bf16.mxu1 %vm1507_vm1, %v6542_v53 }
 0x241   : > { %v6835_v16 = vpop.f32.mrf.mxu1 }
 0x243   : > { %v6837_v22 = vpop.f32.mrf.mxu1 }
 0x245   : > { %v6843_v45 = vpop.f32.mrf.mxu1 }
 0x247   : > { %5620 = vmatmul.mubr.msk.bf16.vlgmr.msra.gmra.mxu1 %vm1507_vm1, %v6559_v10 }
 0x248   : > { %5640 = vmatpush3.bf16.msra.mxu1 %v5999_v48  ;;  %5623 = vmatprep.mubr.msk.bf16.mxu1 %vm1507_vm1, %v6575_v26 }
 0x249   : > { %5641 = vmatprep.subr.bf16.mxu1 %v6000_v3 }
 0x24c   : > { %5642 = vmatpush3.bf16.msra.mxu1 %v6000_v3 }
 0x24d   : > { %5643 = vmatprep.subr.bf16.mxu1 %v6001_v5 }
 0x24f   : > { %5624 = vmatmul.mubr.msk.bf16.gmra.mxu1 %vm1507_vm1, %v6591_v43  ;;  %v6845_v47 = vpop.f32.mrf.mxu1 }
 0x250   : > { %5627 = vmatprep.mubr.msk.bf16.mxu1 %vm1507_vm1, %v6605_v61  ;;  %5644 = vmatpush3.bf16.msra.mxu1 %v6001_v5 }
 0x251   : > { %5645 = vmatprep.subr.bf16.mxu1 %v6002_v19  ;;  %v6851_v40 = vpop.f32.mrf.mxu1 }
 0x253   : > { %v6853_v48 = vpop.f32.mrf.mxu1 }
 0x254   : > { %5646 = vmatpush3.bf16.msra.mxu1 %v6002_v19  ;;  %8433 = vst [vmem:[#allocation23_spill] sm:$0xff] %v6853_v48 }
 0x255   : > { %5719 = vmatprep.subr.bf16.mxu1 %v6003_v27  ;;  %v6859_v3 = vpop.f32.mrf.mxu1 }
 0x256   : > { %8434 = vst [vmem:[#allocation24_spill] sm:$0xff] %v6859_v3  ;;  %v6029_v3 = vld [vmem:[#allocation2 + $0x18] sm:$0xff]  }
 0x257   : > { %5628 = vmatmul.mubr.msk.bf16.gmra.mxu1 %vm1507_vm1, %v6617_v17 }
 0x258   : > { %5631 = vmatprep.mubr.msk.bf16.mxu1 %vm1507_vm1, %v6629_v35 }
 0x25f   : > { %5632 = vmatmul.mubr.msk.bf16.gmra.mxu1 %vm1507_vm1, %v6641_v56  ;;  %v6861_v5 = vpop.f32.mrf.mxu1 }
 0x260   : > { %5635 = vmatprep.mubr.msk.bf16.mxu1 %vm1507_vm1, %v6652_v8  ;;  %8435 = vst [vmem:[#allocation25_spill] sm:$0xff] %v6861_v5  ;;  %v6028_v5 = vld [vmem:[#allocation2 + $0x10] sm:$0xff]  }
 0x261   : > { %v6863_v19 = vpop.f32.mrf.mxu1 }
 0x262   : > { %8436 = vst [vmem:[#allocation26_spill] sm:$0xff] %v6863_v19 }
 0x263   : > { %v6869_v6 = vpop.f32.mrf.mxu1 }
 0x264   : > { %8437 = vst [vmem:[#allocation27_spill] sm:$0xff] %v6869_v6 }
 0x265   : > { %v6871_v14 = vpop.f32.mrf.mxu1 }
 0x266   : > { %8438 = vst [vmem:[#allocation28_spill] sm:$0xff] %v6871_v14 }
 0x267   : > { %5636 = vmatmul.mubr.msk.bf16.gmra.mxu1 %vm1507_vm1, %v6665_v12 }
 0x268   : > { %5647 = vmatprep.mubr.msk.bf16.mxu1 %vm1507_vm1, %v6663_v1  ;;  %v6006_v1 = vld [vmem:[#allocation6 + $0xa0] sm:$0xff]  }
 0x26f   : > { %5648 = vmatmul.mubr.msk.bf16.vlgmr.msra.gmra.mxu1 %vm1507_vm1, %v6679_v15  ;;  %v6877_v9 = vpop.f32.mrf.mxu1 }
 0x270   : > { %5720 = vmatpush3.bf16.msra.mxu1 %v6003_v27  ;;  %5651 = vmatprep.mubr.msk.bf16.mxu1 %vm1507_vm1, %v6681_v18  ;;  %8439 = vst [vmem:[#allocation29_spill] sm:$0xff] %v6877_v9  ;;  %v6007_v18 = vld [vmem:[#allocation6 + $0x118] sm:$0xff]  }
 0x271   : > { %5721 = vmatprep.subr.bf16.mxu1 %v6004_v59  ;;  %v6879_v39 = vpop.f32.mrf.mxu1  ;;  %v6027_v9 = vld [vmem:[#allocation2 + $0x8] sm:$0xff]  }
 0x272   : > { %8440 = vst [vmem:[#allocation30_spill] sm:$0xff] %v6879_v39 }
 0x273   : > { %v6885_v15 = vpop.f32.mrf.mxu1 }
 0x274   : > { %5722 = vmatpush3.bf16.msra.mxu1 %v6004_v59  ;;  %8441 = vst [vmem:[#allocation31_spill] sm:$0xff] %v6885_v15 }
 0x275   : > { %5723 = vmatprep.subr.bf16.mxu1 %v6005_v62  ;;  %v6887_v27 = vpop.f32.mrf.mxu1 }
 0x277   : > { %5652 = vmatmul.mubr.msk.bf16.gmra.mxu1 %vm1507_vm1, %v6692_v21 }
 0x278   : > { %5655 = vmatprep.mubr.msk.bf16.mxu1 %vm1507_vm1, %v6694_v25  ;;  %5724 = vmatpush3.bf16.msra.mxu1 %v6005_v62 }
 0x279   : > { %5725 = vmatprep.subr.bf16.mxu1 %v6006_v1 }
 0x27c   : > { %5726 = vmatpush3.bf16.msra.mxu1 %v6006_v1 }
 0x27d   : > { %5799 = vmatprep.subr.bf16.mxu1 %v6007_v18 }
 0x27f   : > { %v6889_v59 = vpop.f32.mrf.mxu1  ;;  %5656 = vmatmul.mubr.msk.bf16.gmra.mxu1 %vm1507_vm1, %v6704_v2 }
 0x280   : > { %5659 = vmatprep.mubr.msk.bf16.mxu1 %vm1507_vm1, %v6706_v28 }
 0x281   : > { %v6895_v21 = vpop.f32.mrf.mxu1 }
 0x283   : > { %v6897_v25 = vpop.f32.mrf.mxu1 }
 0x285   : > { %v6899_v62 = vpop.f32.mrf.mxu1 }
 0x287   : > { %v6901_v20 = vpop.f32.mrf.mxu1  ;;  %5660 = vmatmul.mubr.msk.bf16.gmra.mxu1 %vm1507_vm1, %v6716_v30 }
 0x288   : > { %5663 = vmatprep.mubr.msk.bf16.mxu1 %vm1507_vm1, %v6718_v31 }
 0x289   : > { %v6907_v1 = vpop.f32.mrf.mxu1 }
 0x28b   : > { %v6909_v2 = vpop.f32.mrf.mxu1 }
 0x28d   : > { %v6911_v0 = vpop.f32.mrf.mxu1 }
 0x28f   : > { %v6913_v28 = vpop.f32.mrf.mxu1  ;;  %5664 = vmatmul.mubr.msk.bf16.gmra.mxu1 %vm1507_vm1, %v6728_v32 }
 0x290   : > { %5667 = vmatprep.mubr.msk.bf16.mxu1 %vm1507_vm1, %v6730_v33 }
 0x291   : > { %v6919_v46 = vpop.f32.mrf.mxu1 }
 0x293   : > { %v6921_v30 = vpop.f32.mrf.mxu1 }
 0x295   : > { %v6923_v41 = vpop.f32.mrf.mxu1 }
 0x297   : > { %v6925_v31 = vpop.f32.mrf.mxu1  ;;  %5668 = vmatmul.mubr.msk.bf16.gmra.mxu1 %vm1507_vm1, %v6740_v34 }
 0x298   : > { %5671 = vmatprep.mubr.msk.bf16.mxu1 %vm1507_vm1, %v6742_v36 }
 0x299   : > { %v6931_v29 = vpop.f32.mrf.mxu1 }
 0x29b   : > { %v6933_v32 = vpop.f32.mrf.mxu1 }
 0x29d   : > { %v6935_v23 = vpop.f32.mrf.mxu1 }
 0x29f   : > { %v6937_v33 = vpop.f32.mrf.mxu1  ;;  %5672 = vmatmul.mubr.msk.bf16.gmra.mxu1 %vm1507_vm1, %v6752_v38 }
 0x2a0   : > { %5675 = vmatprep.mubr.msk.bf16.mxu1 %vm1507_vm1, %v6754_v42  ;;  %v6008_v42 = vld [vmem:[#allocation6 + $0x110] sm:$0xff]  }
 0x2a1   : > { %v6943_v15 = vpop.f32.mrf.mxu1 }
 0x2a3   : > { %v6945_v34 = vpop.f32.mrf.mxu1 }
 0x2a5   : > { %v6947_v39 = vpop.f32.mrf.mxu1 }
 0x2a7   : > { %v6949_v36 = vpop.f32.mrf.mxu1  ;;  %5676 = vmatmul.mubr.msk.bf16.gmra.mxu1 %vm1507_vm1, %v6764_v44 }
 0x2a8   : > { %5727 = vmatprep.mubr.msk.bf16.mxu1 %vm1507_vm1, %v6027_v9  ;;  %v6009_v9 = vld [vmem:[#allocation6 + $0x108] sm:$0xff]  }
 0x2a9   : > { %v6954_v14 = vpop.f32.mrf.mxu1 }
 0x2aa   : > { %8442 = vst [vmem:[#allocation32_spill] sm:$0xff] %v6954_v14 }
 0x2ab   : > { %v6956_v38 = vpop.f32.mrf.mxu1 }
 0x2ac   : > { %8443 = vst [vmem:[#allocation33_spill] sm:$0xff] %v6956_v38 }
 0x2ad   : > { %v6958_v6 = vpop.f32.mrf.mxu1 }
 0x2ae   : > { %8444 = vst [vmem:[#allocation34_spill] sm:$0xff] %v6958_v6  ;;  %v6010_v6 = vld [vmem:[#allocation6 + $0x100] sm:$0xff]  }
 0x2af   : > { %v6960_v19 = vpop.f32.mrf.mxu1  ;;  %5728 = vmatmul.mubr.msk.bf16.vlgmr.msra.gmra.mxu1 %vm1507_vm1, %v6028_v5 }
 0x2b0   : > { %5800 = vmatpush3.bf16.msra.mxu1 %v6007_v18  ;;  %5731 = vmatprep.mubr.msk.bf16.mxu1 %vm1507_vm1, %v6029_v3 }
 0x2b1   : > { %v6964_v44 = vpop.f32.mrf.mxu1  ;;  %5801 = vmatprep.subr.bf16.mxu1 %v6008_v42 }
 0x2b3   : > { %v6966_v48 = vpop.f32.mrf.mxu1 }
 0x2b4   : > { %5802 = vmatpush3.bf16.msra.mxu1 %v6008_v42 }
 0x2b5   : > { %v6968_v38 = vpop.f32.mrf.mxu1  ;;  %5803 = vmatprep.subr.bf16.mxu1 %v6009_v9 }
 0x2b6   : > { %8445 = vst [vmem:[#allocation35_spill] sm:$0xff] %v6968_v38 }
 0x2b7   : > { %v6970_v14 = vpop.f32.mrf.mxu1  ;;  %5732 = vmatmul.mubr.msk.bf16.gmra.mxu1 %vm1507_vm1, %v6504_v11 }
 0x2b8   : > { %5735 = vmatprep.mubr.msk.bf16.mxu1 %vm1507_vm1, %v6516_v24  ;;  %5804 = vmatpush3.bf16.msra.mxu1 %v6009_v9 }
 0x2b9   : > { %v6976_v3 = vpop.f32.mrf.mxu1  ;;  %5805 = vmatprep.subr.bf16.mxu1 %v6010_v6 }
 0x2bb   : > { %v6978_v5 = vpop.f32.mrf.mxu1 }
 0x2bc   : > { %8446 = vst [vmem:[#allocation36_spill] sm:$0xff] %v6978_v5  ;;  %5806 = vmatpush3.bf16.msra.mxu1 %v6010_v6 }
 0x2bd   : > { %v2002_v18 = vpop.f32.mrf.mxu1 }
 0x2be   : > { %v6981_v42 = vadd.f32 %v2002_v18, %v6887_v27  ;;  %v6996_v18 = vpop.f32.mrf.mxu0 }
 0x2bf   : > { %v5557_v38 = vpop.f32.mrf.mxu1  ;;  %5736 = vmatmul.mubr.msk.bf16.gmra.mxu1 %vm1507_vm1, %v6526_v37  ;;  %v1912_v37 = vadd.f32 %v6901_v20, %v6785_v50  ;;  %v1915_v20 = vadd.f32 %v6909_v2, %v6793_v7  ;;  %v1920_v7 = vadd.f32 %v6919_v46, %v6803_v51 }
 0x2c0   : > { %v6986_v11 = vadd.f32 %v5557_v38, %v6889_v59  ;;  %5739 = vmatprep.mubr.msk.bf16.mxu1 %vm1507_vm1, %v6542_v53  ;;  %v1904_v53 = vadd.f32 %v6907_v1, %v6791_v58 }
 0x2c1   : > { %v2015_v24 = vpop.f32.mrf.mxu1 }
 0x2c2   : > { %v6991_v9 = vadd.f32 %v2015_v24, %v6895_v21 }
 0x2c3   : > { %v5558_v5 = vpop.f32.mrf.mxu1 }
 0x2c4   : > { %v6994_v6 = vadd.f32 %v5558_v5, %v6897_v25  ;;  %v7011_v5 = vpop.f32.mrf.mxu0 }
 0x2c5   : > { %v2018_v27 = vpop.f32.mrf.mxu1 }
 0x2c6   : > { %v7001_v59 = vadd.f32 %v2018_v27, %v6899_v62  ;;  %v7021_v1 = vpop.f32.mrf.mxu0 }
 0x2c7   : > { %v5569_v38 = vpop.f32.mrf.mxu1  ;;  %5740 = vmatmul.mubr.msk.bf16.gmra.mxu1 %vm1507_vm1, %v6559_v10  ;;  %v1907_v10 = vadd.f32 %v6911_v0, %v6799_v13 }
 0x2c8   : > { %v7007_v21 = vadd.f32 %v5569_v38, %v1912_v37  ;;  %5743 = vmatprep.mubr.msk.bf16.mxu1 %vm1507_vm1, %v6575_v26  ;;  %v1928_v26 = vadd.f32 %v6913_v28, %v6801_v49  ;;  %v7035_v13 = vpop.f32.mrf.mxu0  ;;  %v1931_v49 = vadd.f32 %v6921_v30, %v6809_v52  ;;  %v1936_v30 = vadd.f32 %v6931_v29, %v6819_v60 }
 0x2c9   : > { %v2258_v25 = vpop.f32.mrf.mxu1  ;;  %v1960_v60 = vadd.f32 %v6937_v33, %v6829_v4  ;;  %v1963_v4 = vadd.f32 %v6945_v34, %v6837_v22  ;;  %v8449_v22 = vld [vmem:[#allocation32_spill] sm:$0xff] }
 0x2ca   : > { %v7015_v50 = vadd.f32 %v2258_v25, %v1904_v53  ;;  %v7041_v53 = vpop.f32.mrf.mxu0  ;;  %v1968_v34 = vadd.f32 %v8449_v22, %v6851_v40 }
 0x2cb   : > { %v5570_v62 = vpop.f32.mrf.mxu1 }
 0x2cc   : > { %8447 = vst [vmem:[#allocation37_spill] sm:$0xff] %v7015_v50  ;;  %v7019_v24 = vadd.f32 %v5570_v62, %v1915_v20  ;;  %v7053_v52 = vpop.f32.mrf.mxu0 }
 0x2cd   : > { %v2261_v58 = vpop.f32.mrf.mxu1 }
 0x2ce   : > { %v7025_v27 = vadd.f32 %v2261_v58, %v1907_v10  ;;  %v7065_v10 = vpop.f32.mrf.mxu0 }
 0x2cf   : > { %v5573_v37 = vpop.f32.mrf.mxu1  ;;  %5744 = vmatmul.mubr.msk.bf16.gmra.mxu1 %vm1507_vm1, %v6591_v43  ;;  %v1923_v43 = vadd.f32 %v6923_v41, %v6811_v54  ;;  %v1947_v54 = vadd.f32 %v6933_v32, %v6825_v57  ;;  %v1952_v32 = vadd.f32 %v6943_v15, %v6835_v16 }
 0x2d0   : > { %v7031_v2 = vadd.f32 %v5573_v37, %v1928_v26  ;;  %5747 = vmatprep.mubr.msk.bf16.mxu1 %vm1507_vm1, %v6605_v61  ;;  %v1944_v61 = vadd.f32 %v6925_v31, %v6817_v55  ;;  %v7077_v57 = vpop.f32.mrf.mxu0 }
 0x2d1   : > { %v2274_v0 = vpop.f32.mrf.mxu1 }
 0x2d2   : > { %v7039_v28 = vadd.f32 %v2274_v0, %v1920_v7 }
 0x2d3   : > { %v5574_v38 = vpop.f32.mrf.mxu1 }
 0x2d4   : > { %v7045_v46 = vadd.f32 %v5574_v38, %v1931_v49 }
 0x2d5   : > { %v2277_v51 = vpop.f32.mrf.mxu1 }
 0x2d6   : > { %v7049_v25 = vadd.f32 %v2277_v51, %v1923_v43  ;;  %v6030_v51 = vld [vmem:[#allocation2 + $0x10] sm:$0xff]  }
 0x2d7   : > { %v5577_v20 = vpop.f32.mrf.mxu1  ;;  %5748 = vmatmul.mubr.msk.bf16.gmra.mxu1 %vm1507_vm1, %v6617_v17  ;;  %v1939_v17 = vadd.f32 %v6935_v23, %v6827_v63  ;;  %v7085_v63 = vpop.f32.mrf.mxu0 }
 0x2d8   : > { %v7057_v62 = vadd.f32 %v5577_v20, %v1944_v61  ;;  %5751 = vmatprep.mubr.msk.bf16.mxu1 %vm1507_vm1, %v6629_v35  ;;  %v8451_v61 = vld [vmem:[#allocation33_spill] sm:$0xff] }
 0x2d9   : > { %v2290_v41 = vpop.f32.mrf.mxu1  ;;  %v7095_v15 = vpop.f32.mrf.mxu0 }
 0x2da   : > { %v7063_v55 = vadd.f32 %v2290_v41, %v1936_v30  ;;  %v8453_v41 = vld [vmem:[#allocation24_spill] sm:$0xff] }
 0x2db   : > { %v5578_v31 = vpop.f32.mrf.mxu1 }
 0x2dc   : > { %v7069_v58 = vadd.f32 %v5578_v31, %v1947_v54  ;;  %v8454_v54 = vld [vmem:[#allocation34_spill] sm:$0xff] }
 0x2dd   : > { %v2293_v29 = vpop.f32.mrf.mxu1  ;;  %v1971_v31 = vadd.f32 %v8454_v54, %v8453_v41 }
 0x2de   : > { %v7073_v26 = vadd.f32 %v2293_v29, %v1939_v17 }
 0x2df   : > { %v5581_v35 = vpop.f32.mrf.mxu1  ;;  %5752 = vmatmul.mubr.msk.bf16.gmra.mxu1 %vm1507_vm1, %v6641_v56  ;;  %v1955_v56 = vadd.f32 %v6947_v39, %v6843_v45  ;;  %v7109_v39 = vld [vmem:[%s8388_s4] ss:$0 sm:$0xff] }
 0x2e0   : > { %v7081_v37 = vadd.f32 %v5581_v35, %v1960_v60  ;;  %5755 = vmatprep.mubr.msk.bf16.mxu1 %vm1507_vm1, %v6652_v8  ;;  %v1976_v8 = vadd.f32 %v6949_v36, %v6845_v47  ;;  %v7111_v47 = vpop.f32.mrf.mxu0  ;;  %v8450_v36 = vld [vmem:[#allocation23_spill] sm:$0xff] }
 0x2e1   : > { %v2306_v23 = vpop.f32.mrf.mxu1  ;;  %v1979_v20 = vadd.f32 %v8451_v61, %v8450_v36 }
 0x2e2   : > { %v7089_v33 = vadd.f32 %v2306_v23, %v1952_v32  ;;  %v7123_v35 = vpop.f32.mrf.mxu0  ;;  %v8456_v32 = vld [vmem:[#allocation25_spill] sm:$0xff] }
 0x2e3   : > { %v5582_v7 = vpop.f32.mrf.mxu1  ;;  %v1992_v23 = vadd.f32 %v6960_v19, %v8456_v32  ;;  %v8465_v32 = vld [vmem:[#allocation29_spill] sm:$0xff] }
 0x2e4   : > { %v7093_v0 = vadd.f32 %v5582_v7, %v1963_v4  ;;  %v7137_v19 = vpop.f32.mrf.mxu0 }
 0x2e5   : > { %v2309_v16 = vpop.f32.mrf.mxu1 }
 0x2e6   : > { %v7099_v49 = vadd.f32 %v2309_v16, %v1955_v56  ;;  %v6031_v16 = vld [vmem:[#allocation2 + $0x18] sm:$0xff]  }
 0x2e7   : > { %v5585_v38 = vpop.f32.mrf.mxu1  ;;  %5756 = vmatmul.mubr.msk.bf16.gmra.mxu1 %vm1507_vm1, %v6665_v12 }
 0x2e8   : > { %8448 = vst [vmem:[#allocation38_spill] sm:$0xff] %v7099_v49  ;;  %v2403_v43 = vadd.f32 %v5585_v38, %v1976_v8  ;;  %5807 = vmatprep.mubr.msk.bf16.mxu1 %vm1507_vm1, %v6030_v51  ;;  %v8458_v8 = vld [vmem:[#allocation26_spill] sm:$0xff] }
 0x2e9   : > { %v2322_v45 = vpop.f32.mrf.mxu1  ;;  %v1984_v38 = vadd.f32 %v6964_v44, %v8458_v8  ;;  %v8463_v44 = vld [vmem:[#allocation35_spill] sm:$0xff]  ;;  %v8467_v8 = vld [vmem:[#allocation30_spill] sm:$0xff] }
 0x2ea   : > { %v7116_v12 = vadd.f32 %v7109_v39, %v2403_v43  ;;  %v2401_v30 = vadd.f32 %v2322_v45, %v1968_v34  ;;  %v6032_v43 = vld [vmem:[#allocation2 + $0x20] sm:$0xff]   ;;  %v8460_v45 = vld [vmem:[#allocation27_spill] sm:$0xff] }
 0x2eb   : > { %v5586_v40 = vpop.f32.mrf.mxu1  ;;  %v1995_v36 = vadd.f32 %v6966_v48, %v8460_v45 }
 0x2ec   : > { %8452 = vst [vmem:[#allocation32_spill] sm:$0xff] %v7116_v12  ;;  %v7121_v17 = vadd.f32 %v7109_v39, %v2401_v30  ;;  %v2404_v29 = vadd.f32 %v5586_v40, %v1979_v20  ;;  %v8462_v40 = vld [vmem:[#allocation28_spill] sm:$0xff]  ;;  %v904_v12 = vlaneseq }
 0x2ed   : > { %v2325_v60 = vpop.f32.mrf.mxu1  ;;  %v1987_v41 = vadd.f32 %v8463_v44, %v8462_v40 }
 0x2ee   : > { %8455 = vst [vmem:[#allocation23_spill] sm:$0xff] %v7121_v17  ;;  %v7128_v4 = vadd.f32 %v7109_v39, %v2404_v29  ;;  %v2402_v7 = vadd.f32 %v2325_v60, %v1971_v31  ;;  %v7149_v60 = vpop.f32.mrf.mxu0 }
 0x2ef   : > { %v5589_v56 = vpop.f32.mrf.mxu1  ;;  %5808 = vmatmul.mubr.msk.bf16.vlgmr.msra.gmra.mxu1 %vm1507_vm1, %v6031_v16  ;;  %v6033_v16 = vld [vmem:[#allocation2 + $0x28] sm:$0xff]  }
 0x2f0   : > { %8457 = vst [vmem:[#allocation33_spill] sm:$0xff] %v7128_v4  ;;  %v7134_v22 = vadd.f32 %v7109_v39, %v2402_v7  ;;  %v2407_v34 = vadd.f32 %v5589_v56, %v1992_v23  ;;  %5811 = vmatprep.mubr.msk.bf16.mxu1 %vm1507_vm1, %v6032_v43  ;;  %v2008_v23 = vadd.f32 %v6970_v14, %v8465_v32  ;;  %v7163_v14 = vpop.f32.mrf.mxu0  ;;  %v7298_v4 = vshrl.u32 %v904_v12, 7 }
 0x2f1   : > { %v2338_v51 = vpop.f32.mrf.mxu1 }
 0x2f2   : > { %8459 = vst [vmem:[#allocation24_spill] sm:$0xff] %v7134_v22  ;;  %v7142_v61 = vadd.f32 %v7109_v39, %v2407_v34  ;;  %v2405_v20 = vadd.f32 %v2338_v51, %v1984_v38  ;;  %v2000_v38 = vadd.f32 %v6976_v3, %v8467_v8  ;;  %v6034_v51 = vld [vmem:[#allocation2 + $0x30] sm:$0xff]   ;;  %v7173_v32 = vpop.f32.mrf.mxu0  ;;  %vm3101_vm2 = vcmp.lt.s32.totalorder %v7298_v4, 1 }
 0x2f3   : > { %v5590_v30 = vpop.f32.mrf.mxu1 }
 0x2f4   : > { %8461 = vst [vmem:[#allocation34_spill] sm:$0xff] %v7142_v61  ;;  %v7147_v54 = vadd.f32 %v7109_v39, %v2405_v20  ;;  %v2408_v31 = vadd.f32 %v5590_v30, %v1995_v36  ;;  %v8469_v36 = vld [vmem:[#allocation31_spill] sm:$0xff]  ;;  %v8470_v20 = vld [vmem:[#allocation36_spill] sm:$0xff]  ;;  %v8495_v61 = vld [vmem:[#allocation22_spill] sm:$0xff] }
 0x2f5   : > { %v2341_v29 = vpop.f32.mrf.mxu1  ;;  %v2011_v30 = vadd.f32 %v8470_v20, %v8469_v36  ;;  %v6011_v20 = vld [vmem:[%s8389_s5 + $0x30] ss:$8 sps:$4 sm:$0xff]  }
 0x2f6   : > { %8464 = vst [vmem:[#allocation25_spill] sm:$0xff] %v7147_v54  ;;  %v7154_v48 = vadd.f32 %v7109_v39, %v2408_v31  ;;  %v2406_v7 = vadd.f32 %v2341_v29, %v1987_v41 }
 0x2f7   : > { %v5593_v56 = vpop.f32.mrf.mxu1  ;;  %5812 = vmatmul.mubr.msk.bf16.gmra.mxu1 %vm1507_vm1, %v6033_v16  ;;  %v8474_v16 = vld [vmem:[#allocation12_spill] sm:$0xff] }
 0x2f8   : > { %8466 = vst [vmem:[#allocation26_spill] sm:$0xff] %v7154_v48  ;;  %v7160_v34 = vadd.f32 %v7109_v39, %v2406_v7  ;;  %v2411_v43 = vadd.f32 %v5593_v56, %v2008_v23  ;;  %5815 = vmatprep.mubr.msk.bf16.mxu1 %vm1507_vm1, %v6034_v51  ;;  %v6019_v48 = vld [vmem:[%s8389_s5 + $0x14] ss:$8 sps:$4 sm:$0xff]  }
 0x2f9   : > { %v2354_v45 = vpop.f32.mrf.mxu1 }
 0x2fa   : > { %8468 = vst [vmem:[#allocation27_spill] sm:$0xff] %v7160_v34  ;;  %v7168_v40 = vadd.f32 %v7109_v39, %v2411_v43  ;;  %v2409_v44 = vadd.f32 %v2354_v45, %v2000_v38  ;;  %v8476_v43 = vld [vmem:[#allocation13_spill] sm:$0xff]  ;;  %v7187_v45 = vpop.f32.mrf.mxu0 }
 0x2fb   : > { %v5594_v41 = vpop.f32.mrf.mxu1  ;;  %v6017_v34 = vld [vmem:[%s8389_s5 + $0x10] ss:$8 sps:$4 sm:$0xff]  }
 0x2fc   : > { %8471 = vst [vmem:[#allocation28_spill] sm:$0xff] %v7168_v40  ;;  %v7171_v3 = vadd.f32 %v7109_v39, %v2409_v44  ;;  %v2412_v31 = vadd.f32 %v5594_v41, %v2011_v30  ;;  %v6013_v30 = vld [vmem:[%s8389_s5 + $0x34] ss:$8 sps:$4 sm:$0xff]  }
 0x2fd   : > { %v2357_v29 = vpop.f32.mrf.mxu1  ;;  %4297 = vmatprep.subr.bf16.mxu0 %v6013_v30 }
 0x2fe   : > { %8472 = vst [vmem:[#allocation35_spill] sm:$0xff] %v7171_v3  ;;  %v7176_v23 = vadd.f32 %v7109_v39, %v2412_v31  ;;  %v2410_v7 = vadd.f32 %v2357_v29, %v6981_v42  ;;  %4298 = vmatpush1.bf16.msra.mxu0 %v6011_v20  ;;  %v7203_v29 = vpop.f32.mrf.mxu0  ;;  %v8494_v3 = vld [vmem:[#allocation20_spill] sm:$0xff] }
 0x2ff   : > { %v5597_v56 = vpop.f32.mrf.mxu1  ;;  %5816 = vmatmul.mubr.msk.bf16.gmra.mxu1 %vm1507_vm1, %v8474_v16  ;;  %v8480_v16 = vld [vmem:[#allocation14_spill] sm:$0xff] }
 0x300   : > { %8473 = vst [vmem:[#allocation29_spill] sm:$0xff] %v7176_v23  ;;  %v7182_v8 = vadd.f32 %v7109_v39, %v2410_v7  ;;  %v2415_v38 = vadd.f32 %v5597_v56, %v6986_v11  ;;  %5819 = vmatprep.mubr.msk.bf16.mxu1 %vm1507_vm1, %v8476_v43  ;;  %v8482_v43 = vld [vmem:[#allocation15_spill] sm:$0xff] }
 0x301   : > { %v2370_v51 = vpop.f32.mrf.mxu1 }
 0x302   : > { %8475 = vst [vmem:[#allocation30_spill] sm:$0xff] %v7182_v8  ;;  %v7190_v36 = vadd.f32 %v7109_v39, %v2415_v38  ;;  %v2413_v42 = vadd.f32 %v2370_v51, %v6991_v9  ;;  %v7220_v51 = vpop.f32.mrf.mxu0 }
 0x303   : > { %v5598_v11 = vpop.f32.mrf.mxu1 }
 0x304   : > { %8477 = vst [vmem:[#allocation31_spill] sm:$0xff] %v7190_v36  ;;  %v7200_v44 = vadd.f32 %v7109_v39, %v2413_v42  ;;  %v2416_v41 = vadd.f32 %v5598_v11, %v6994_v6  ;;  %v8483_v11 = vld [vmem:[#allocation16_spill] sm:$0xff] }
 0x305   : > { %v2373_v31 = vpop.f32.mrf.mxu1 }
 0x306   : > { %8478 = vst [vmem:[#allocation36_spill] sm:$0xff] %v7200_v44  ;;  %v7206_v9 = vadd.f32 %v7109_v39, %v2416_v41  ;;  %v2414_v7 = vadd.f32 %v2373_v31, %v7001_v59  ;;  %v7226_v59 = vpop.f32.mrf.mxu0  ;;  %v8484_v41 = vld [vmem:[#allocation17_spill] sm:$0xff]  ;;  %v8489_v44 = vld [vmem:[#allocation19_spill] sm:$0xff] }
 0x307   : > { %v7209_v56 = vpop.f32.mrf.mxu1  ;;  %5820 = vmatmul.mubr.msk.bf16.gmra.mxu1 %vm1507_vm1, %v8480_v16  ;;  %v6014_v16 = vld [vmem:[%s8389_s5 + $0x20] ss:$8 sps:$4 sm:$0xff]  }
 0x308   : > { %8479 = vst [vmem:[#allocation12_spill] sm:$0xff] %v7206_v9  ;;  %v7214_v38 = vadd.f32 %v7109_v39, %v2414_v7  ;;  %5823 = vmatprep.mubr.msk.bf16.mxu1 %vm1507_vm1, %v8482_v43  ;;  %v7236_v7 = vpop.f32.mrf.mxu0  ;;  %v6016_v43 = vld [vmem:[%s8389_s5 + $0x24] ss:$8 sps:$4 sm:$0xff]  }
 0x309   : > { %v7218_v6 = vpop.f32.mrf.mxu1  ;;  %4299 = vmatprep.subr.bf16.mxu0 %v6016_v43  ;;  %v8488_v9 = vld [vmem:[#allocation18_spill] sm:$0xff] }
 0x30a   : > { %8481 = vst [vmem:[#allocation13_spill] sm:$0xff] %v7214_v38  ;;  %4300 = vmatpush1.bf16.msra.mxu0 %v6014_v16 }
 0x30b   : > { %v7222_v42 = vpop.f32.mrf.mxu1  ;;  %4301 = vmatprep.subr.bf16.mxu0 %v6019_v48 }
 0x30d   : > { %v7224_v20 = vpop.f32.mrf.mxu1 }
 0x30e   : > { %4302 = vmatpush1.bf16.msra.mxu0 %v6017_v34 }
 0x30f   : > { %v7228_v30 = vpop.f32.mrf.mxu1  ;;  %5824 = vmatmul.mubr.msk.bf16.gmra.mxu1 %vm1507_vm1, %v8483_v11  ;;  %v7248_v11 = vpop.f32.mrf.mxu0 }
 0x310   : > { %5827 = vmatprep.mubr.msk.bf16.mxu1 %vm1507_vm1, %v8484_v41 }
 0x311   : > { %v7234_v31 = vpop.f32.mrf.mxu1  ;;  %v7258_v40 = vpop.f32.mrf.mxu0 }
 0x313   : > { %v7244_v36 = vpop.f32.mrf.mxu1  ;;  %v7264_v23 = vpop.f32.mrf.mxu0 }
 0x314   : > { %8485 = vst [vmem:[#allocation14_spill] sm:$0xff] %v7244_v36  ;;  %v911_v36 = vadd.s32 48, %v7298_v4 }
 0x315   : > { %v7246_v38 = vpop.f32.mrf.mxu1 }
 0x316   : > { %8486 = vst [vmem:[#allocation15_spill] sm:$0xff] %v7246_v38  ;;  %v909_v38 = vadd.s32 32, %v7298_v4 }
 0x317   : > { %v7250_v41 = vpop.f32.mrf.mxu1  ;;  %5828 = vmatmul.mubr.msk.bf16.gmra.mxu1 %vm1507_vm1, %v8488_v9 }
 0x318   : > { %8487 = vst [vmem:[#allocation16_spill] sm:$0xff] %v7250_v41  ;;  %5831 = vmatprep.mubr.msk.bf16.mxu1 %vm1507_vm1, %v8489_v44  ;;  %v7274_v44 = vpop.f32.mrf.mxu0 }
 0x319   : > { %v7256_v50 = vpop.f32.mrf.mxu1 }
 0x31a   : > { %8490 = vst [vmem:[#allocation17_spill] sm:$0xff] %v7256_v50 }
 0x31b   : > { %v7260_v8 = vpop.f32.mrf.mxu1 }
 0x31c   : > { %8491 = vst [vmem:[#allocation18_spill] sm:$0xff] %v7260_v8 }
 0x31d   : > { %v7262_v43 = vpop.f32.mrf.mxu1 }
 0x31e   : > { %8492 = vst [vmem:[#allocation19_spill] sm:$0xff] %v7262_v43 }
 0x31f   : > { %v7266_v16 = vpop.f32.mrf.mxu1  ;;  %5832 = vmatmul.mubr.msk.bf16.gmra.mxu1 %vm1507_vm1, %v8494_v3  ;;  %v7286_v3 = vpop.f32.mrf.mxu0 }
 0x320   : > { %8493 = vst [vmem:[#allocation39_spill] sm:$0xff] %v7266_v16  ;;  %5835 = vmatprep.mubr.msk.bf16.mxu1 %vm1507_vm1, %v8495_v61 }
 0x321   : > { %v7272_v9 = vpop.f32.mrf.mxu1  ;;  %v7294_v8 = vpop.f32.mrf.mxu0 }
 0x322   : > { %8496 = vst [vmem:[#allocation20_spill] sm:$0xff] %v7272_v9  ;;  %v8500_v9 = vld [vmem:[#allocation21_spill] sm:$0xff] }
 0x323   : > { %v7282_v54 = vpop.f32.mrf.mxu1 }
 0x324   : > { %8497 = vst [vmem:[#allocation22_spill] sm:$0xff] %v7282_v54 }
 0x325   : > { %v7284_v16 = vpop.f32.mrf.mxu1 }
 0x326   : > { %8498 = vst [vmem:[#allocation40_spill] sm:$0xff] %v7284_v16  ;;  %v7302_v16 = vpop.f32.mrf.mxu0 }
 0x327   : > { %v7288_v61 = vpop.f32.mrf.mxu1  ;;  %5836 = vmatmul.mubr.msk.bf16.gmra.mxu1 %vm1507_vm1, %v8500_v9 }
 0x328   : > { %8499 = vst [vmem:[#allocation41_spill] sm:$0xff] %v7288_v61  ;;  %v907_v61 = vadd.s32 16, %v7298_v4  ;;  %v7306_v9 = vpop.f32.mrf.mxu0 }
 0x329   : > { %v7292_v43 = vpop.f32.mrf.mxu1  ;;  %8504 = vst [vmem:[#allocation44_spill] sm:$0xff] %v7306_v9 }
 0x32a   : > { %8501 = vst [vmem:[#allocation21_spill] sm:$0xff] %v7292_v43 }
 0x32b   : > { %v7296_v22 = vpop.f32.mrf.mxu1 }
 0x32c   : > { %8502 = vst [vmem:[#allocation42_spill] sm:$0xff] %v7296_v22  ;;  %v955_v22 = vand.u32 15, %v907_v61 }
 0x32d   : > { %v7300_v48 = vpop.f32.mrf.mxu1 }
 0x32e   : > { %8503 = vst [vmem:[#allocation43_spill] sm:$0xff] %v7300_v48  ;;  %v6020_v48 = vld [vmem:[%s8389_s5] ss:$8 sps:$4 sm:$0xff]   ;;  %vm7328_vm3 = vcmp.gt.s32.totalorder %v955_v22, 0 }
 0x32f   : > { %v5649_v34 = vpop.f32.mrf.mxu1 }
 0x330   : > { %v2725_v54 = vadd.f32 %v5649_v34, %v6996_v18  ;;  %v6022_v18 = vld [vmem:[%s8389_s5 + $0x4] ss:$8 sps:$4 sm:$0xff]  }
 0x331   : > { %v2716_v17 = vpop.f32.mrf.mxu1  ;;  %4303 = vmatprep.subr.bf16.mxu0 %v6022_v18 }
 0x332   : > { %v2717_v43 = vadd.f32 %v2716_v17, %v7011_v5  ;;  %v3039_v41 = vadd.f32 %v7137_v19, %v2725_v54  ;;  %v7319_v5 = vpop.f32.mrf.mxu0  ;;  %4304 = vmatpush1.bf16.msra.mxu0 %v6020_v48 }
 0x333   : > { %v5650_v50 = vpop.f32.mrf.mxu1 }
 0x334   : > { %v2728_v12 = vadd.f32 %v5650_v50, %v7021_v1  ;;  %v7322_v17 = vadd.f32 %v7149_v60, %v2717_v43  ;;  %v3071_v54 = vrot.slane %v3039_v41, 7  ;;  %v2427_v60 = vadd.f32 %v7109_v39, %v7019_v24  ;;  %v7335_v18 = vpop.f32.mrf.mxu0 }
 0x335   : > { %v2719_v34 = vpop.f32.mrf.mxu1  ;;  %v969_v43 = vand.u32 15, %v909_v38  ;;  %v2426_v38 = vadd.f32 %v7109_v39, %v7007_v21 }
 0x336   : > { %v3040_v50 = vadd.f32 %v7163_v14, %v2728_v12  ;;  %v2720_v1 = vadd.f32 %v2719_v34, %v7035_v13  ;;  %v983_v12 = vand.u32 15, %v911_v36  ;;  %v3069_v48 = vrot.slane %v7322_v17, 7 }
 0x337   : > { %v5653_v19 = vpop.f32.mrf.mxu1  ;;  %v2425_v34 = vadd.f32 %v7109_v39, %v7025_v27  ;;  %v915_v36 = vadd.s32 80, %v7298_v4  ;;  %vm7364_vm4 = vcmp.gt.s32.totalorder %v969_v43, 0  ;;  %v2428_v43 = vadd.f32 %v7109_v39, %v7039_v28 }
 0x338   : > { %v3072_v61 = vrot.slane %v3040_v50, 7  ;;  %v3038_v9 = vadd.f32 %v7173_v32, %v2720_v1  ;;  %v2741_v14 = vadd.f32 %v5653_v19, %v7041_v53  ;;  %v913_v53 = vadd.s32 64, %v7298_v4 }
 0x339   : > { %v2732_v13 = vpop.f32.mrf.mxu1  ;;  %vm7372_vm5 = vcmp.gt.s32.totalorder %v983_v12, 0 }
 0x33a   : > { %v3130_v41 = vsel %vm3101_vm2, %v3071_v54, %v3072_v61  ;;  %v3070_v32 = vrot.slane %v3038_v9, 7  ;;  %v2733_v22 = vadd.f32 %v2732_v13, %v7053_v52 }
 0x33b   : > { %v7343_v50 = vadd.f32 %v3130_v41, %v2427_v60  ;;  %v5654_v24 = vpop.f32.mrf.mxu1  ;;  %v3043_v60 = vadd.f32 %v7187_v45, %v2741_v14  ;;  %v7362_v41 = vpop.f32.mrf.mxu0  ;;  %v1011_v14 = vand.u32 15, %v915_v36  ;;  %v2431_v36 = vadd.f32 %v7109_v39, %v7045_v46 }
 0x33c   : > { %v3131_v1 = vsel %vm3101_vm2, %v3070_v32, %v3071_v54  ;;  %v3132_v52 = vsel %vm3101_vm2, %v3069_v48, %v3070_v32  ;;  %v3041_v27 = vadd.f32 %v7203_v29, %v2733_v22  ;;  %v2744_v13 = vadd.f32 %v5654_v24, %v7065_v10 }
 0x33d   : > { %8507 = vst [vmem:[#allocation45_spill] sm:$0xff] %v7343_v50  ;;  %v3232_v9 = vsel %vm7328_vm3, %v3131_v1, 0.0  ;;  %v7358_v19 = vadd.f32 %v3132_v52, %v2425_v34  ;;  %v2735_v21 = vpop.f32.mrf.mxu1  ;;  %v997_v10 = vand.u32 15, %v913_v53  ;;  %v7376_v34 = vpop.f32.mrf.mxu0  ;;  %v917_v53 = vadd.s32 96, %v7298_v4 }
 0x33e   : > { %v3073_v54 = vrot.slane %v3041_v27, 7  ;;  %v2736_v32 = vadd.f32 %v2735_v21, %v7077_v57  ;;  %v7369_v29 = vadd.f32 %v3232_v9, %v2426_v38  ;;  %v3044_v49 = vadd.f32 %v7220_v51, %v2744_v13 }
 0x33f   : > { %v5657_v45 = vpop.f32.mrf.mxu1  ;;  %v3075_v51 = vrot.slane %v3043_v60, 7  ;;  %v919_v60 = vadd.s32 112, %v7298_v4  ;;  %v7399_v13 = vpop.f32.mrf.mxu0  ;;  %vm7414_vm6 = vcmp.gt.s32.totalorder %v997_v10, 0  ;;  %vm7419_vm7 = vcmp.gt.s32.totalorder %v1011_v14, 0 }
 0x340   : > { %v3129_v24 = vsel %vm3101_vm2, %v3072_v61, %v3073_v54  ;;  %v3042_v57 = vadd.f32 %v7226_v59, %v2736_v32  ;;  %v2757_v38 = vadd.f32 %v5657_v45, %v7085_v63  ;;  %v3076_v1 = vrot.slane %v3044_v49, 7 }
 0x341   : > { %v3234_v12 = vsel %vm7364_vm4, %v3129_v24, 0.0  ;;  %v2748_v52 = vpop.f32.mrf.mxu1  ;;  %v2430_v59 = vadd.f32 %v7109_v39, %v7031_v2  ;;  %v2429_v63 = vadd.f32 %v7109_v39, %v7049_v25  ;;  %v7434_v14 = vadd.s32 144, %v7298_v4 }
 0x342   : > { %v3074_v27 = vrot.slane %v3042_v57, 7  ;;  %v2749_v28 = vadd.f32 %v2748_v52, %v7095_v15  ;;  %v7390_v9 = vadd.f32 %v3234_v12, %v2428_v43  ;;  %v3126_v61 = vsel %vm3101_vm2, %v3075_v51, %v3076_v1 }
 0x343   : > { %v5658_v50 = vpop.f32.mrf.mxu1  ;;  %v7401_v46 = vadd.f32 %v3126_v61, %v2431_v36  ;;  %v3047_v2 = vadd.f32 %v7236_v7, %v2757_v38  ;;  %v1039_v12 = vand.u32 15, %v919_v60  ;;  %v2432_v36 = vadd.f32 %v7109_v39, %v7063_v55 }
 0x344   : > { %v3127_v15 = vsel %vm3101_vm2, %v3074_v27, %v3075_v51  ;;  %v3128_v21 = vsel %vm3101_vm2, %v3073_v54, %v3074_v27  ;;  %v3045_v49 = vadd.f32 %v7248_v11, %v2749_v28  ;;  %v2760_v45 = vadd.f32 %v5658_v50, %v7111_v47  ;;  %v7426_v47 = vpop.f32.mrf.mxu0 }
 0x345   : > { %v3236_v25 = vsel %vm7372_vm5, %v3127_v15, 0.0  ;;  %v7410_v32 = vadd.f32 %v3128_v21, %v2429_v63  ;;  %v2751_v43 = vpop.f32.mrf.mxu1  ;;  %v1025_v11 = vand.u32 15, %v917_v53  ;;  %v3079_v27 = vrot.slane %v3047_v2, 7 }
 0x346   : > { %v2752_v57 = vadd.f32 %v2751_v43, %v7123_v35  ;;  %v7423_v7 = vadd.f32 %v3236_v25, %v2430_v59  ;;  %v3077_v22 = vrot.slane %v3045_v49, 7  ;;  %v3048_v38 = vadd.f32 %v7258_v40, %v2760_v45  ;;  %v7453_v15 = vpop.f32.mrf.mxu0 }
 0x347   : > { %v5661_v51 = vpop.f32.mrf.mxu1  ;;  %v7431_v35 = vadd.s32 128, %v7298_v4  ;;  %v2434_v61 = vadd.f32 %v7109_v39, %v7057_v62  ;;  %v2433_v55 = vadd.f32 %v7109_v39, %v7073_v26  ;;  %vm7470_vm8 = vcmp.gt.s32.totalorder %v1025_v11, 0 }
 0x348   : > { %v3046_v10 = vadd.f32 %v7264_v23, %v2752_v57  ;;  %v2773_v52 = vadd.f32 %v5661_v51, %v7209_v56  ;;  %v3125_v40 = vsel %vm3101_vm2, %v3076_v1, %v3077_v22  ;;  %v3080_v53 = vrot.slane %v3048_v38, 7  ;;  %v7468_v43 = vpop.f32.mrf.mxu0 }
 0x349   : > { %v2764_v28 = vpop.f32.mrf.mxu1  ;;  %v2435_v23 = vadd.f32 %v7109_v39, %v7069_v58  ;;  %v3238_v56 = vsel %vm7414_vm6, %v3125_v40, 0.0  ;;  %vm7478_vm9 = vcmp.gt.s32.totalorder %v1039_v12, 0 }
 0x34a   : > { %v3078_v59 = vrot.slane %v3046_v10, 7  ;;  %v2765_v63 = vadd.f32 %v2764_v28, %v7218_v6  ;;  %v3122_v1 = vsel %vm3101_vm2, %v3079_v27, %v3080_v53  ;;  %v7451_v60 = vadd.f32 %v3238_v56, %v2432_v36  ;;  %v7491_v40 = vpop.f32.mrf.mxu0  ;;  %v8521_v28 = vld [vmem:[#allocation38_spill] sm:$0xff] }
 0x34b   : > { %v5662_v50 = vpop.f32.mrf.mxu1  ;;  %v7455_v58 = vadd.f32 %v3122_v1, %v2435_v23  ;;  %v3051_v62 = vadd.f32 %v7274_v44, %v2773_v52  ;;  %v1067_v10 = vand.u32 15, %v7434_v14  ;;  %v2436_v52 = vadd.f32 %v7109_v39, %v7089_v33 }
 0x34c   : > { %v3123_v21 = vsel %vm3101_vm2, %v3078_v59, %v3079_v27  ;;  %v3124_v6 = vsel %vm3101_vm2, %v3077_v22, %v3078_v59  ;;  %v3049_v25 = vadd.f32 %v7286_v3, %v2765_v63  ;;  %v2776_v49 = vadd.f32 %v5662_v50, %v7222_v42 }
 0x34d   : > { %8516 = vst [vmem:[#allocation46_spill] sm:$0xff] %v7455_v58  ;;  %v3240_v26 = vsel %vm7419_vm7, %v3123_v21, 0.0  ;;  %v7464_v2 = vadd.f32 %v3124_v6, %v2433_v55  ;;  %v2767_v45 = vpop.f32.mrf.mxu1  ;;  %v1053_v42 = vand.u32 15, %v7431_v35  ;;  %v3083_v36 = vrot.slane %v3051_v62, 7  ;;  %v8526_v21 = vld [vmem:[#allocation14_spill] sm:$0xff] }
 0x34e   : > { %v2768_v57 = vadd.f32 %v2767_v45, %v7224_v20  ;;  %v7475_v22 = vadd.f32 %v3240_v26, %v2434_v61  ;;  %v3081_v44 = vrot.slane %v3049_v25, 7  ;;  %v3052_v54 = vadd.f32 %v7294_v8, %v2776_v49  ;;  %v8524_v61 = vld [vmem:[#allocation44_spill] sm:$0xff]  ;;  %v7519_v26 = vpop.f32.mrf.mxu0  ;;  %v8527_v25 = vld [vmem:[#allocation15_spill] sm:$0xff] }
 0x34f   : > { %v5665_v3 = vpop.f32.mrf.mxu1  ;;  %v925_v20 = vadd.s32 160, %v7298_v4  ;;  %v2438_v33 = vadd.f32 %v7109_v39, %v7081_v37  ;;  %v2437_v23 = vadd.f32 %v7109_v39, %v8521_v28  ;;  %vm7524_vm10 = vcmp.gt.s32.totalorder %v1053_v42, 0 }
 0x350   : > { %v3050_v51 = vadd.f32 %v7302_v16, %v2768_v57  ;;  %v2789_v11 = vadd.f32 %v5665_v3, %v7228_v30  ;;  %v3121_v8 = vsel %vm3101_vm2, %v3080_v53, %v3081_v44  ;;  %v3084_v12 = vrot.slane %v3052_v54, 7  ;;  %v8533_v3 = vld [vmem:[#allocation16_spill] sm:$0xff] }
 0x351   : > { %v2780_v27 = vpop.f32.mrf.mxu1  ;;  %v2439_v16 = vadd.f32 %v7109_v39, %v7093_v0  ;;  %v3242_v30 = vsel %vm7470_vm8, %v3121_v8, 0.0  ;;  %vm7530_vm11 = vcmp.gt.s32.totalorder %v1067_v10, 0  ;;  %v1081_v42 = vand.u32 15, %v925_v20 }
 0x352   : > { %v3082_v35 = vrot.slane %v3050_v51, 7  ;;  %v2781_v14 = vadd.f32 %v2780_v27, %v7234_v31  ;;  %v3118_v53 = vsel %vm3101_vm2, %v3083_v36, %v3084_v12  ;;  %v7504_v59 = vadd.f32 %v3242_v30, %v2436_v52  ;;  %v3009_v27 = vpop.f32.mrf.mxu0  ;;  %v8534_v30 = vld [vmem:[#allocation17_spill] sm:$0xff] }
 0x353   : > { %v5666_v56 = vpop.f32.mrf.mxu1  ;;  %v7506_v63 = vadd.f32 %v3118_v53, %v2439_v16  ;;  %v3055_v55 = vadd.f32 %v8524_v61, %v2789_v11  ;;  %v927_v10 = vadd.s32 176, %v7298_v4  ;;  %vm7563_vm12 = vcmp.gt.s32.totalorder %v1081_v42, 0 }
 0x354   : > { %8522 = vst [vmem:[#allocation38_spill] sm:$0xff] %v7504_v59  ;;  %v3119_v0 = vsel %vm3101_vm2, %v3082_v35, %v3083_v36  ;;  %v3120_v31 = vsel %vm3101_vm2, %v3081_v44, %v3082_v35  ;;  %v3053_v50 = vadd.f32 %v7319_v5, %v2781_v14  ;;  %v2792_v6 = vadd.f32 %v5666_v56, %v8526_v21 }
 0x355   : > { %8523 = vst [vmem:[#allocation47_spill] sm:$0xff] %v7506_v63  ;;  %v3244_v37 = vsel %vm7478_vm9, %v3119_v0, 0.0  ;;  %v7515_v1 = vadd.f32 %v3120_v31, %v2437_v23  ;;  %v2783_v62 = vpop.f32.mrf.mxu1  ;;  %v3087_v11 = vrot.slane %v3055_v55, 7  ;;  %v8539_v31 = vld [vmem:[#allocation24_spill] sm:$0xff]  ;;  %v931_v5 = vadd.s32 208, %v7298_v4 }
 0x356   : > { %v2784_v49 = vadd.f32 %v2783_v62, %v8527_v25  ;;  %v7522_v45 = vadd.f32 %v3244_v37, %v2438_v33  ;;  %v3085_v24 = vrot.slane %v3053_v50, 7  ;;  %v3056_v44 = vadd.f32 %v7335_v18, %v2792_v6  ;;  %v8535_v33 = vld [vmem:[#allocation23_spill] sm:$0xff]  ;;  %v8541_v37 = vld [vmem:[#allocation18_spill] sm:$0xff]  ;;  %v7561_v6 = vpop.f32.mrf.mxu0 }
 0x357   : > { %8525 = vst [vmem:[#allocation44_spill] sm:$0xff] %v7515_v1  ;;  %v5669_v54 = vpop.f32.mrf.mxu1  ;;  %v1095_v25 = vand.u32 15, %v927_v10  ;;  %v8550_v10 = vld [vmem:[#allocation20_spill] sm:$0xff]  ;;  %v912_v1 = vadd.s32 56, %v7298_v4 }
 0x358   : > { %8528 = vst [vmem:[#allocation14_spill] sm:$0xff] %v7522_v45  ;;  %v3054_v38 = vadd.f32 %v7362_v41, %v2784_v49  ;;  %v2805_v51 = vadd.f32 %v5669_v54, %v8533_v3  ;;  %v3117_v52 = vsel %vm3101_vm2, %v3084_v12, %v3085_v24  ;;  %v3088_v36 = vrot.slane %v3056_v44, 7  ;;  %v8537_v12 = vld [vmem:[#allocation33_spill] sm:$0xff]  ;;  %v8544_v49 = vld [vmem:[#allocation19_spill] sm:$0xff] }
 0x359   : > { %v2796_v8 = vpop.f32.mrf.mxu1  ;;  %v3246_v18 = vsel %vm7524_vm10, %v3117_v52, 0.0  ;;  %vm7580_vm13 = vcmp.gt.s32.totalorder %v1095_v25, 0  ;;  %v8557_v25 = vld [vmem:[#allocation22_spill] sm:$0xff] }
 0x35a   : > { %v3086_v16 = vrot.slane %v3054_v38, 7  ;;  %v2797_v41 = vadd.f32 %v2796_v8, %v8534_v30  ;;  %v3114_v35 = vsel %vm3101_vm2, %v3087_v11, %v3088_v36  ;;  %v7544_v28 = vadd.f32 %v3246_v18, %v8535_v33 }
 0x35b   : > { %v5670_v14 = vpop.f32.mrf.mxu1  ;;  %v7547_v23 = vadd.f32 %v3114_v35, %v8537_v12  ;;  %v3059_v56 = vadd.f32 %v7376_v34, %v2805_v51  ;;  %v8547_v51 = vld [vmem:[#allocation39_spill] sm:$0xff]  ;;  %v1123_v12 = vand.u32 15, %v931_v5 }
 0x35c   : > { %8536 = vst [vmem:[#allocation15_spill] sm:$0xff] %v7544_v28  ;;  %v3115_v20 = vsel %vm3101_vm2, %v3086_v16, %v3087_v11  ;;  %v3116_v53 = vsel %vm3101_vm2, %v3085_v24, %v3086_v16  ;;  %v3057_v55 = vadd.f32 %v7399_v13, %v2797_v41  ;;  %v2808_v50 = vadd.f32 %v5670_v14, %v8541_v37  ;;  %v8545_v24 = vld [vmem:[#allocation32_spill] sm:$0xff]  ;;  %v3022_v16 = vpop.f32.mrf.mxu0 }
 0x35d   : > { %8538 = vst [vmem:[#allocation16_spill] sm:$0xff] %v7547_v23  ;;  %v3248_v0 = vsel %vm7530_vm11, %v3115_v20, 0.0  ;;  %v7557_v61 = vadd.f32 %v3116_v53, %v8539_v31  ;;  %v2799_v21 = vpop.f32.mrf.mxu1  ;;  %v929_v13 = vadd.s32 192, %v7298_v4  ;;  %v3091_v52 = vrot.slane %v3059_v56, 7  ;;  %v8553_v53 = vld [vmem:[#allocation26_spill] sm:$0xff] }
 0x35e   : > { %v2800_v34 = vadd.f32 %v2799_v21, %v8544_v49  ;;  %v7569_v57 = vadd.f32 %v3248_v0, %v8545_v24  ;;  %v3089_v44 = vrot.slane %v3057_v55, 7  ;;  %v3060_v54 = vadd.f32 %v7426_v47, %v2808_v50  ;;  %v8555_v50 = vld [vmem:[#allocation27_spill] sm:$0xff]  ;;  %v5718_v24 = vpop.f32.mrf.mxu0 }
 0x35f   : > { %8540 = vst [vmem:[#allocation17_spill] sm:$0xff] %v7557_v61  ;;  %v5673_v38 = vpop.f32.mrf.mxu1  ;;  %v1109_v14 = vand.u32 15, %v929_v13  ;;  %v8559_v13 = vld [vmem:[#allocation34_spill] sm:$0xff]  ;;  %vm7618_vm15 = vcmp.gt.s32.totalorder %v1123_v12, 0 }
 0x360   : > { %8546 = vst [vmem:[#allocation23_spill] sm:$0xff] %v7569_v57  ;;  %v3058_v3 = vadd.f32 %v7453_v15, %v2800_v34  ;;  %v2821_v11 = vadd.f32 %v5673_v38, %v8547_v51  ;;  %v3113_v42 = vsel %vm3101_vm2, %v3088_v36, %v3089_v44  ;;  %v3092_v8 = vrot.slane %v3060_v54, 7  ;;  %v8551_v36 = vld [vmem:[#allocation25_spill] sm:$0xff]  ;;  %v8558_v54 = vld [vmem:[#allocation40_spill] sm:$0xff] }
 0x361   : > { %v2812_v18 = vpop.f32.mrf.mxu1  ;;  %v3250_v30 = vsel %vm7563_vm12, %v3113_v42, 0.0  ;;  %vm7609_vm14 = vcmp.gt.s32.totalorder %v1109_v14, 0  ;;  %v8566_v14 = vld [vmem:[#allocation21_spill] sm:$0xff] }
 0x362   : > { %v3090_v47 = vrot.slane %v3058_v3, 7  ;;  %v2813_v35 = vadd.f32 %v2812_v18, %v8550_v10  ;;  %v3110_v15 = vsel %vm3101_vm2, %v3091_v52, %v3092_v8  ;;  %v7588_v20 = vadd.f32 %v3250_v30, %v8551_v36 }
 0x363   : > { %v5674_v33 = vpop.f32.mrf.mxu1  ;;  %v7591_v56 = vadd.f32 %v3110_v15, %v8553_v53  ;;  %v3063_v55 = vadd.f32 %v7468_v43, %v2821_v11  ;;  %v933_v11 = vadd.s32 224, %v7298_v4 }
 0x364   : > { %8552 = vst [vmem:[#allocation33_spill] sm:$0xff] %v7588_v20  ;;  %v3111_v0 = vsel %vm3101_vm2, %v3090_v47, %v3091_v52  ;;  %v3112_v31 = vsel %vm3101_vm2, %v3089_v44, %v3090_v47  ;;  %v3061_v62 = vadd.f32 %v7491_v40, %v2813_v35  ;;  %v2824_v49 = vadd.f32 %v5674_v33, %v8557_v25  ;;  %v8563_v52 = vld [vmem:[#allocation41_spill] sm:$0xff]  ;;  %v3025_v35 = vpop.f32.mrf.mxu0 }
 0x365   : > { %8554 = vst [vmem:[#allocation24_spill] sm:$0xff] %v7591_v56  ;;  %v3252_v37 = vsel %vm7580_vm13, %v3111_v0, 0.0  ;;  %v7601_v21 = vadd.f32 %v3112_v31, %v8555_v50  ;;  %v2815_v34 = vpop.f32.mrf.mxu1  ;;  %v3095_v18 = vrot.slane %v3063_v55, 7  ;;  %v1137_v53 = vand.u32 15, %v933_v11  ;;  %v8567_v0 = vld [vmem:[#allocation35_spill] sm:$0xff]  ;;  %v8569_v55 = vld [vmem:[#allocation29_spill] sm:$0xff] }
 0x366   : > { %v2816_v38 = vadd.f32 %v2815_v34, %v8558_v54  ;;  %v7607_v5 = vadd.f32 %v3252_v37, %v8559_v13  ;;  %v3093_v44 = vrot.slane %v3061_v62, 7  ;;  %v3064_v3 = vadd.f32 %v7519_v26, %v2824_v49  ;;  %v8571_v34 = vld [vmem:[#allocation30_spill] sm:$0xff] }
 0x367   : > { %8556 = vst [vmem:[#allocation18_spill] sm:$0xff] %v7601_v21  ;;  %v5677_v51 = vpop.f32.mrf.mxu1  ;;  %v8573_v13 = vld [vmem:[#allocation42_spill] sm:$0xff]  ;;  %vm7652_vm0 = vcmp.gt.s32.totalorder %v1137_v53, 0  ;;  %v8581_v53 = vld [vmem:[#allocation37_spill] sm:$0xff] }
 0x368   : > { %8560 = vst [vmem:[#allocation19_spill] sm:$0xff] %v7607_v5  ;;  %v3062_v40 = vadd.f32 %v3009_v27, %v2816_v38  ;;  %v2837_v42 = vadd.f32 %v5677_v51, %v8563_v52  ;;  %v3109_v30 = vsel %vm3101_vm2, %v3092_v8, %v3093_v44  ;;  %v3096_v47 = vrot.slane %v3064_v3, 7  ;;  %v7646_v51 = vpop.f32.mrf.mxu0 }
 0x369   : > { %v2828_v10 = vpop.f32.mrf.mxu1  ;;  %v3254_v26 = vsel %vm7609_vm14, %v3109_v30, 0.0  ;;  %v935_v27 = vadd.s32 240, %v7298_v4  ;;  %v941_v8 = vand.u32 15, %v7298_v4 }
 0x36a   : > { %v3094_v15 = vrot.slane %v3062_v40, 7  ;;  %v2829_v33 = vadd.f32 %v2828_v10, %v8566_v14  ;;  %v3106_v36 = vsel %vm3101_vm2, %v3095_v18, %v3096_v47  ;;  %v7630_v31 = vadd.f32 %v3254_v26, %v8567_v0  ;;  %v8574_v40 = vld [vmem:[#allocation43_spill] sm:$0xff]  ;;  %v8582_v0 = vld [vmem:[#allocation36_spill] sm:$0xff] }
 0x36b   : > { %v5678_v12 = vpop.f32.mrf.mxu1  ;;  %v7633_v37 = vadd.f32 %v3106_v36, %v8569_v55  ;;  %v3067_v25 = vadd.f32 %v7561_v6, %v2837_v42  ;;  %v1151_v11 = vand.u32 15, %v935_v27  ;;  %vm7660_vm3 = vcmp.gt.s32.totalorder %v941_v8, 0  ;;  %v7666_v27 = vpop.f32.mrf.mxu0 }
 0x36c   : > { %8568 = vst [vmem:[#allocation32_spill] sm:$0xff] %v7630_v31  ;;  %v3107_v50 = vsel %vm3101_vm2, %v3094_v15, %v3095_v18  ;;  %v3108_v62 = vsel %vm3101_vm2, %v3093_v44, %v3094_v15  ;;  %v3065_v38 = vadd.f32 %v3022_v16, %v2829_v33  ;;  %v2840_v43 = vadd.f32 %v5678_v12, %v8573_v13  ;;  %v8575_v18 = vld [vmem:[#allocation28_spill] sm:$0xff] }
 0x36d   : > { %8570 = vst [vmem:[#allocation39_spill] sm:$0xff] %v7633_v37  ;;  %v3256_v49 = vsel %vm7618_vm15, %v3107_v50, 0.0  ;;  %v7643_v54 = vadd.f32 %v3108_v62, %v8571_v34  ;;  %v2831_v3 = vpop.f32.mrf.mxu1  ;;  %v3099_v10 = vrot.slane %v3067_v25, 7  ;;  %vm3164_vm4 = vcmp.gt.s32.totalorder %v1151_v11, 0  ;;  %v8584_v62 = vld [vmem:[#allocation12_spill] sm:$0xff]  ;;  %v8586_v34 = vld [vmem:[#allocation13_spill] sm:$0xff] }
 0x36e   : > { %v2832_v52 = vadd.f32 %v2831_v3, %v8574_v40  ;;  %v7650_v30 = vadd.f32 %v3256_v49, %v8575_v18  ;;  %v3097_v44 = vrot.slane %v3065_v38, 7  ;;  %v3068_v42 = vadd.f32 %v5718_v24, %v2840_v43  ;;  %v5770_v43 = vpop.f32.mrf.mxu0  ;;  %v8588_v3 = vld [vmem:[#allocation31_spill] sm:$0xff] }
 0x36f   : > { %8572 = vst [vmem:[#allocation20_spill] sm:$0xff] %v7643_v54  ;;  %v7656_v41 = vpop.f32.mrf.mxu1 }
 0x370   : > { %8576 = vst [vmem:[#allocation25_spill] sm:$0xff] %v7650_v30  ;;  %v3066_v16 = vadd.f32 %v3025_v35, %v2832_v52  ;;  %v3105_v26 = vsel %vm3101_vm2, %v3096_v47, %v3097_v44  ;;  %v3100_v15 = vrot.slane %v3068_v42, 7  ;;  %v2424_v35 = vadd.f32 %v7109_v39, %v8581_v53  ;;  %v3558_v18 = vpop.f32.mrf.mxu0 }
 0x371   : > { %v7664_v33 = vpop.f32.mrf.mxu1  ;;  %v3258_v36 = vsel %vm7652_vm0, %v3105_v26, 0.0 }
 0x372   : > { %v3098_v24 = vrot.slane %v3066_v16, 7  ;;  %v3102_v47 = vsel %vm3101_vm2, %v3099_v10, %v3100_v15  ;;  %v3133_v8 = vsel %vm3101_vm2, %v3100_v15, %v3069_v48  ;;  %v7679_v55 = vadd.f32 %v3258_v36, %v8582_v0 }
 0x373   : > { %v5730_v12 = vpop.f32.mrf.mxu1  ;;  %v3230_v50 = vsel %vm7660_vm3, %v3133_v8, 0.0  ;;  %v7684_v25 = vadd.f32 %v3102_v47, %v8584_v62 }
 0x374   : > { %8583 = vst [vmem:[#allocation26_spill] sm:$0xff] %v7679_v55  ;;  %v3103_v39 = vsel %vm3101_vm2, %v3098_v24, %v3099_v10  ;;  %v3104_v49 = vsel %vm3101_vm2, %v3097_v44, %v3098_v24  ;;  %v7693_v13 = vadd.f32 %v3230_v50, %v2424_v35  ;;  %v5773_v44 = vpop.f32.mrf.mxu0  ;;  %v3567_v63 = vadd.f32 %v5770_v43, %v5730_v12 }
 0x375   : > { %8585 = vst [vmem:[#allocation27_spill] sm:$0xff] %v7684_v25  ;;  %v3260_v17 = vsel %vm3164_vm4, %v3103_v39, 0.0  ;;  %v7691_v38 = vadd.f32 %v3104_v49, %v8586_v34  ;;  %v3373_v48 = vpop.f32.mrf.mxu1  ;;  %vm3940_vm2 = vcmp.lt.s32.totalorder %v7298_v4, 7 }
 0x376   : > { %v7696_v11 = vadd.f32 %v3260_v17, %v8588_v3  ;;  %v7710_v26 = vpop.f32.mrf.mxu0  ;;  %v3559_v59 = vadd.f32 %v3558_v18, %v3373_v48 }
 0x377   : > { %8587 = vst [vmem:[#allocation22_spill] sm:$0xff] %v7691_v38  ;;  %v7698_v40 = vpop.f32.mrf.mxu1 }
 0x378   : > { %8589 = vst [vmem:[#allocation40_spill] sm:$0xff] %v7696_v11  ;;  %v7716_v36 = vpop.f32.mrf.mxu0 }
 0x379   : > { %v7700_v52 = vpop.f32.mrf.mxu1 }
 0x37a   : > { %v7722_v35 = vpop.f32.mrf.mxu0 }
 0x37b   : > { %v7702_v6 = vpop.f32.mrf.mxu1 }
 0x37c   : > { %v7728_v0 = vpop.f32.mrf.mxu0 }
 0x37d   : > { %v7704_v42 = vpop.f32.mrf.mxu1 }
 0x37e   : > { %v7734_v39 = vpop.f32.mrf.mxu0 }
 0x37f   : > { %v7706_v16 = vpop.f32.mrf.mxu1 }
 0x380   : > { %v7740_v34 = vpop.f32.mrf.mxu0 }
 0x381   : > { %v7708_v10 = vpop.f32.mrf.mxu1 }
 0x382   : > { %v7746_v55 = vpop.f32.mrf.mxu0 }
 0x383   : > { %v7712_v15 = vpop.f32.mrf.mxu1 }
 0x384   : > { %v7752_v37 = vpop.f32.mrf.mxu0 }
 0x385   : > { %v7714_v14 = vpop.f32.mrf.mxu1 }
 0x386   : > { %v7758_v30 = vpop.f32.mrf.mxu0 }
 0x387   : > { %v7718_v24 = vpop.f32.mrf.mxu1 }
 0x388   : > { %v7764_v20 = vpop.f32.mrf.mxu0 }
 0x389   : > { %v7720_v53 = vpop.f32.mrf.mxu1 }
 0x38a   : > { %v7770_v61 = vpop.f32.mrf.mxu0 }
 0x38b   : > { %v7724_v47 = vpop.f32.mrf.mxu1 }
 0x38d   : > { %v7726_v8 = vpop.f32.mrf.mxu1 }
 0x38f   : > { %v7730_v50 = vpop.f32.mrf.mxu1 }
 0x391   : > { %v7732_v62 = vpop.f32.mrf.mxu1 }
 0x393   : > { %v7736_v49 = vpop.f32.mrf.mxu1 }
 0x394   : > { %8590 = vst [vmem:[#allocation34_spill] sm:$0xff] %v7736_v49 }
 0x395   : > { %v7738_v17 = vpop.f32.mrf.mxu1 }
 0x396   : > { %8591 = vst [vmem:[#allocation41_spill] sm:$0xff] %v7738_v17 }
 0x397   : > { %v7742_v3 = vpop.f32.mrf.mxu1 }
 0x398   : > { %8592 = vst [vmem:[#allocation21_spill] sm:$0xff] %v7742_v3  ;;  %v910_v3 = vadd.s32 40, %v7298_v4 }
 0x399   : > { %v7744_v38 = vpop.f32.mrf.mxu1 }
 0x39a   : > { %8593 = vst [vmem:[#allocation35_spill] sm:$0xff] %v7744_v38  ;;  %v976_v12 = vand.u32 15, %v910_v3 }
 0x39b   : > { %v7748_v25 = vpop.f32.mrf.mxu1 }
 0x39c   : > { %8594 = vst [vmem:[#allocation29_spill] sm:$0xff] %v7748_v25  ;;  %v908_v25 = vadd.s32 24, %v7298_v4  ;;  %vm7823_vm7 = vcmp.lt.s32.totalorder %v976_v12, 15  ;;  %v918_v12 = vadd.s32 104, %v7298_v4 }
 0x39d   : > { %v7750_v11 = vpop.f32.mrf.mxu1 }
 0x39e   : > { %8595 = vst [vmem:[#allocation30_spill] sm:$0xff] %v7750_v11  ;;  %v962_v45 = vand.u32 15, %v908_v25 }
 0x39f   : > { %v7754_v54 = vpop.f32.mrf.mxu1 }
 0x3a0   : > { %8596 = vst [vmem:[#allocation42_spill] sm:$0xff] %v7754_v54  ;;  %v7776_v54 = vpop.f32.mrf.mxu0  ;;  %vm7805_vm6 = vcmp.lt.s32.totalorder %v962_v45, 15 }
 0x3a1   : > { %v7756_v31 = vpop.f32.mrf.mxu1 }
 0x3a2   : > { %8597 = vst [vmem:[#allocation43_spill] sm:$0xff] %v7756_v31  ;;  %v906_v31 = vadd.s32 8, %v7298_v4 }
 0x3a3   : > { %v7760_v56 = vpop.f32.mrf.mxu1 }
 0x3a4   : > { %8598 = vst [vmem:[#allocation28_spill] sm:$0xff] %v7760_v56  ;;  %v948_v38 = vand.u32 15, %v906_v31 }
 0x3a5   : > { %v7762_v21 = vpop.f32.mrf.mxu1 }
 0x3a6   : > { %8599 = vst [vmem:[#allocation37_spill] sm:$0xff] %v7762_v21  ;;  %v3564_v21 = vadd.f32 %v7646_v51, %v7656_v41  ;;  %vm7793_vm5 = vcmp.lt.s32.totalorder %v948_v38, 15 }
 0x3a7   : > { %v7766_v5 = vpop.f32.mrf.mxu1 }
 0x3a8   : > { %8600 = vst [vmem:[#allocation36_spill] sm:$0xff] %v7766_v5  ;;  %v7782_v5 = vpop.f32.mrf.mxu0 }
 0x3a9   : > { %v7768_v23 = vpop.f32.mrf.mxu1 }
 0x3aa   : > { %8601 = vst [vmem:[#allocation12_spill] sm:$0xff] %v7768_v23  ;;  %v3556_v23 = vadd.f32 %v7666_v27, %v7664_v33  ;;  %v7791_v49 = vpop.f32.mrf.mxu0 }
 0x3ab   : > { %v7772_v28 = vpop.f32.mrf.mxu1 }
 0x3ac   : > { %8602 = vst [vmem:[#allocation13_spill] sm:$0xff] %v7772_v28 }
 0x3ad   : > { %v7774_v11 = vpop.f32.mrf.mxu1 }
 0x3ae   : > { %8603 = vst [vmem:[#allocation31_spill] sm:$0xff] %v7774_v11 }
 0x3af   : > { %v5809_v57 = vpop.f32.mrf.mxu1 }
 0x3b0   : > { %v3878_v28 = vadd.f32 %v5809_v57, %v3564_v21  ;;  %v3580_v21 = vadd.f32 %v5773_v44, %v7698_v40  ;;  %v7810_v40 = vpop.f32.mrf.mxu0 }
 0x3b1   : > { %v3749_v56 = vpop.f32.mrf.mxu1 }
 0x3b2   : > { %v7788_v17 = vadd.f32 %v3749_v56, %v3556_v23  ;;  %v3910_v58 = vrot.slane %v3878_v28, 1  ;;  %v990_v23 = vand.u32 15, %v912_v1  ;;  %v3572_v56 = vadd.f32 %v7710_v26, %v7700_v52 }
 0x3b3   : > { %v5810_v11 = vpop.f32.mrf.mxu1  ;;  %v916_v1 = vadd.s32 88, %v7298_v4  ;;  %v3583_v52 = vadd.f32 %v7716_v36, %v7702_v6 }
 0x3b4   : > { %v3879_v51 = vadd.f32 %v5810_v11, %v3567_v63  ;;  %v914_v63 = vadd.s32 72, %v7298_v4  ;;  %v3908_v25 = vrot.slane %v7788_v17, 1  ;;  %vm7830_vm8 = vcmp.lt.s32.totalorder %v990_v23, 15 }
 0x3b5   : > { %v3752_v41 = vpop.f32.mrf.mxu1  ;;  %v3596_v23 = vadd.f32 %v7728_v0, %v7706_v16  ;;  %v3599_v16 = vadd.f32 %v7740_v34, %v7712_v15  ;;  %v3591_v15 = vadd.f32 %v7746_v55, %v7714_v14 }
 0x3b6   : > { %v3911_v33 = vrot.slane %v3879_v51, 1  ;;  %v3877_v27 = vadd.f32 %v3752_v41, %v3559_v59  ;;  %v1004_v6 = vand.u32 15, %v914_v63 }
 0x3b7   : > { %v5813_v31 = vpop.f32.mrf.mxu1 }
 0x3b8   : > { %v3969_v28 = vsel %vm3940_vm2, %v3910_v58, %v3911_v33  ;;  %v3909_v59 = vrot.slane %v3877_v27, 1  ;;  %v3882_v48 = vadd.f32 %v5813_v31, %v3580_v21  ;;  %vm7851_vm9 = vcmp.lt.s32.totalorder %v1004_v6, 15 }
 0x3b9   : > { %v4103_v38 = vadd.f32 %v3969_v28, %v7369_v29  ;;  %v3765_v43 = vpop.f32.mrf.mxu1  ;;  %v7835_v28 = vpop.f32.mrf.mxu0 }
 0x3ba   : > { %v3970_v18 = vsel %vm3940_vm2, %v3909_v59, %v3910_v58  ;;  %v3971_v29 = vsel %vm3940_vm2, %v3908_v25, %v3909_v59  ;;  %v3880_v44 = vadd.f32 %v3765_v43, %v3572_v56  ;;  %v3575_v58 = vadd.f32 %v7722_v35, %v7704_v42 }
 0x3bb   : > { %v4070_v45 = vsel %vm7793_vm5, %v3970_v18, 0.0  ;;  %v4101_v26 = vadd.f32 %v3971_v29, %v7693_v13  ;;  %v5814_v3 = vpop.f32.mrf.mxu1  ;;  %v3914_v31 = vrot.slane %v3882_v48, 1  ;;  %v1018_v56 = vand.u32 15, %v916_v1  ;;  %v8612_v18 = vld [vmem:[#allocation45_spill] sm:$0xff] }
 0x3bc   : > { %v4102_v36 = vadd.f32 %v4070_v45, %v7358_v19  ;;  %v3912_v41 = vrot.slane %v3880_v44, 1  ;;  %v3883_v27 = vadd.f32 %v5814_v3, %v3583_v52  ;;  %v3588_v59 = vadd.f32 %v7734_v39, %v7708_v10 }
 0x3bd   : > { %v4133_v57 = vmax.f32 %v4101_v26, 0.0  ;;  %v3768_v13 = vpop.f32.mrf.mxu1  ;;  %v7846_v1 = vadd.s32 120, %v7298_v4  ;;  %v4135_v10 = vmax.f32 %v4103_v38, 0.0  ;;  %v7858_v26 = vpop.f32.mrf.mxu0  ;;  %vm7872_vm10 = vcmp.lt.s32.totalorder %v1018_v56, 15 }
 0x3be   : > { %v4134_v63 = vmax.f32 %v4102_v36, 0.0  ;;  %v3968_v42 = vsel %vm3940_vm2, %v3911_v33, %v3912_v41  ;;  %v3915_v35 = vrot.slane %v3883_v27, 1  ;;  %v3881_v19 = vadd.f32 %v3768_v13, %v3575_v58 }
 0x3bf   : > { %v4072_v48 = vsel %vm7805_vm6, %v3968_v42, 0.0  ;;  %v5817_v43 = vpop.f32.mrf.mxu1  ;;  %v8615_v27 = vmov 0   ;;  %v1046_v51 = vand.u32 15, %v7846_v1  ;;  %v3612_v56 = vadd.f32 %v7752_v37, %v7718_v24 }
 0x3c0   : > { %v4165_v52 = vpack.c.bf16 %v4134_v63, %v4133_v57  ;;  %v4104_v29 = vadd.f32 %v4072_v48, %v8612_v18  ;;  %v3965_v33 = vsel %vm3940_vm2, %v3914_v31, %v3915_v35  ;;  %v3913_v44 = vrot.slane %v3881_v19, 1 }
 0x3c1   : > { %v4107_v0 = vadd.f32 %v3965_v33, %v7423_v7  ;;  %v3886_v39 = vadd.f32 %v5817_v43, %v3596_v23  ;;  %v3781_v11 = vpop.f32.mrf.mxu1  ;;  %v1032_v57 = vand.u32 15, %v918_v12  ;;  %v7880_v23 = vpop.f32.mrf.mxu0  ;;  %v3604_v43 = vadd.f32 %v7758_v30, %v7720_v53 }
 0x3c2   : > { %v4136_v3 = vmax.f32 %v4104_v29, 0.0  ;;  %v3966_v58 = vsel %vm3940_vm2, %v3913_v44, %v3914_v31  ;;  %v3967_v6 = vsel %vm3940_vm2, %v3912_v41, %v3913_v44  ;;  %v3884_v36 = vadd.f32 %v3781_v11, %v3588_v59  ;;  %5132 = vmatmul.mubr.msk.bf16.vlgmr.msra.gmra.mxu0 %vm1507_vm1, %v4165_v52 }
 0x3c3   : > { %v4074_v7 = vsel %vm7823_vm7, %v3966_v58, 0.0  ;;  %v4105_v34 = vadd.f32 %v3967_v6, %v7390_v9  ;;  %v5818_v38 = vpop.f32.mrf.mxu1  ;;  %4331 = vmatprep.mubr.bf16.mxu0 %v8615_v27  ;;  %v3918_v55 = vrot.slane %v3886_v39, 1  ;;  %v7878_v9 = vadd.s32 136, %v7298_v4 }
 0x3c4   : > { %v4166_v13 = vpack.c.bf16 %v4136_v3, %v4135_v10  ;;  %v4106_v31 = vadd.f32 %v4074_v7, %v7410_v32  ;;  %v3916_v63 = vrot.slane %v3884_v36, 1  ;;  %v3887_v41 = vadd.f32 %v5818_v38, %v3599_v16  ;;  %v7903_v10 = vpop.f32.mrf.mxu0 }
 0x3c5   : > { %v4137_v19 = vmax.f32 %v4105_v34, 0.0  ;;  %v3784_v14 = vpop.f32.mrf.mxu1  ;;  %v7891_v18 = vadd.s32 152, %v7298_v4  ;;  %vm7896_vm11 = vcmp.lt.s32.totalorder %v1032_v57, 15  ;;  %v3615_v37 = vadd.f32 %v7764_v20, %v7724_v47 }
 0x3c6   : > { %v4138_v12 = vmax.f32 %v4106_v31, 0.0  ;;  %v3964_v32 = vsel %vm3940_vm2, %v3915_v35, %v3916_v63  ;;  %v3919_v59 = vrot.slane %v3887_v41, 1  ;;  %v3885_v48 = vadd.f32 %v3784_v14, %v3591_v15  ;;  %v7928_v57 = vpop.f32.mrf.mxu0 }
 0x3c7   : > { %v4076_v1 = vsel %vm7830_vm8, %v3964_v32, 0.0  ;;  %v5821_v52 = vpop.f32.mrf.mxu1  ;;  %v4139_v30 = vmax.f32 %v4107_v0, 0.0  ;;  %v3607_v20 = vadd.f32 %v7770_v61, %v7726_v8  ;;  %v1060_v58 = vand.u32 15, %v7878_v9 }
 0x3c8   : > { %v4167_v29 = vpack.c.bf16 %v4138_v12, %v4137_v19  ;;  %v4108_v33 = vadd.f32 %v4076_v1, %v7401_v46  ;;  %v3961_v35 = vsel %vm3940_vm2, %v3918_v55, %v3919_v59  ;;  %v3917_v44 = vrot.slane %v3885_v48, 1  ;;  %v8622_v12 = vld [vmem:[#allocation46_spill] sm:$0xff]  ;;  %v7949_v1 = vpop.f32.mrf.mxu0 }
 0x3c9   : > { %v4111_v24 = vadd.f32 %v3961_v35, %v7475_v22  ;;  %v3890_v53 = vadd.f32 %v5821_v52, %v3612_v56  ;;  %v3797_v21 = vpop.f32.mrf.mxu1  ;;  %vm7920_vm12 = vcmp.lt.s32.totalorder %v1046_v51, 15  ;;  %v7926_v38 = vadd.s32 168, %v7298_v4  ;;  %v8623_v56 = vld [vmem:[#allocation34_spill] sm:$0xff] }
 0x3ca   : > { %v4140_v39 = vmax.f32 %v4108_v33, 0.0  ;;  %v3962_v46 = vsel %vm3940_vm2, %v3917_v44, %v3918_v55  ;;  %v3963_v11 = vsel %vm3940_vm2, %v3916_v63, %v3917_v44  ;;  %v3888_v3 = vadd.f32 %v3797_v21, %v3604_v43  ;;  %5133 = vmatmul.mubr.msk.bf16.gmra.mxu0 %vm1507_vm1, %v4166_v13  ;;  %v8625_v44 = vld [vmem:[#allocation41_spill] sm:$0xff] }
 0x3cb   : > { %v4078_v22 = vsel %vm7851_vm9, %v3962_v46, 0.0  ;;  %v4109_v47 = vadd.f32 %v3963_v11, %v7451_v60  ;;  %v5822_v0 = vpop.f32.mrf.mxu1  ;;  %4341 = vmatprep.mubr.bf16.mxu0 %v8615_v27  ;;  %v3922_v8 = vrot.slane %v3890_v53, 1  ;;  %v1074_v60 = vand.u32 15, %v7891_v18  ;;  %v8629_v46 = vld [vmem:[#allocation44_spill] sm:$0xff] }
 0x3cc   : > { %v7917_v6 = vpack.c.bf16 %v4140_v39, %v4139_v30  ;;  %v4110_v36 = vadd.f32 %v4078_v22, %v7464_v2  ;;  %v3920_v15 = vrot.slane %v3888_v3, 1  ;;  %v3891_v7 = vadd.f32 %v5822_v0, %v3615_v37  ;;  %v8626_v30 = vld [vmem:[#allocation38_spill] sm:$0xff] }
 0x3cd   : > { %v4141_v61 = vmax.f32 %v4109_v47, 0.0  ;;  %v3800_v45 = vpop.f32.mrf.mxu1  ;;  %v3628_v41 = vadd.f32 %v7776_v54, %v7730_v50  ;;  %v3620_v19 = vadd.f32 %v7782_v5, %v7732_v62  ;;  %v7939_v51 = vadd.s32 184, %v7298_v4  ;;  %v8624_v5 = vld [vmem:[#allocation14_spill] sm:$0xff] }
 0x3ce   : > { %v4142_v13 = vmax.f32 %v4110_v36, 0.0  ;;  %v3960_v2 = vsel %vm3940_vm2, %v3919_v59, %v3920_v15  ;;  %v3923_v31 = vrot.slane %v3891_v7, 1  ;;  %v3889_v63 = vadd.f32 %v3800_v45, %v3607_v20 }
 0x3cf   : > { %v4080_v55 = vsel %vm7872_vm10, %v3960_v2, 0.0  ;;  %v5825_v14 = vpop.f32.mrf.mxu1  ;;  %v3631_v54 = vadd.f32 %v7791_v49, %v8623_v56  ;;  %v4143_v50 = vmax.f32 %v4111_v24, 0.0  ;;  %v3623_v49 = vadd.f32 %v7810_v40, %v8625_v44  ;;  %v8639_v44 = vld [vmem:[#allocation17_spill] sm:$0xff]  ;;  %v8650_v40 = vld [vmem:[#allocation19_spill] sm:$0xff] }
 0x3d0   : > { %v7941_v9 = vpack.c.bf16 %v4142_v13, %v4141_v61  ;;  %v4112_v32 = vadd.f32 %v4080_v55, %v8622_v12  ;;  %v3957_v59 = vsel %vm3940_vm2, %v3922_v8, %v3923_v31  ;;  %v3921_v48 = vrot.slane %v3889_v63, 1 }
 0x3d1   : > { %v4115_v62 = vadd.f32 %v3957_v59, %v8624_v5  ;;  %v3894_v42 = vadd.f32 %v5825_v14, %v3628_v41  ;;  %v3813_v43 = vpop.f32.mrf.mxu1  ;;  %vm7961_vm13 = vcmp.lt.s32.totalorder %v1060_v58, 15  ;;  %vm7969_vm14 = vcmp.lt.s32.totalorder %v1074_v60, 15  ;;  %v5794_v58 = vpop.f32.mrf.mxu0  ;;  %v8633_v60 = vld [vmem:[#allocation35_spill] sm:$0xff] }
 0x3d2   : > { %v4144_v52 = vmax.f32 %v4112_v32, 0.0  ;;  %v3958_v18 = vsel %vm3940_vm2, %v3921_v48, %v3922_v8  ;;  %v3959_v33 = vsel %vm3940_vm2, %v3920_v15, %v3921_v48  ;;  %v3892_v35 = vadd.f32 %v3813_v43, %v3620_v19  ;;  %5134 = vmatmul.mubr.msk.bf16.gmra.mxu0 %vm1507_vm1, %v4167_v29  ;;  %v8632_v8 = vld [vmem:[#allocation21_spill] sm:$0xff]  ;;  %v8634_v19 = vld [vmem:[#allocation47_spill] sm:$0xff] }
 0x3d3   : > { %v4082_v37 = vsel %vm7896_vm11, %v3958_v18, 0.0  ;;  %v4113_v24 = vadd.f32 %v3959_v33, %v8626_v30  ;;  %v5826_v53 = vpop.f32.mrf.mxu1  ;;  %4351 = vmatprep.mubr.bf16.mxu0 %v8615_v27  ;;  %v3926_v20 = vrot.slane %v3894_v42, 1  ;;  %v1088_v47 = vand.u32 15, %v7926_v38  ;;  %v8636_v32 = vld [vmem:[#allocation23_spill] sm:$0xff]  ;;  %v3654_v48 = vpop.f32.mrf.mxu0  ;;  %v8637_v42 = vld [vmem:[#allocation30_spill] sm:$0xff] }
 0x3d4   : > { %v7966_v39 = vpack.c.bf16 %v4144_v52, %v4143_v50  ;;  %v4114_v11 = vadd.f32 %v4082_v37, %v8629_v46  ;;  %v3924_v29 = vrot.slane %v3892_v35, 1  ;;  %v3895_v3 = vadd.f32 %v5826_v53, %v3631_v54  ;;  %v8638_v43 = vld [vmem:[#allocation15_spill] sm:$0xff] }
 0x3d5   : > { %v4145_v16 = vmax.f32 %v4113_v24, 0.0  ;;  %v3816_v22 = vpop.f32.mrf.mxu1  ;;  %v1102_v0 = vand.u32 15, %v7939_v51  ;;  %v3644_v45 = vadd.f32 %v7835_v28, %v8632_v8  ;;  %v3636_v13 = vadd.f32 %v7858_v26, %v8633_v60  ;;  %v8635_v51 = vld [vmem:[#allocation29_spill] sm:$0xff]  ;;  %v5797_v46 = vpop.f32.mrf.mxu0 }
 0x3d6   : > { %v4146_v36 = vmax.f32 %v4114_v11, 0.0  ;;  %v3956_v15 = vsel %vm3940_vm2, %v3923_v31, %v3924_v29  ;;  %v3927_v7 = vrot.slane %v3895_v3, 1  ;;  %v3893_v61 = vadd.f32 %v3816_v22, %v3623_v49 }
 0x3d7   : > { %v4084_v2 = vsel %vm7920_vm12, %v3956_v15, 0.0  ;;  %v5829_v63 = vpop.f32.mrf.mxu1  ;;  %v930_v38 = vadd.s32 200, %v7298_v4  ;;  %v3647_v28 = vadd.f32 %v7880_v23, %v8635_v51  ;;  %v4147_v12 = vmax.f32 %v4115_v62, 0.0 }
 0x3d8   : > { %v7984_v41 = vpack.c.bf16 %v4146_v36, %v4145_v16  ;;  %v4116_v55 = vadd.f32 %v4084_v2, %v8634_v19  ;;  %v3953_v31 = vsel %vm3940_vm2, %v3926_v20, %v3927_v7  ;;  %v3925_v14 = vrot.slane %v3893_v61, 1  ;;  %v8645_v36 = vld [vmem:[#allocation43_spill] sm:$0xff] }
 0x3d9   : > { %v4119_v26 = vadd.f32 %v3953_v31, %v8636_v32  ;;  %v3898_v59 = vadd.f32 %v5829_v63, %v3644_v45  ;;  %v3829_v34 = vpop.f32.mrf.mxu1  ;;  %v3639_v23 = vadd.f32 %v7903_v10, %v8637_v42  ;;  %v1116_v33 = vand.u32 15, %v930_v38  ;;  %v8646_v45 = vld [vmem:[#allocation16_spill] sm:$0xff]  ;;  %v3667_v31 = vpop.f32.mrf.mxu0  ;;  %v8651_v32 = vld [vmem:[#allocation37_spill] sm:$0xff] }
 0x3da   : > { %v4148_v56 = vmax.f32 %v4116_v55, 0.0  ;;  %v3954_v54 = vsel %vm3940_vm2, %v3925_v14, %v3926_v20  ;;  %v3955_v50 = vsel %vm3940_vm2, %v3924_v29, %v3925_v14  ;;  %v3896_v5 = vadd.f32 %v3829_v34, %v3636_v13  ;;  %5135 = vmatmul.mubr.msk.bf16.gmra.mxu0 %vm1507_vm1, %v7917_v6  ;;  %v8644_v20 = vld [vmem:[#allocation42_spill] sm:$0xff] }
 0x3db   : > { %v4086_v62 = vsel %vm7961_vm13, %v3954_v54, 0.0  ;;  %v4117_v52 = vadd.f32 %v3955_v50, %v8638_v43  ;;  %v5830_v18 = vpop.f32.mrf.mxu1  ;;  %4361 = vmatprep.mubr.bf16.mxu0 %v8615_v27  ;;  %v3930_v6 = vrot.slane %v3898_v59, 1  ;;  %vm8007_vm15 = vcmp.lt.s32.totalorder %v1088_v47, 15 }
 0x3dc   : > { %v8004_v35 = vpack.c.bf16 %v4148_v56, %v4147_v12  ;;  %v4118_v49 = vadd.f32 %v4086_v62, %v8639_v44  ;;  %v3928_v37 = vrot.slane %v3896_v5, 1  ;;  %v3899_v30 = vadd.f32 %v5830_v18, %v3647_v28  ;;  %v8653_v5 = vld [vmem:[#allocation18_spill] sm:$0xff] }
 0x3dd   : > { %v4149_v24 = vmax.f32 %v4117_v52, 0.0  ;;  %v3832_v53 = vpop.f32.mrf.mxu1  ;;  %vm8011_vm0 = vcmp.lt.s32.totalorder %v1102_v0, 15  ;;  %v3660_v22 = vadd.f32 %v7928_v57, %v8644_v20  ;;  %v3652_v47 = vadd.f32 %v7949_v1, %v8645_v36  ;;  %v8649_v57 = vld [vmem:[#allocation28_spill] sm:$0xff] }
 0x3de   : > { %v4150_v11 = vmax.f32 %v4118_v49, 0.0  ;;  %v3952_v29 = vsel %vm3940_vm2, %v3927_v7, %v3928_v37  ;;  %v3931_v3 = vrot.slane %v3899_v30, 1  ;;  %v3897_v16 = vadd.f32 %v3832_v53, %v3639_v23  ;;  %v8655_v53 = vld [vmem:[#allocation12_spill] sm:$0xff] }
 0x3df   : > { %v4088_v15 = vsel %vm7969_vm14, %v3952_v29, 0.0  ;;  %v5833_v0 = vpop.f32.mrf.mxu1  ;;  %v932_v61 = vadd.s32 216, %v7298_v4  ;;  %vm8029_vm3 = vcmp.lt.s32.totalorder %v1116_v33, 15  ;;  %v3663_v1 = vadd.f32 %v5794_v58, %v8649_v57  ;;  %v5798_v33 = vpop.f32.mrf.mxu0 }
 0x3e0   : > { %v8024_v8 = vpack.c.bf16 %v4150_v11, %v4149_v24  ;;  %v4120_v60 = vadd.f32 %v4088_v15, %v8646_v45  ;;  %v3949_v7 = vsel %vm3940_vm2, %v3930_v6, %v3931_v3  ;;  %v3929_v13 = vrot.slane %v3897_v16, 1  ;;  %v8654_v24 = vld [vmem:[#allocation36_spill] sm:$0xff]  ;;  %v8658_v45 = vld [vmem:[#allocation25_spill] sm:$0xff] }
 0x3e1   : > { %v4151_v63 = vmax.f32 %v4119_v26, 0.0  ;;  %v4123_v38 = vadd.f32 %v3949_v7, %v8650_v40  ;;  %v3902_v19 = vadd.f32 %v5833_v0, %v3660_v22  ;;  %v3845_v55 = vpop.f32.mrf.mxu1  ;;  %v3655_v59 = vadd.f32 %v3654_v48, %v8651_v32  ;;  %v8652_v26 = vld [vmem:[#allocation33_spill] sm:$0xff]  ;;  %v8656_v22 = vld [vmem:[#allocation24_spill] sm:$0xff]  ;;  %v8659_v40 = vld [vmem:[#allocation31_spill] sm:$0xff] }
 0x3e2   : > { %v4152_v14 = vmax.f32 %v4120_v60, 0.0  ;;  %v3950_v51 = vsel %vm3940_vm2, %v3929_v13, %v3930_v6  ;;  %v3951_v28 = vsel %vm3940_vm2, %v3928_v37, %v3929_v13  ;;  %v3900_v12 = vadd.f32 %v3845_v55, %v3652_v47  ;;  %5136 = vmatmul.mubr.msk.bf16.gmra.mxu0 %vm1507_vm1, %v7941_v9  ;;  %v3670_v13 = vpop.f32.mrf.mxu0  ;;  %v8660_v55 = vld [vmem:[#allocation32_spill] sm:$0xff] }
 0x3e3   : > { %v4090_v58 = vsel %vm8007_vm15, %v3950_v51, 0.0  ;;  %v4121_v34 = vadd.f32 %v3951_v28, %v8652_v26  ;;  %v5834_v56 = vpop.f32.mrf.mxu1  ;;  %4371 = vmatprep.mubr.bf16.mxu0 %v8615_v27  ;;  %v936_v54 = vadd.s32 248, %v7298_v4  ;;  %v3934_v9 = vrot.slane %v3902_v19, 1 }
 0x3e4   : > { %v8047_v50 = vpack.c.bf16 %v4152_v14, %v4151_v63  ;;  %v4122_v42 = vadd.f32 %v4090_v58, %v8653_v5  ;;  %v3932_v23 = vrot.slane %v3900_v12, 1  ;;  %v3903_v62 = vadd.f32 %v5834_v56, %v3663_v1  ;;  %v8663_v12 = vld [vmem:[#allocation20_spill] sm:$0xff] }
 0x3e5   : > { %v4153_v43 = vmax.f32 %v4121_v34, 0.0  ;;  %v3848_v52 = vpop.f32.mrf.mxu1  ;;  %v1130_v48 = vand.u32 15, %v932_v61  ;;  %v934_v18 = vadd.s32 232, %v7298_v4  ;;  %v3676_v6 = vadd.f32 %v5797_v46, %v8654_v24 }
 0x3e6   : > { %v4154_v44 = vmax.f32 %v4122_v42, 0.0  ;;  %v3948_v49 = vsel %vm3940_vm2, %v3931_v3, %v3932_v23  ;;  %v3935_v37 = vrot.slane %v3903_v62, 1  ;;  %v3901_v30 = vadd.f32 %v3848_v52, %v3655_v59  ;;  %v8657_v3 = vld [vmem:[#allocation13_spill] sm:$0xff] }
 0x3e7   : > { %v3668_v10 = vadd.f32 %v3667_v31, %v8655_v53  ;;  %v4092_v11 = vsel %vm8011_vm0, %v3948_v49, 0.0  ;;  %v5837_v29 = vpop.f32.mrf.mxu1  ;;  %v1158_v16 = vand.u32 15, %v936_v54  ;;  %v3679_v0 = vadd.f32 %v5798_v33, %v8657_v3 }
 0x3e8   : > { %v8057_v20 = vpack.c.bf16 %v4154_v44, %v4153_v43  ;;  %v4124_v36 = vadd.f32 %v4092_v11, %v8656_v22  ;;  %v3945_v47 = vsel %vm3940_vm2, %v3934_v9, %v3935_v37  ;;  %v3933_v15 = vrot.slane %v3901_v30, 1  ;;  %v8667_v44 = vld [vmem:[#allocation40_spill] sm:$0xff]  ;;  %v8669_v22 = vld [vmem:[#allocation26_spill] sm:$0xff] }
 0x3e9   : > { %v4155_v61 = vmax.f32 %v4123_v38, 0.0  ;;  %v4127_v46 = vadd.f32 %v3945_v47, %v8658_v45  ;;  %v3906_v60 = vadd.f32 %v5837_v29, %v3676_v6  ;;  %v3861_v7 = vpop.f32.mrf.mxu1  ;;  %v3671_v19 = vadd.f32 %v3670_v13, %v8659_v40  ;;  %v8668_v6 = vld [vmem:[#allocation27_spill] sm:$0xff]  ;;  %v8670_v47 = vld [vmem:[#allocation22_spill] sm:$0xff]  ;;  %v4483_v13 = vld [vmem:[%s6331_s16 + $0x8] sm:$0xff] }
 0x3ea   : > { %v4156_v21 = vmax.f32 %v4124_v36, 0.0  ;;  %v3946_v57 = vsel %vm3940_vm2, %v3933_v15, %v3934_v9  ;;  %v3947_v1 = vsel %vm3940_vm2, %v3932_v23, %v3933_v15  ;;  %v3904_v63 = vadd.f32 %v3861_v7, %v3668_v10  ;;  %5137 = vmatmul.mubr.msk.bf16.gmra.mxu0 %vm1507_vm1, %v7966_v39  ;;  %v8666_v9 = vld [vmem:[#allocation39_spill] sm:$0xff] }
 0x3eb   : > { %v4094_v38 = vsel %vm8029_vm3, %v3946_v57, 0.0  ;;  %v4125_v31 = vadd.f32 %v3947_v1, %v8660_v55  ;;  %vm8074_vm4 = vcmp.lt.s32.totalorder %v1130_v48, 15  ;;  %v5838_v51 = vpop.f32.mrf.mxu1  ;;  %4381 = vmatprep.mubr.bf16.mxu0 %v8615_v27  ;;  %v3938_v26 = vrot.slane %v3906_v60, 1  ;;  %v4482_v60 = vld [vmem:[%s6331_s16] sm:$0xff]  ;;  %v4485_v55 = vld [vmem:[%s6331_s16 + $0x18] sm:$0xff] }
 0x3ec   : > { %v4176_v28 = vpack.c.bf16 %v4156_v21, %v4155_v61  ;;  %v4126_v32 = vadd.f32 %v4094_v38, %v8663_v12  ;;  %v3936_v59 = vrot.slane %v3904_v63, 1  ;;  %v3907_v58 = vadd.f32 %v5838_v51, %v3679_v0  ;;  %v4484_v63 = vld [vmem:[%s6331_s16 + $0x10] sm:$0xff]  ;;  %v4486_v12 = vld [vmem:[%s6331_s16 + $0x20] sm:$0xff] }
 0x3ed   : > { %v4157_v39 = vmax.f32 %v4125_v31, 0.0  ;;  %vm8080_vm5 = vcmp.lt.s32.totalorder %v1158_v16, 15  ;;  %v1144_v2 = vand.u32 15, %v934_v18  ;;  %v3864_v56 = vpop.f32.mrf.mxu1  ;;  %v4159_v30 = vmax.f32 %v4127_v46, 0.0 }
 0x3ee   : > { %v4158_v54 = vmax.f32 %v4126_v32, 0.0  ;;  %v3944_v5 = vsel %vm3940_vm2, %v3935_v37, %v3936_v59  ;;  %v3939_v42 = vrot.slane %v3907_v58, 1  ;;  %v3905_v23 = vadd.f32 %v3864_v56, %v3671_v19 }
 0x3ef   : > { %v4096_v62 = vsel %vm8074_vm4, %v3944_v5, 0.0  ;;  %vm4002_vm6 = vcmp.lt.s32.totalorder %v1144_v2, 15  ;;  %v4488_v5 = vld [vmem:[%s6331_s16 + $0x30] sm:$0xff] }
 0x3f0   : > { %v4177_v43 = vpack.c.bf16 %v4158_v54, %v4157_v39  ;;  %v4128_v52 = vadd.f32 %v4096_v62, %v8666_v9  ;;  %v3941_v48 = vsel %vm3940_vm2, %v3938_v26, %v3939_v42  ;;  %v3972_v18 = vsel %vm3940_vm2, %v3939_v42, %v3908_v25  ;;  %v4489_v9 = vld [vmem:[%s6331_s16 + $0x38] sm:$0xff] }
 0x3f1   : > { %v4100_v33 = vsel %vm8080_vm5, %v3972_v18, 0.0  ;;  %v4131_v49 = vadd.f32 %v3941_v48, %v8667_v44  ;;  %v3937_v37 = vrot.slane %v3905_v23, 1  ;;  %v4490_v44 = vld [vmem:[%s6331_s16 + $0x40] sm:$0xff] }
 0x3f2   : > { %v4160_v24 = vmax.f32 %v4128_v52, 0.0  ;;  %v4132_v53 = vadd.f32 %v4100_v33, %v8668_v6  ;;  %5138 = vmatmul.mubr.msk.bf16.gmra.mxu0 %vm1507_vm1, %v7984_v41  ;;  %v4491_v6 = vld [vmem:[%s6331_s16 + $0x48] sm:$0xff] }
 0x3f3   : > { %v4163_v10 = vmax.f32 %v4131_v49, 0.0  ;;  %v3942_v17 = vsel %vm3940_vm2, %v3937_v37, %v3938_v26  ;;  %v3943_v25 = vsel %vm3940_vm2, %v3936_v59, %v3937_v37  ;;  %4391 = vmatprep.mubr.bf16.mxu0 %v8615_v27  ;;  %v4487_v26 = vld [vmem:[%s6331_s16 + $0x28] sm:$0xff] }
 0x3f4   : > { %v4178_v11 = vpack.c.bf16 %v4160_v24, %v4159_v30  ;;  %v4164_v29 = vmax.f32 %v4132_v53, 0.0  ;;  %v4098_v16 = vsel %vm4002_vm6, %v3942_v17, 0.0  ;;  %v4129_v36 = vadd.f32 %v3943_v25, %v8669_v22 }
 0x3f5   : > { %v4130_v15 = vadd.f32 %v4098_v16, %v8670_v47  ;;  %v4493_v47 = vld [vmem:[%s6331_s16 + $0x58] sm:$0xff] }
 0x3f6   : > { %v4180_v3 = vpack.c.bf16 %v4164_v29, %v4163_v10  ;;  %v4161_v0 = vmax.f32 %v4129_v36, 0.0 }
 0x3f7   : > { %v4162_v61 = vmax.f32 %v4130_v15, 0.0 }
 0x3f9   : > { %v4179_v41 = vpack.c.bf16 %v4162_v61, %v4161_v0 }
 0x3fa   : > { %5139 = vmatmul.mubr.msk.bf16.gmra.mxu0 %vm1507_vm1, %v8004_v35  ;;  %v4193_v35 = vsub.s32 0, %v7298_v4 }
 0x3fb   : > { %4401 = vmatprep.mubr.bf16.mxu0 %v8615_v27 }
 0x402   : > { %5140 = vmatmul.mubr.msk.bf16.gmra.mxu0 %vm1507_vm1, %v8024_v8  ;;  %v4189_v8 = vld [vmem:[%s8390_s6] sm:$0x3] }
 0x403   : > { %4411 = vmatprep.mubr.bf16.mxu0 %v8615_v27 }
 0x40a   : > { %5141 = vmatmul.mubr.msk.bf16.gmra.mxu0 %vm1507_vm1, %v8047_v50  ;;  %v4197_v50 = vsub.s32 1, %v7298_v4 }
 0x40b   : > { %4421 = vmatprep.mubr.bf16.mxu0 %v8615_v27 }
 0x40c   : > { %v8136_v45 = vrot.slane %v4189_v8, %v4197_v50 }
 0x412   : > { %5142 = vmatmul.mubr.msk.bf16.gmra.mxu0 %vm1507_vm1, %v8057_v20  ;;  %v8134_v20 = vrot.slane %v4189_v8, %v4193_v35 }
 0x413   : > { %4431 = vmatprep.mubr.bf16.mxu0 %v8615_v27 }
 0x41a   : > { %5143 = vmatmul.mubr.msk.bf16.gmra.mxu0 %vm1507_vm1, %v4176_v28 }
 0x41b   : > { %4441 = vmatprep.mubr.bf16.mxu0 %v8615_v27 }
 0x422   : > { %5144 = vmatmul.mubr.msk.bf16.gmra.mxu0 %vm1507_vm1, %v4177_v43 }
 0x423   : > { %4451 = vmatprep.mubr.bf16.mxu0 %v8615_v27 }
 0x42a   : > { %5145 = vmatmul.mubr.msk.bf16.gmra.mxu0 %vm1507_vm1, %v4178_v11  ;;  %v4492_v11 = vld [vmem:[%s6331_s16 + $0x50] sm:$0xff] }
 0x42b   : > { %4461 = vmatprep.mubr.bf16.mxu0 %v8615_v27 }
 0x432   : > { %5146 = vmatmul.mubr.msk.bf16.gmra.mxu0 %vm1507_vm1, %v4179_v41  ;;  %v4494_v41 = vld [vmem:[%s6331_s16 + $0x60] sm:$0xff] }
 0x433   : > { %4471 = vmatprep.mubr.bf16.mxu0 %v8615_v27 }
 0x43a   : > { %5147 = vmatmul.mubr.msk.bf16.gmra.mxu0 %vm1507_vm1, %v4180_v3 }
 0x482   : > { %v4323_v46 = vpop.f32.mrf.mxu0 }
 0x483   : > { %v4324_v27 = vadd.f32 %v4323_v46, %v8134_v20 }
 0x484   : > { %v4325_v7 = vpop.f32.mrf.mxu0 }
 0x485   : > { %v4546_v21 = vadd.f32 %v4482_v60, %v4324_v27  ;;  %v4326_v57 = vadd.f32 %v4325_v7, %v8136_v45  ;;  %v4495_v60 = vld [vmem:[%s6331_s16 + $0x68] sm:$0xff] }
 0x486   : > { %v4327_v1 = vpop.f32.mrf.mxu0 }
 0x487   : > { %v4610_v40 = vmax.f32 %v4546_v21, 0.0  ;;  %v4547_v4 = vadd.f32 %v4483_v13, %v4326_v57  ;;  %v4328_v19 = vadd.f32 %v4327_v1, %v8134_v20  ;;  %v4496_v57 = vld [vmem:[%s6331_s16 + $0x70] sm:$0xff] }
 0x488   : > { %v4329_v38 = vpop.f32.mrf.mxu0 }
 0x489   : > { %4674 = vst [vmem:[%s8147_s30] sm:$0xff] %v4610_v40  ;;  %v4611_v31 = vmax.f32 %v4547_v4, 0.0  ;;  %v4548_v14 = vadd.f32 %v4484_v63, %v4328_v19  ;;  %v4330_v51 = vadd.f32 %v4329_v38, %v8136_v45  ;;  %v4497_v19 = vld [vmem:[%s6331_s16 + $0x78] sm:$0xff] }
 0x48a   : > { %v4333_v28 = vpop.f32.mrf.mxu0 }
 0x48b   : > { %4675 = vst [vmem:[%s8147_s30 + $0x8] sm:$0xff] %v4611_v31  ;;  %v4612_v32 = vmax.f32 %v4548_v14, 0.0  ;;  %v4549_v59 = vadd.f32 %v4485_v55, %v4330_v51  ;;  %v4334_v58 = vadd.f32 %v4333_v28, %v8134_v20  ;;  %v4498_v51 = vld [vmem:[%s6331_s16 + $0x80] sm:$0xff] }
 0x48c   : > { %v4335_v39 = vpop.f32.mrf.mxu0 }
 0x48d   : > { %4676 = vst [vmem:[%s8147_s30 + $0x10] sm:$0xff] %v4612_v32  ;;  %v4613_v34 = vmax.f32 %v4549_v59, 0.0  ;;  %v4550_v2 = vadd.f32 %v4486_v12, %v4334_v58  ;;  %v4336_v56 = vadd.f32 %v4335_v39, %v8136_v45  ;;  %v4499_v58 = vld [vmem:[%s6331_s16 + $0x88] sm:$0xff] }
 0x48e   : > { %v4337_v54 = vpop.f32.mrf.mxu0 }
 0x48f   : > { %4677 = vst [vmem:[%s8147_s30 + $0x18] sm:$0xff] %v4613_v34  ;;  %v4614_v42 = vmax.f32 %v4550_v2, 0.0  ;;  %v4551_v23 = vadd.f32 %v4487_v26, %v4336_v56  ;;  %v4338_v62 = vadd.f32 %v4337_v54, %v8134_v20  ;;  %v4500_v56 = vld [vmem:[%s6331_s16 + $0x90] sm:$0xff] }
 0x490   : > { %v4339_v43 = vpop.f32.mrf.mxu0 }
 0x491   : > { %4678 = vst [vmem:[%s8147_s30 + $0x20] sm:$0xff] %v4614_v42  ;;  %v4615_v52 = vmax.f32 %v4551_v23, 0.0  ;;  %v4552_v48 = vadd.f32 %v4488_v5, %v4338_v62  ;;  %v4340_v18 = vadd.f32 %v4339_v43, %v8136_v45  ;;  %v4501_v62 = vld [vmem:[%s6331_s16 + $0x98] sm:$0xff] }
 0x492   : > { %v4343_v33 = vpop.f32.mrf.mxu0 }
 0x493   : > { %4679 = vst [vmem:[%s8147_s30 + $0x28] sm:$0xff] %v4615_v52  ;;  %v4616_v49 = vmax.f32 %v4552_v48, 0.0  ;;  %v4553_v37 = vadd.f32 %v4489_v9, %v4340_v18  ;;  %v4344_v30 = vadd.f32 %v4343_v33, %v8134_v20  ;;  %v4502_v18 = vld [vmem:[%s6331_s16 + $0xa0] sm:$0xff] }
 0x494   : > { %v4345_v24 = vpop.f32.mrf.mxu0 }
 0x495   : > { %4680 = vst [vmem:[%s8147_s30 + $0x30] sm:$0xff] %v4616_v49  ;;  %v4617_v53 = vmax.f32 %v4553_v37, 0.0  ;;  %v4554_v10 = vadd.f32 %v4490_v44, %v4344_v30  ;;  %v4346_v17 = vadd.f32 %v4345_v24, %v8136_v45  ;;  %v4503_v30 = vld [vmem:[%s6331_s16 + $0xa8] sm:$0xff] }
 0x496   : > { %v4347_v25 = vpop.f32.mrf.mxu0 }
 0x497   : > { %4681 = vst [vmem:[%s8147_s30 + $0x38] sm:$0xff] %v4617_v53  ;;  %v4618_v29 = vmax.f32 %v4554_v10, 0.0  ;;  %v4555_v16 = vadd.f32 %v4491_v6, %v4346_v17  ;;  %v4348_v22 = vadd.f32 %v4347_v25, %v8134_v20  ;;  %v4504_v17 = vld [vmem:[%s6331_s16 + $0xb0] sm:$0xff] }
 0x498   : > { %v4349_v36 = vpop.f32.mrf.mxu0 }
 0x499   : > { %4682 = vst [vmem:[%s8147_s30 + $0x40] sm:$0xff] %v4618_v29  ;;  %v4619_v15 = vmax.f32 %v4555_v16, 0.0  ;;  %v4556_v3 = vadd.f32 %v4492_v11, %v4348_v22  ;;  %v4350_v0 = vadd.f32 %v4349_v36, %v8136_v45  ;;  %v4505_v22 = vld [vmem:[%s6331_s16 + $0xb8] sm:$0xff] }
 0x49a   : > { %v4353_v61 = vpop.f32.mrf.mxu0 }
 0x49b   : > { %4683 = vst [vmem:[%s8147_s30 + $0x48] sm:$0xff] %v4619_v15  ;;  %v4620_v35 = vmax.f32 %v4556_v3, 0.0  ;;  %v4557_v8 = vadd.f32 %v4493_v47, %v4350_v0  ;;  %v4354_v50 = vadd.f32 %v4353_v61, %v8134_v20  ;;  %v4506_v0 = vld [vmem:[%s6331_s16 + $0xc0] sm:$0xff] }
 0x49c   : > { %v4355_v46 = vpop.f32.mrf.mxu0 }
 0x49d   : > { %4684 = vst [vmem:[%s8147_s30 + $0x50] sm:$0xff] %v4620_v35  ;;  %v4621_v27 = vmax.f32 %v4557_v8, 0.0  ;;  %v4558_v7 = vadd.f32 %v4494_v41, %v4354_v50  ;;  %v4356_v13 = vadd.f32 %v4355_v46, %v8136_v45  ;;  %v4507_v50 = vld [vmem:[%s6331_s16 + $0xc8] sm:$0xff] }
 0x49e   : > { %v4357_v21 = vpop.f32.mrf.mxu0 }
 0x49f   : > { %4685 = vst [vmem:[%s8147_s30 + $0x58] sm:$0xff] %v4621_v27  ;;  %v4622_v1 = vmax.f32 %v4558_v7, 0.0  ;;  %v4559_v63 = vadd.f32 %v4495_v60, %v4356_v13  ;;  %v4358_v40 = vadd.f32 %v4357_v21, %v8134_v20  ;;  %v4508_v13 = vld [vmem:[%s6331_s16 + $0xd0] sm:$0xff] }
 0x4a0   : > { %v4359_v4 = vpop.f32.mrf.mxu0 }
 0x4a1   : > { %4686 = vst [vmem:[%s8147_s30 + $0x60] sm:$0xff] %v4622_v1  ;;  %v4623_v38 = vmax.f32 %v4559_v63, 0.0  ;;  %v4560_v55 = vadd.f32 %v4496_v57, %v4358_v40  ;;  %v4360_v31 = vadd.f32 %v4359_v4, %v8136_v45  ;;  %v4509_v40 = vld [vmem:[%s6331_s16 + $0xd8] sm:$0xff] }
 0x4a2   : > { %v4363_v14 = vpop.f32.mrf.mxu0 }
 0x4a3   : > { %4687 = vst [vmem:[%s8147_s30 + $0x68] sm:$0xff] %v4623_v38  ;;  %v4624_v28 = vmax.f32 %v4560_v55, 0.0  ;;  %v4561_v12 = vadd.f32 %v4497_v19, %v4360_v31  ;;  %v4364_v32 = vadd.f32 %v4363_v14, %v8134_v20  ;;  %v4510_v31 = vld [vmem:[%s6331_s16 + $0xe0] sm:$0xff] }
 0x4a4   : > { %v4365_v59 = vpop.f32.mrf.mxu0 }
 0x4a5   : > { %4688 = vst [vmem:[%s8147_s30 + $0x70] sm:$0xff] %v4624_v28  ;;  %v4625_v39 = vmax.f32 %v4561_v12, 0.0  ;;  %v4562_v26 = vadd.f32 %v4498_v51, %v4364_v32  ;;  %v4366_v34 = vadd.f32 %v4365_v59, %v8136_v45  ;;  %v4511_v32 = vld [vmem:[%s6331_s16 + $0xe8] sm:$0xff] }
 0x4a6   : > { %v4367_v2 = vpop.f32.mrf.mxu0 }
 0x4a7   : > { %4689 = vst [vmem:[%s8147_s30 + $0x78] sm:$0xff] %v4625_v39  ;;  %v4626_v54 = vmax.f32 %v4562_v26, 0.0  ;;  %v4563_v5 = vadd.f32 %v4499_v58, %v4366_v34  ;;  %v4368_v42 = vadd.f32 %v4367_v2, %v8134_v20  ;;  %v4512_v34 = vld [vmem:[%s6331_s16 + $0xf0] sm:$0xff] }
 0x4a8   : > { %v4369_v23 = vpop.f32.mrf.mxu0 }
 0x4a9   : > { %4690 = vst [vmem:[%s8147_s30 + $0x80] sm:$0xff] %v4626_v54  ;;  %v4627_v43 = vmax.f32 %v4563_v5, 0.0  ;;  %v4564_v9 = vadd.f32 %v4500_v56, %v4368_v42  ;;  %v4370_v52 = vadd.f32 %v4369_v23, %v8136_v45  ;;  %v4513_v42 = vld [vmem:[%s6331_s16 + $0xf8] sm:$0xff] }
 0x4aa   : > { %v4373_v48 = vpop.f32.mrf.mxu0 }
 0x4ab   : > { %4691 = vst [vmem:[%s8147_s30 + $0x88] sm:$0xff] %v4627_v43  ;;  %v4628_v33 = vmax.f32 %v4564_v9, 0.0  ;;  %v4565_v44 = vadd.f32 %v4501_v62, %v4370_v52  ;;  %v4374_v49 = vadd.f32 %v4373_v48, %v8134_v20  ;;  %v4514_v52 = vld [vmem:[%s6331_s16 + $0x100] sm:$0xff] }
 0x4ac   : > { %v4375_v37 = vpop.f32.mrf.mxu0 }
 0x4ad   : > { %4692 = vst [vmem:[%s8147_s30 + $0x90] sm:$0xff] %v4628_v33  ;;  %v4629_v24 = vmax.f32 %v4565_v44, 0.0  ;;  %v4566_v6 = vadd.f32 %v4502_v18, %v4374_v49  ;;  %v4376_v53 = vadd.f32 %v4375_v37, %v8136_v45  ;;  %v4515_v49 = vld [vmem:[%s6331_s16 + $0x108] sm:$0xff] }
 0x4ae   : > { %v4377_v10 = vpop.f32.mrf.mxu0 }
 0x4af   : > { %4693 = vst [vmem:[%s8147_s30 + $0x98] sm:$0xff] %v4629_v24  ;;  %v4630_v25 = vmax.f32 %v4566_v6, 0.0  ;;  %v4567_v11 = vadd.f32 %v4503_v30, %v4376_v53  ;;  %v4378_v29 = vadd.f32 %v4377_v10, %v8134_v20  ;;  %v4516_v53 = vld [vmem:[%s6331_s16 + $0x110] sm:$0xff] }
 0x4b0   : > { %v4379_v16 = vpop.f32.mrf.mxu0 }
 0x4b1   : > { %4694 = vst [vmem:[%s8147_s30 + $0xa0] sm:$0xff] %v4630_v25  ;;  %v4631_v36 = vmax.f32 %v4567_v11, 0.0  ;;  %v4568_v47 = vadd.f32 %v4504_v17, %v4378_v29  ;;  %v4380_v15 = vadd.f32 %v4379_v16, %v8136_v45  ;;  %v4517_v29 = vld [vmem:[%s6331_s16 + $0x118] sm:$0xff] }
 0x4b2   : > { %v4383_v3 = vpop.f32.mrf.mxu0 }
 0x4b3   : > { %4695 = vst [vmem:[%s8147_s30 + $0xa8] sm:$0xff] %v4631_v36  ;;  %v4632_v61 = vmax.f32 %v4568_v47, 0.0  ;;  %v4569_v41 = vadd.f32 %v4505_v22, %v4380_v15  ;;  %v4384_v35 = vadd.f32 %v4383_v3, %v8134_v20  ;;  %v4518_v15 = vld [vmem:[%s6331_s16 + $0x120] sm:$0xff] }
 0x4b4   : > { %v4385_v8 = vpop.f32.mrf.mxu0 }
 0x4b5   : > { %4696 = vst [vmem:[%s8147_s30 + $0xb0] sm:$0xff] %v4632_v61  ;;  %v4633_v46 = vmax.f32 %v4569_v41, 0.0  ;;  %v4570_v60 = vadd.f32 %v4506_v0, %v4384_v35  ;;  %v4386_v27 = vadd.f32 %v4385_v8, %v8136_v45  ;;  %v4519_v35 = vld [vmem:[%s6331_s16 + $0x128] sm:$0xff] }
 0x4b6   : > { %v4387_v7 = vpop.f32.mrf.mxu0 }
 0x4b7   : > { %4697 = vst [vmem:[%s8147_s30 + $0xb8] sm:$0xff] %v4633_v46  ;;  %v4634_v21 = vmax.f32 %v4570_v60, 0.0  ;;  %v4571_v57 = vadd.f32 %v4507_v50, %v4386_v27  ;;  %v4388_v1 = vadd.f32 %v4387_v7, %v8134_v20  ;;  %v4520_v27 = vld [vmem:[%s6331_s16 + $0x130] sm:$0xff] }
 0x4b8   : > { %v4389_v63 = vpop.f32.mrf.mxu0 }
 0x4b9   : > { %4698 = vst [vmem:[%s8147_s30 + $0xc0] sm:$0xff] %v4634_v21  ;;  %v4635_v4 = vmax.f32 %v4571_v57, 0.0  ;;  %v4572_v19 = vadd.f32 %v4508_v13, %v4388_v1  ;;  %v4390_v38 = vadd.f32 %v4389_v63, %v8136_v45  ;;  %v4521_v1 = vld [vmem:[%s6331_s16 + $0x138] sm:$0xff] }
 0x4ba   : > { %v4393_v55 = vpop.f32.mrf.mxu0 }
 0x4bb   : > { %4699 = vst [vmem:[%s8147_s30 + $0xc8] sm:$0xff] %v4635_v4  ;;  %v4636_v14 = vmax.f32 %v4572_v19, 0.0  ;;  %v4573_v51 = vadd.f32 %v4509_v40, %v4390_v38  ;;  %v4394_v28 = vadd.f32 %v4393_v55, %v8134_v20  ;;  %v4522_v38 = vld [vmem:[%s6331_s16 + $0x140] sm:$0xff] }
 0x4bc   : > { %v4395_v12 = vpop.f32.mrf.mxu0 }
 0x4bd   : > { %4700 = vst [vmem:[%s8147_s30 + $0xd0] sm:$0xff] %v4636_v14  ;;  %v4637_v59 = vmax.f32 %v4573_v51, 0.0  ;;  %v4574_v58 = vadd.f32 %v4510_v31, %v4394_v28  ;;  %v4396_v39 = vadd.f32 %v4395_v12, %v8136_v45  ;;  %v4523_v28 = vld [vmem:[%s6331_s16 + $0x148] sm:$0xff] }
 0x4be   : > { %v4397_v26 = vpop.f32.mrf.mxu0 }
 0x4bf   : > { %4701 = vst [vmem:[%s8147_s30 + $0xd8] sm:$0xff] %v4637_v59  ;;  %v4638_v2 = vmax.f32 %v4574_v58, 0.0  ;;  %v4575_v56 = vadd.f32 %v4511_v32, %v4396_v39  ;;  %v4398_v54 = vadd.f32 %v4397_v26, %v8134_v20  ;;  %v4524_v39 = vld [vmem:[%s6331_s16 + $0x150] sm:$0xff] }
 0x4c0   : > { %v4399_v5 = vpop.f32.mrf.mxu0 }
 0x4c1   : > { %4702 = vst [vmem:[%s8147_s30 + $0xe0] sm:$0xff] %v4638_v2  ;;  %v4639_v23 = vmax.f32 %v4575_v56, 0.0  ;;  %v4576_v62 = vadd.f32 %v4512_v34, %v4398_v54  ;;  %v4400_v43 = vadd.f32 %v4399_v5, %v8136_v45  ;;  %v4525_v54 = vld [vmem:[%s6331_s16 + $0x158] sm:$0xff] }
 0x4c2   : > { %v4403_v9 = vpop.f32.mrf.mxu0 }
 0x4c3   : > { %4703 = vst [vmem:[%s8147_s30 + $0xe8] sm:$0xff] %v4639_v23  ;;  %v4640_v48 = vmax.f32 %v4576_v62, 0.0  ;;  %v4577_v18 = vadd.f32 %v4513_v42, %v4400_v43  ;;  %v4404_v33 = vadd.f32 %v4403_v9, %v8134_v20  ;;  %v4526_v43 = vld [vmem:[%s6331_s16 + $0x160] sm:$0xff] }
 0x4c4   : > { %v4405_v44 = vpop.f32.mrf.mxu0 }
 0x4c5   : > { %4704 = vst [vmem:[%s8147_s30 + $0xf0] sm:$0xff] %v4640_v48  ;;  %v4641_v37 = vmax.f32 %v4577_v18, 0.0  ;;  %v4578_v30 = vadd.f32 %v4514_v52, %v4404_v33  ;;  %v4406_v24 = vadd.f32 %v4405_v44, %v8136_v45  ;;  %v4527_v33 = vld [vmem:[%s6331_s16 + $0x168] sm:$0xff] }
 0x4c6   : > { %v4407_v6 = vpop.f32.mrf.mxu0 }
 0x4c7   : > { %4705 = vst [vmem:[%s8147_s30 + $0xf8] sm:$0xff] %v4641_v37  ;;  %v4642_v10 = vmax.f32 %v4578_v30, 0.0  ;;  %v4579_v17 = vadd.f32 %v4515_v49, %v4406_v24  ;;  %v4408_v25 = vadd.f32 %v4407_v6, %v8134_v20  ;;  %v4528_v24 = vld [vmem:[%s6331_s16 + $0x170] sm:$0xff] }
 0x4c8   : > { %v4409_v11 = vpop.f32.mrf.mxu0 }
 0x4c9   : > { %4706 = vst [vmem:[%s8147_s30 + $0x100] sm:$0xff] %v4642_v10  ;;  %v4643_v16 = vmax.f32 %v4579_v17, 0.0  ;;  %v4580_v22 = vadd.f32 %v4516_v53, %v4408_v25  ;;  %v4410_v36 = vadd.f32 %v4409_v11, %v8136_v45  ;;  %v4529_v25 = vld [vmem:[%s6331_s16 + $0x178] sm:$0xff] }
 0x4ca   : > { %v4413_v47 = vpop.f32.mrf.mxu0 }
 0x4cb   : > { %4707 = vst [vmem:[%s8147_s30 + $0x108] sm:$0xff] %v4643_v16  ;;  %v4644_v3 = vmax.f32 %v4580_v22, 0.0  ;;  %v4581_v0 = vadd.f32 %v4517_v29, %v4410_v36  ;;  %v4414_v61 = vadd.f32 %v4413_v47, %v8134_v20  ;;  %v4530_v36 = vld [vmem:[%s6331_s16 + $0x180] sm:$0xff] }
 0x4cc   : > { %v4415_v41 = vpop.f32.mrf.mxu0 }
 0x4cd   : > { %4708 = vst [vmem:[%s8147_s30 + $0x110] sm:$0xff] %v4644_v3  ;;  %v4645_v8 = vmax.f32 %v4581_v0, 0.0  ;;  %v4582_v50 = vadd.f32 %v4518_v15, %v4414_v61  ;;  %v4416_v46 = vadd.f32 %v4415_v41, %v8136_v45  ;;  %v4531_v61 = vld [vmem:[%s6331_s16 + $0x188] sm:$0xff] }
 0x4ce   : > { %v4417_v60 = vpop.f32.mrf.mxu0 }
 0x4cf   : > { %4709 = vst [vmem:[%s8147_s30 + $0x118] sm:$0xff] %v4645_v8  ;;  %v4646_v7 = vmax.f32 %v4582_v50, 0.0  ;;  %v4583_v13 = vadd.f32 %v4519_v35, %v4416_v46  ;;  %v4418_v21 = vadd.f32 %v4417_v60, %v8134_v20  ;;  %v4532_v46 = vld [vmem:[%s6331_s16 + $0x190] sm:$0xff] }
 0x4d0   : > { %v4419_v57 = vpop.f32.mrf.mxu0 }
 0x4d1   : > { %4710 = vst [vmem:[%s8147_s30 + $0x120] sm:$0xff] %v4646_v7  ;;  %v4647_v63 = vmax.f32 %v4583_v13, 0.0  ;;  %v4584_v40 = vadd.f32 %v4520_v27, %v4418_v21  ;;  %v4420_v4 = vadd.f32 %v4419_v57, %v8136_v45  ;;  %v4533_v21 = vld [vmem:[%s6331_s16 + $0x198] sm:$0xff] }
 0x4d2   : > { %v4423_v19 = vpop.f32.mrf.mxu0 }
 0x4d3   : > { %4711 = vst [vmem:[%s8147_s30 + $0x128] sm:$0xff] %v4647_v63  ;;  %v4648_v55 = vmax.f32 %v4584_v40, 0.0  ;;  %v4585_v31 = vadd.f32 %v4521_v1, %v4420_v4  ;;  %v4424_v14 = vadd.f32 %v4423_v19, %v8134_v20  ;;  %v4534_v4 = vld [vmem:[%s6331_s16 + $0x1a0] sm:$0xff] }
 0x4d4   : > { %v4425_v51 = vpop.f32.mrf.mxu0 }
 0x4d5   : > { %4712 = vst [vmem:[%s8147_s30 + $0x130] sm:$0xff] %v4648_v55  ;;  %v4649_v12 = vmax.f32 %v4585_v31, 0.0  ;;  %v4586_v32 = vadd.f32 %v4522_v38, %v4424_v14  ;;  %v4426_v59 = vadd.f32 %v4425_v51, %v8136_v45  ;;  %v4535_v14 = vld [vmem:[%s6331_s16 + $0x1a8] sm:$0xff] }
 0x4d6   : > { %v4427_v58 = vpop.f32.mrf.mxu0 }
 0x4d7   : > { %4713 = vst [vmem:[%s8147_s30 + $0x138] sm:$0xff] %v4649_v12  ;;  %v4650_v26 = vmax.f32 %v4586_v32, 0.0  ;;  %v4587_v34 = vadd.f32 %v4523_v28, %v4426_v59  ;;  %v4428_v2 = vadd.f32 %v4427_v58, %v8134_v20  ;;  %v4536_v59 = vld [vmem:[%s6331_s16 + $0x1b0] sm:$0xff] }
 0x4d8   : > { %v4429_v56 = vpop.f32.mrf.mxu0 }
 0x4d9   : > { %4714 = vst [vmem:[%s8147_s30 + $0x140] sm:$0xff] %v4650_v26  ;;  %v4651_v5 = vmax.f32 %v4587_v34, 0.0  ;;  %v4588_v42 = vadd.f32 %v4524_v39, %v4428_v2  ;;  %v4430_v23 = vadd.f32 %v4429_v56, %v8136_v45  ;;  %v4537_v2 = vld [vmem:[%s6331_s16 + $0x1b8] sm:$0xff] }
 0x4da   : > { %v4433_v62 = vpop.f32.mrf.mxu0 }
 0x4db   : > { %4715 = vst [vmem:[%s8147_s30 + $0x148] sm:$0xff] %v4651_v5  ;;  %v4652_v9 = vmax.f32 %v4588_v42, 0.0  ;;  %v4589_v52 = vadd.f32 %v4525_v54, %v4430_v23  ;;  %v4434_v48 = vadd.f32 %v4433_v62, %v8134_v20  ;;  %v4538_v23 = vld [vmem:[%s6331_s16 + $0x1c0] sm:$0xff] }
 0x4dc   : > { %v4435_v18 = vpop.f32.mrf.mxu0 }
 0x4dd   : > { %4716 = vst [vmem:[%s8147_s30 + $0x150] sm:$0xff] %v4652_v9  ;;  %v4653_v44 = vmax.f32 %v4589_v52, 0.0  ;;  %v4590_v49 = vadd.f32 %v4526_v43, %v4434_v48  ;;  %v4436_v37 = vadd.f32 %v4435_v18, %v8136_v45  ;;  %v4539_v48 = vld [vmem:[%s6331_s16 + $0x1c8] sm:$0xff] }
 0x4de   : > { %v4437_v30 = vpop.f32.mrf.mxu0 }
 0x4df   : > { %4717 = vst [vmem:[%s8147_s30 + $0x158] sm:$0xff] %v4653_v44  ;;  %v4654_v6 = vmax.f32 %v4590_v49, 0.0  ;;  %v4591_v53 = vadd.f32 %v4527_v33, %v4436_v37  ;;  %v4438_v10 = vadd.f32 %v4437_v30, %v8134_v20  ;;  %v4540_v37 = vld [vmem:[%s6331_s16 + $0x1d0] sm:$0xff] }
 0x4e0   : > { %v4439_v17 = vpop.f32.mrf.mxu0 }
 0x4e1   : > { %4718 = vst [vmem:[%s8147_s30 + $0x160] sm:$0xff] %v4654_v6  ;;  %v4655_v11 = vmax.f32 %v4591_v53, 0.0  ;;  %v4592_v29 = vadd.f32 %v4528_v24, %v4438_v10  ;;  %v4440_v16 = vadd.f32 %v4439_v17, %v8136_v45  ;;  %v4541_v10 = vld [vmem:[%s6331_s16 + $0x1d8] sm:$0xff] }
 0x4e2   : > { %v4443_v22 = vpop.f32.mrf.mxu0 }
 0x4e3   : > { %4719 = vst [vmem:[%s8147_s30 + $0x168] sm:$0xff] %v4655_v11  ;;  %v4656_v47 = vmax.f32 %v4592_v29, 0.0  ;;  %v4593_v15 = vadd.f32 %v4529_v25, %v4440_v16  ;;  %v4444_v3 = vadd.f32 %v4443_v22, %v8134_v20  ;;  %v4542_v16 = vld [vmem:[%s6331_s16 + $0x1e0] sm:$0xff] }
 0x4e4   : > { %v4445_v0 = vpop.f32.mrf.mxu0 }
 0x4e5   : > { %4720 = vst [vmem:[%s8147_s30 + $0x170] sm:$0xff] %v4656_v47  ;;  %v4657_v41 = vmax.f32 %v4593_v15, 0.0  ;;  %v4594_v35 = vadd.f32 %v4530_v36, %v4444_v3  ;;  %v4446_v8 = vadd.f32 %v4445_v0, %v8136_v45  ;;  %v4543_v3 = vld [vmem:[%s6331_s16 + $0x1e8] sm:$0xff] }
 0x4e6   : > { %v4447_v50 = vpop.f32.mrf.mxu0 }
 0x4e7   : > { %4721 = vst [vmem:[%s8147_s30 + $0x178] sm:$0xff] %v4657_v41  ;;  %v4658_v60 = vmax.f32 %v4594_v35, 0.0  ;;  %v4595_v27 = vadd.f32 %v4531_v61, %v4446_v8  ;;  %v4448_v7 = vadd.f32 %v4447_v50, %v8134_v20  ;;  %v4544_v8 = vld [vmem:[%s6331_s16 + $0x1f0] sm:$0xff] }
 0x4e8   : > { %v4449_v13 = vpop.f32.mrf.mxu0 }
 0x4e9   : > { %4722 = vst [vmem:[%s8147_s30 + $0x180] sm:$0xff] %v4658_v60  ;;  %v4659_v57 = vmax.f32 %v4595_v27, 0.0  ;;  %v4596_v1 = vadd.f32 %v4532_v46, %v4448_v7  ;;  %v4450_v63 = vadd.f32 %v4449_v13, %v8136_v45  ;;  %v4545_v7 = vld [vmem:[%s6331_s16 + $0x1f8] sm:$0xff]  ;;  %s4739_s16 = scalar_lea.sflag [#allocation5], %s6325_s10 }
 0x4ea   : > { %v4453_v40 = vpop.f32.mrf.mxu0 }
 0x4eb   : > { %4723 = vst [vmem:[%s8147_s30 + $0x188] sm:$0xff] %v4659_v57  ;;  %v4660_v19 = vmax.f32 %v4596_v1, 0.0  ;;  %v4597_v38 = vadd.f32 %v4533_v21, %v4450_v63  ;;  %v4454_v55 = vadd.f32 %v4453_v40, %v8134_v20 }
 0x4ec   : > { %v4455_v31 = vpop.f32.mrf.mxu0 }
 0x4ed   : > { %4724 = vst [vmem:[%s8147_s30 + $0x190] sm:$0xff] %v4660_v19  ;;  %v4661_v51 = vmax.f32 %v4597_v38, 0.0  ;;  %v4598_v28 = vadd.f32 %v4534_v4, %v4454_v55  ;;  %v4456_v12 = vadd.f32 %v4455_v31, %v8136_v45 }
 0x4ee   : > { %v4457_v32 = vpop.f32.mrf.mxu0 }
 0x4ef   : > { %4725 = vst [vmem:[%s8147_s30 + $0x198] sm:$0xff] %v4661_v51  ;;  %v4662_v58 = vmax.f32 %v4598_v28, 0.0  ;;  %v4599_v39 = vadd.f32 %v4535_v14, %v4456_v12  ;;  %v4458_v26 = vadd.f32 %v4457_v32, %v8134_v20 }
 0x4f0   : > { %v4459_v34 = vpop.f32.mrf.mxu0 }
 0x4f1   : > { %4726 = vst [vmem:[%s8147_s30 + $0x1a0] sm:$0xff] %v4662_v58  ;;  %v4663_v56 = vmax.f32 %v4599_v39, 0.0  ;;  %v4600_v54 = vadd.f32 %v4536_v59, %v4458_v26  ;;  %v4460_v5 = vadd.f32 %v4459_v34, %v8136_v45 }
 0x4f2   : > { %v4463_v42 = vpop.f32.mrf.mxu0 }
 0x4f3   : > { %4727 = vst [vmem:[%s8147_s30 + $0x1a8] sm:$0xff] %v4663_v56  ;;  %v4664_v62 = vmax.f32 %v4600_v54, 0.0  ;;  %v4601_v43 = vadd.f32 %v4537_v2, %v4460_v5  ;;  %v4464_v9 = vadd.f32 %v4463_v42, %v8134_v20 }
 0x4f4   : > { %v4465_v52 = vpop.f32.mrf.mxu0 }
 0x4f5   : > { %4728 = vst [vmem:[%s8147_s30 + $0x1b0] sm:$0xff] %v4664_v62  ;;  %v4665_v18 = vmax.f32 %v4601_v43, 0.0  ;;  %v4602_v33 = vadd.f32 %v4538_v23, %v4464_v9  ;;  %v4466_v44 = vadd.f32 %v4465_v52, %v8136_v45 }
 0x4f6   : > { %v4467_v49 = vpop.f32.mrf.mxu0 }
 0x4f7   : > { %4729 = vst [vmem:[%s8147_s30 + $0x1b8] sm:$0xff] %v4665_v18  ;;  %v4666_v30 = vmax.f32 %v4602_v33, 0.0  ;;  %v4603_v24 = vadd.f32 %v4539_v48, %v4466_v44  ;;  %v4468_v6 = vadd.f32 %v4467_v49, %v8134_v20 }
 0x4f8   : > { %v4469_v53 = vpop.f32.mrf.mxu0 }
 0x4f9   : > { %4730 = vst [vmem:[%s8147_s30 + $0x1c0] sm:$0xff] %v4666_v30  ;;  %v4667_v17 = vmax.f32 %v4603_v24, 0.0  ;;  %v4604_v25 = vadd.f32 %v4540_v37, %v4468_v6  ;;  %v4470_v11 = vadd.f32 %v4469_v53, %v8136_v45 }
 0x4fa   : > { %v4473_v29 = vpop.f32.mrf.mxu0 }
 0x4fb   : > { %4731 = vst [vmem:[%s8147_s30 + $0x1c8] sm:$0xff] %v4667_v17  ;;  %v4668_v22 = vmax.f32 %v4604_v25, 0.0  ;;  %v4605_v36 = vadd.f32 %v4541_v10, %v4470_v11  ;;  %v4474_v47 = vadd.f32 %v4473_v29, %v8134_v20 }
 0x4fc   : > { %v4475_v15 = vpop.f32.mrf.mxu0 }
 0x4fd   : > { %4732 = vst [vmem:[%s8147_s30 + $0x1d0] sm:$0xff] %v4668_v22  ;;  %v4669_v0 = vmax.f32 %v4605_v36, 0.0  ;;  %v4606_v61 = vadd.f32 %v4542_v16, %v4474_v47  ;;  %v4476_v41 = vadd.f32 %v4475_v15, %v8136_v45 }
 0x4fe   : > { %v4477_v35 = vpop.f32.mrf.mxu0 }
 0x4ff   : > { %4733 = vst [vmem:[%s8147_s30 + $0x1d8] sm:$0xff] %v4669_v0  ;;  %v4670_v50 = vmax.f32 %v4606_v61, 0.0  ;;  %v4607_v46 = vadd.f32 %v4543_v3, %v4476_v41  ;;  %v4478_v60 = vadd.f32 %v4477_v35, %v8134_v20 }
 0x500   : > { %v4479_v27 = vpop.f32.mrf.mxu0 }
 0x501   : > { %4734 = vst [vmem:[%s8147_s30 + $0x1e0] sm:$0xff] %v4670_v50  ;;  %v4671_v13 = vmax.f32 %v4607_v46, 0.0  ;;  %v4608_v21 = vadd.f32 %v4544_v8, %v4478_v60  ;;  %v4480_v57 = vadd.f32 %v4479_v27, %v8136_v45 }
 0x503   : > { %4735 = vst [vmem:[%s8147_s30 + $0x1e8] sm:$0xff] %v4671_v13  ;;  %v4672_v1 = vmax.f32 %v4608_v21, 0.0  ;;  %v4609_v63 = vadd.f32 %v4545_v7, %v4480_v57 }
 0x505   : > { %4736 = vst [vmem:[%s8147_s30 + $0x1f0] sm:$0xff] %v4672_v1  ;;  %v4673_v20 = vmax.f32 %v4609_v63, 0.0 }
 0x507   : > { %4737 = vst [vmem:[%s8147_s30 + $0x1f8] sm:$0xff] %v4673_v20 }
 0x508   : > { %6102 = shalt.err (!%p6099_p0)
}
 0x509   : > { %s6103_s14 = scalar_lea.hbm %s8337_s29, 8192  ;;  %s6107_s23 = scalar_lea.hbm %s8391_s7, 16384 }
 0x50a   : > { %p6104_p5 = scmp.ne.s32.totalorder %s8337_s29, %s6103_s14  ;;  %p6108_p4 = scmp.lt.s32.totalorder %s8337_s29, %s8391_s7 }
 0x50b   : > { %p6109_p6 = scmp.lt.s32.totalorder %s6107_s23, %s6103_s14 }
 0x50c   : > { %p6105_p9 = pnand %p6104_p5, %p8671_p11 }
 0x50d   : > { %p6110_p8 = por %p6109_p6, %p6108_p4 }
 0x50e   : > { %p6106_p1 = pneg %p6105_p9 }
 0x510   : > { %p6111_p3 = pnand %p6110_p8, %p6106_p1 }
 0x512   : > { %6114 = shalt.err (!%p6111_p3)
}
 0x513   : > { %s6167_s20 = smov 256   ;;  %s6168_s18 = smov 16  }
 0x514   : > { %5853 = dma.vmem_to_hbm [thread:$0]  (%p8671_p11), %s8339_s11, 8192, %s8337_s29, %s4739_s16, %s6167_s20, %s6167_s20, %s6168_s18  }
 0x515 PF: > { %s4767_s12 = sand.u32 1, %s6145_s24   ;;  %p8672_p7 = scmp.ne.s32.totalorder %s8411_s8, 0 }
 0x516   : > { %p8673_p12 = scmp.ge.s32.totalorder %s6157_s27, 2  ;;  %s4768_s28 = scalar_lea.sflag [#allocation5], %s4767_s12 }
 0x518   : > { %p5864_p10 = pnand %p8673_p12, %p8672_p7 }
 0x51a   : > { %p5865_p2 = pneg %p5864_p10 }
 0x51c   : > { %6140 = dma.done.wait (%p5865_p2), %s4768_s28, 8192  }
 0x51d   : > { %6142 = vsyncadd (%p5865_p2), %s4768_s28, 4294959104  ;;  %p21_p13 = scmp.ge.s32.totalorder %s6263_s13, 4   ;;  %s8674_s24 = smov %s6149_s25 }
 0x51e   : > { %s8675_s25 = smov %s6153_s26  ;;  %s8676_s26 = smov %s6280_s21 }
 0x51f   : > { %s8677_s27 = smov %s6263_s13  ;;  %23 = sbr.rel (!%p21_p13) target bundleno = 8 (0x8), region = 108 }
 0x524   :  { %4773 = vsyncpa [#allocation4], 1 }
 0x525   :  { %4775 = vsyncpa [#allocation4 + $0x1], 1 }
 0x526   :  { %4776 = vsyncpa [#allocation7], 1 }
 0x527   :  { %4777 = vsyncpa [#allocation5], 1 }
 0x528   :  { %4779 = vsyncpa [#allocation5 + $0x1], 1 }

</bundles_post_ra>
